<compile_context>
chip_gen: v5e
topology: v5e:2x2
jax: 0.10.0
libtpu: 0.0.40
codegen_flags: <defaults>
</compile_context>

<pallas_src>
import functools

import jax
import jax.numpy as jnp
from jax.experimental import pallas as pl
from jax.experimental.pallas import tpu as pltpu


def _round_up(x, m):
    return (x + m - 1) // m * m


def _pick_tm(M, split_at=256, cap=512):
    """M-tile choice: multiple of 16 (bf16 sublane packing).  Above `split_at`, split the
    M-grid into >=2 steps so the "parallel" grid can shard across v7x's 2 TensorCores
    (costs ~0.35us/extra step on single-TC v5e/v6e).  `cap` bounds the per-step VMEM
    footprint (patches tile is double-buffered; at K=2048 bf16 a 512-row tile is ~2 MiB
    x2 + 512 KiB resident weight -- safe on v7x's 64 MiB without raising limits)."""
    m16 = _round_up(M, 16)
    if m16 < split_at:
        return m16
    return min(cap, _round_up(m16 // 2, 16))


# ----------------------------- Pallas kernels ---------------------------------

def _conv_matmul_kernel(p_ref, w_ref, shift_ref, o_ref, *, slope):
    """im2col matmul (bf16 MXU, f32 accumulate) + per-channel shift + LeakyReLU.
    The BN / identity scale is pre-folded into the bf16 weight columns."""
    y = jnp.dot(p_ref[...], w_ref[...], preferred_element_type=jnp.float32) + shift_ref[...]
    if slope is not None:
        y = jnp.maximum(y, slope * y)          # LeakyReLU (valid for 0 < slope < 1)
    o_ref[...] = y.astype(o_ref.dtype)


def _trunk_c4_kernel(p_ref, w0_ref, s0_ref, w1s_ref, s1_ref, wc4_ref, sc4_ref,
                     trunk_ref, c4_ref, *, slope):
    """Fused trunk (conv k2/s2 + LReLU -> conv k2/s2 + BN + LReLU) + Cout=1 c4 tail conv.

    p_ref     : (16, tm, 4*Cin) bf16, offset o = (d*2+e)*4 + (dh*2+dw), rows = (b,h2,w2)
    w0_ref    : (4*Cin, cp0)    bf16 trunk0 weight (scale-folded, lane padded)
    w1s_ref   : (4, cp0, cp1)   bf16 trunk1 weight split per (dh,dw) offset (row/lane padded)
    wc4_ref   : (4, cp1, cpt)   bf16 c4 weight split per (d,e) offset
    trunk_ref : (4, tm, cp1)    bf16 trunk feature map, leading dim = d*2+e
    c4_ref    : (tm, cpt)       f32 c4 output map
    Padded lanes/rows of every weight are zero, so padded channels stay exactly zero.
    """
    w0 = w0_ref[...]
    s0 = s0_ref[...]
    s1 = s1_ref[...]
    c4_acc = None
    for de in range(4):                 # (d, e): position inside the c4 2x2 window
        acc1 = None
        for j in range(4):              # (dh, dw): position inside the trunk1 2x2 window
            a = jnp.dot(p_ref[de * 4 + j], w0, preferred_element_type=jnp.float32) + s0
            y = jnp.maximum(a, slope * a).astype(jnp.bfloat16)       # trunk0 + LeakyReLU
            d1 = jnp.dot(y, w1s_ref[j], preferred_element_type=jnp.float32)
            acc1 = d1 if acc1 is None else acc1 + d1
        z = acc1 + s1                                                # trunk1 conv + BN shift
        z = jnp.maximum(z, slope * z)                                # LeakyReLU
        zb = z.astype(jnp.bfloat16)
        trunk_ref[de] = zb                                           # bf16 feature for c1
        d4 = jnp.dot(zb, wc4_ref[de], preferred_element_type=jnp.float32)
        c4_acc = d4 if c4_acc is None else c4_acc + d4
    c4_ref[...] = c4_acc + sc4_ref[...]                              # c4 conv bias (no LReLU)


# ------------------------------ kernel wrappers --------------------------------

def fused_conv_matmul(patches, weight_bf16, shift, slope, out_dtype):
    """patches: (M, K) bf16; weight: (K, Cp) bf16 scale-folded; shift: (1, Cp) f32."""
    if patches.dtype != jnp.bfloat16:
        patches = patches.astype(jnp.bfloat16)
    M, K = patches.shape
    Kw, Cp = weight_bf16.shape
    assert K == Kw and Cp % 128 == 0
    tm = _pick_tm(M)
    m_pad = _round_up(M, tm)
    if m_pad != M:
        patches = jnp.pad(patches, ((0, m_pad - M), (0, 0)))  # padded rows sliced off later
    return pl.pallas_call(
        functools.partial(_conv_matmul_kernel, slope=slope),
        out_shape=jax.ShapeDtypeStruct((m_pad, Cp), out_dtype),
        grid=(m_pad // tm,),
        in_specs=[
            pl.BlockSpec((tm, K), lambda i: (i, 0)),     # patches tile (pipelined)
            pl.BlockSpec((K, Cp), lambda i: (0, 0)),     # weight (resident)
            pl.BlockSpec((1, Cp), lambda i: (0, 0)),     # shift
        ],
        out_specs=pl.BlockSpec((tm, Cp), lambda i: (i, 0)),   # lane-dense (Cp = 128k)
        compiler_params=pltpu.CompilerParams(dimension_semantics=("parallel",)),
    )(patches, weight_bf16, shift)


def fused_trunk_c4(x_nhwc, arr, st):
    """x: (B, H, W, Cin) bf16, H and W divisible by 8.  One pallas_call for the full trunk
    plus the c4 tail.  Returns (trunk_bf, c4_raw, (H2, W2))."""
    B, H, W, C = x_nhwc.shape
    assert H % 8 == 0 and W % 8 == 0, "fused trunk kernel needs H, W divisible by 8"
    H2, W2 = H // 8, W // 8
    # k=2/s=2 patches are disjoint 2x2 blocks -> im2col is a pure layout change:
    # one reshape + one transpose, no data duplication.
    p = x_nhwc.reshape(B, H2, 2, 2, 2, W2, 2, 2, 2, C)
    #            dims: (b, h2, d, dh, kh, w2, e, dw, kw, c)
    p = jnp.transpose(p, (2, 6, 3, 7, 0, 1, 5, 4, 8, 9))
    #            dims: (d, e, dh, dw, b, h2, w2, kh, kw, c)
    M = B * H2 * W2
    K0 = 4 * C
    p = p.reshape(16, M, K0)

    cp0 = arr["w0"].shape[1]
    cp1 = arr["w1s"].shape[2]
    cpt = arr["wc4"].shape[2]
    tm = _pick_tm(M, split_at=64)   # heaviest kernel of the net: let v7x use both TCs
    m_pad = _round_up(M, tm)
    if m_pad != M:
        p = jnp.pad(p, ((0, 0), (0, m_pad - M), (0, 0)))

    trunk_bf, c4_raw = pl.pallas_call(
        functools.partial(_trunk_c4_kernel, slope=st["slope"]),
        out_shape=(jax.ShapeDtypeStruct((4, m_pad, cp1), jnp.bfloat16),
                   jax.ShapeDtypeStruct((m_pad, cpt), jnp.float32)),
        grid=(m_pad // tm,),
        in_specs=[
            pl.BlockSpec((16, tm, K0), lambda i: (0, i, 0)),   # patch tensor (pipelined)
            pl.BlockSpec((K0, cp0), lambda i: (0, 0)),          # resident weights / shifts
            pl.BlockSpec((1, cp0), lambda i: (0, 0)),
            pl.BlockSpec((4, cp0, cp1), lambda i: (0, 0, 0)),
            pl.BlockSpec((1, cp1), lambda i: (0, 0)),
            pl.BlockSpec((4, cp1, cpt), lambda i: (0, 0, 0)),
            pl.BlockSpec((1, cpt), lambda i: (0, 0)),
        ],
        out_specs=(pl.BlockSpec((4, tm, cp1), lambda i: (0, i, 0)),
                   pl.BlockSpec((tm, cpt), lambda i: (i, 0))),
        compiler_params=pltpu.CompilerParams(dimension_semantics=("parallel",)),
    )(p, arr["w0"], arr["s0"], arr["w1s"], arr["s1"], arr["wc4"], arr["sc4"])
    return trunk_bf, c4_raw, (H2, W2)


# ------------------------------ JAX glue --------------------------------------

def _im2col(x_nhwc, kh, kw, stride):
    """x: (N, H, W, C) -> patches (N*Ho*Wo, kh*kw*C) ordered (kh, kw, c)."""
    N, H, W, C = x_nhwc.shape
    Ho = (H - kh) // stride + 1
    Wo = (W - kw) // stride + 1
    cols = []
    for i in range(kh):
        for j in range(kw):
            cols.append(x_nhwc[:, i:i + stride * Ho:stride, j:j + stride * Wo:stride, :])
    p = jnp.stack(cols, axis=3)  # (N, Ho, Wo, kh*kw, C)
    return p.reshape(N * Ho * Wo, kh * kw * C), (N, Ho, Wo)


def _conv_layer(x_nhwc, arr, st):
    """One Conv2d(+folded affine)(+LeakyReLU) via wrapper-side im2col + Pallas matmul."""
    kh, kw, stride, pad, cout = st["kh"], st["kw"], st["stride"], st["pad"], st["cout"]
    if pad:
        x_nhwc = jnp.pad(x_nhwc, ((0, 0), (pad, pad), (pad, pad), (0, 0)))
    patches, (N, Ho, Wo) = _im2col(x_nhwc, kh, kw, stride)
    out = fused_conv_matmul(patches, arr["w"], arr["shift"], st["lrelu"], st["out_dtype"])
    out = out[:N * Ho * Wo, :cout]          # single combined (rows, lane-padding) slice
    return out.reshape(N, Ho, Wo, cout)


def prepare_params(raw_params, c_align=128):
    """Hoist per-forward work: OIHW->(K,Cout) reorder, BN-scale folding into the bf16
    weight columns, lane padding to 128, and per-offset weight stacking for the fused
    trunk+c4 kernel."""

    def w2d_folded(layer):
        w = layer["w"]                                   # (Cout, Cin, kh, kw)
        cout, cin, kh, kw = w.shape
        w2 = jnp.transpose(w, (2, 3, 1, 0)).reshape(kh * kw * cin, cout)
        w2 = w2 * layer["scale"].astype(jnp.float32)[None, :]   # fold scale BEFORE bf16 cast
        return w2, cout, cin, kh, kw

    def prep_generic(layer, out_dtype):
        w2, cout, cin, kh, kw = w2d_folded(layer)
        cp = _round_up(cout, c_align)
        w2 = jnp.pad(w2, ((0, 0), (0, cp - cout))).astype(jnp.bfloat16)
        shift = jnp.pad(layer["shift"].astype(jnp.float32), (0, cp - cout)).reshape(1, cp)
        arrays = dict(w=w2, shift=shift)
        static = dict(kh=kh, kw=kw, stride=layer["stride"], pad=layer["pad"],
                      lrelu=layer["lrelu"], cout=cout, out_dtype=out_dtype)
        return arrays, static

    # --- fused trunk (first + downsample) + c4 tail ---
    trunk, c4 = raw_params["trunk"], raw_params["c4"]
    assert len(trunk) == 2 and len(c4) == 1, "fused trunk kernel assumes n_layers == 3"
    for l in trunk + c4:
        assert l["w"].shape[2:] == (2, 2) and l["stride"] == 2 and l["pad"] == 0
    assert trunk[0]["lrelu"] == trunk[1]["lrelu"] and trunk[0]["lrelu"] is not None
    assert c4[0]["lrelu"] is None

    w0_2d, cout0, cin0, _, _ = w2d_folded(trunk[0])
    w1_2d, cout1, cin1, _, _ = w2d_folded(trunk[1])
    wc4_2d, coutt, cint, _, _ = w2d_folded(c4[0])
    assert cin1 == cout0 and cint == cout1
    cp0 = _round_up(cout0, c_align)
    cp1 = _round_up(cout1, c_align)
    cpt = _round_up(coutt, c_align)

    w0 = jnp.pad(w0_2d, ((0, 0), (0, cp0 - cout0))).astype(jnp.bfloat16)
    s0 = jnp.pad(trunk[0]["shift"].astype(jnp.float32), (0, cp0 - cout0)).reshape(1, cp0)
    # per-(dh,dw) / per-(d,e) slices of the K = 2*2*Cin weight, zero padded on both axes
    # so the zero-padded channels of the previous stage contribute nothing.
    w1s = jnp.pad(w1_2d.reshape(4, cin1, cout1),
                  ((0, 0), (0, cp0 - cin1), (0, cp1 - cout1))).astype(jnp.bfloat16)
    s1 = jnp.pad(trunk[1]["shift"].astype(jnp.float32), (0, cp1 - cout1)).reshape(1, cp1)
    wc4 = jnp.pad(wc4_2d.reshape(4, cint, coutt),
                  ((0, 0), (0, cp1 - cint), (0, cpt - coutt))).astype(jnp.bfloat16)
    sc4 = jnp.pad(c4[0]["shift"].astype(jnp.float32), (0, cpt - coutt)).reshape(1, cpt)

    trunk_arrays = dict(w0=w0, s0=s0, w1s=w1s, s1=s1, wc4=wc4, sc4=sc4)
    trunk_static = dict(slope=trunk[0]["lrelu"], cout=cout1, cout_c4=coutt)

    c1_arrays, c1_statics = [], []
    for idx, layer in enumerate(raw_params["c1"]):
        last = idx == len(raw_params["c1"]) - 1
        a, s = prep_generic(layer, jnp.float32 if last else jnp.bfloat16)
        c1_arrays.append(a)
        c1_statics.append(s)

    return (dict(trunk=trunk_arrays, c1=c1_arrays),
            dict(trunk=trunk_static, c1=c1_statics))


def build_forward(statics):
    """Return a jitted forward(arrays, input1, input2) -> (feature_c1, feature_c4)."""
    ts = statics["trunk"]
    c1_statics = statics["c1"]

    def forward(arrays, input1, input2):
        n1, n2 = input1.shape[0], input2.shape[0]
        # Shared trunk weights: run the fused trunk+c4 kernel ONCE over the concatenated
        # batch; activations are bf16 from here on.
        x = jnp.concatenate([input1, input2], axis=0).astype(jnp.bfloat16)
        x = jnp.transpose(x, (0, 2, 3, 1))                       # NCHW -> NHWC
        trunk_bf, c4_raw, (H2, W2) = fused_trunk_c4(x, arrays["trunk"], ts)

        cout1 = ts["cout"]
        m1 = n1 * H2 * W2
        # c1 branch (input1): un-permute the (d,e)-grouped rows back to (b, h1, w1, c).
        t = trunk_bf[:, :m1, :cout1].reshape(2, 2, n1, H2, W2, cout1)
        t = jnp.transpose(t, (2, 3, 0, 4, 1, 5)).reshape(n1, 2 * H2, 2 * W2, cout1)
        for arr, st in zip(arrays["c1"], c1_statics):
            t = _conv_layer(t, arr, st)
        feature_c1 = jnp.transpose(t, (0, 3, 1, 2))              # NHWC -> NCHW

        # c4 branch (input2): rows [m1, m1 + n2*H2*W2) of the fused kernel's 2nd output.
        ct = ts["cout_c4"]
        c4 = c4_raw[m1:m1 + n2 * H2 * W2, :ct].reshape(n2, H2, W2, ct)
        feature_c4 = jnp.transpose(c4, (0, 3, 1, 2))
        return feature_c1, feature_c4

    return jax.jit(forward)


# --------------------------- parameter init -----------------------------------

def init_params(key, input_nc, ndf=16, n_layers=3, eps=1e-5):
    keys = iter(jax.random.split(key, 64))

    def conv_w(cout, cin, k):
        return 0.02 * jax.random.normal(next(keys), (cout, cin, k, k), jnp.float32)

    def conv_b(cout):
        return 0.02 * jax.random.normal(next(keys), (cout,), jnp.float32)

    def bn_affine(c):
        gamma = 1.0 + 0.1 * jax.random.normal(next(keys), (c,), jnp.float32)
        beta = 0.1 * jax.random.normal(next(keys), (c,), jnp.float32)
        rm = 0.1 * jax.random.normal(next(keys), (c,), jnp.float32)
        rv = 1.0 + jnp.abs(0.1 * jax.random.normal(next(keys), (c,), jnp.float32))
        scale = gamma / jnp.sqrt(rv + eps)
        shift = beta - rm * scale
        return scale, shift

    # norm_layer == BatchNorm2d  ->  use_bias = False for the normalized convs
    trunk = []
    # self.first: Conv(input_nc, ndf, k=2, s=2, p=0, bias=True) + LeakyReLU(0.2)
    trunk.append(dict(w=conv_w(ndf, input_nc, 2), scale=jnp.ones((ndf,), jnp.float32),
                      shift=conv_b(ndf), stride=2, pad=0, lrelu=0.2))
    # self.downsample
    nf_mult, nf_mult_prev, temp = 1, 1, 0
    for n in range(1, n_layers - 1):
        nf_mult_prev = nf_mult
        nf_mult = min(2 ** n, 8)
        scale, shift = bn_affine(ndf * nf_mult)
        trunk.append(dict(w=conv_w(ndf * nf_mult, ndf * nf_mult_prev, 2),
                          scale=scale, shift=shift, stride=2, pad=0, lrelu=0.2))
        temp = n

    # self.model_c1
    c1 = []
    nf_mult_prev = nf_mult
    nf_mult = min(2 ** temp, 8)
    scale, shift = bn_affine(ndf * nf_mult)
    c1.append(dict(w=conv_w(ndf * nf_mult, ndf * nf_mult_prev, 4),
                   scale=scale, shift=shift, stride=2, pad=1, lrelu=0.2))
    nf_mult_prev = nf_mult
    nf_mult = min(2 ** n_layers, 8)
    scale, shift = bn_affine(ndf * nf_mult)
    c1.append(dict(w=conv_w(ndf * nf_mult, ndf * nf_mult_prev, 4),
                   scale=scale, shift=shift, stride=1, pad=1, lrelu=0.2))
    c1.append(dict(w=conv_w(1, ndf * nf_mult, 4), scale=jnp.ones((1,), jnp.float32),
                   shift=conv_b(1), stride=1, pad=1, lrelu=None))

    # self.model_c4
    c4 = [dict(w=conv_w(1, ndf * nf_mult_prev, 2), scale=jnp.ones((1,), jnp.float32),
               shift=conv_b(1), stride=2, pad=0, lrelu=None)]

    return dict(trunk=trunk, c1=c1, c4=c4)


# ------------------------------ reference -------------------------------------

def _ref_layer(x_nchw, layer):
    out = jax.lax.conv_general_dilated(
        x_nchw, layer["w"], (layer["stride"], layer["stride"]),
        [(layer["pad"], layer["pad"]), (layer["pad"], layer["pad"])],
        dimension_numbers=("NCHW", "OIHW", "NCHW"),
        precision=jax.lax.Precision.HIGHEST)
    out = out * layer["scale"][None, :, None, None] + layer["shift"][None, :, None, None]
    if layer["lrelu"] is not None:
        out = jnp.where(out > 0, out, layer["lrelu"] * out)
    return out


def _ref_forward(params, input1, input2):
    r1 = input1
    for layer in params["trunk"] + params["c1"]:
        r1 = _ref_layer(r1, layer)
    r4 = input2
    for layer in params["trunk"] + params["c4"]:
        r4 = _ref_layer(r4, layer)
    return r1, r4


# --------------------------------- main ----------------------------------------

if __name__ == "__main__":
    key = jax.random.PRNGKey(0)
    kp, k1, k2 = jax.random.split(key, 3)

    input_nc, ndf, n_layers = 3, 16, 3
    N, H, W = 2, 32, 32

    raw_params = init_params(kp, input_nc, ndf=ndf, n_layers=n_layers)
    arrays, statics = prepare_params(raw_params)
    forward = build_forward(statics)

    input1 = jax.random.normal(k1, (N, input_nc, H, W), jnp.float32)
    input2 = jax.random.normal(k2, (N, input_nc, H, W), jnp.float32)

    feature_c1, feature_c4 = forward(arrays, input1, input2)
    jax.block_until_ready((feature_c1, feature_c4))

    # shape checks (32 -> first/2 -> 16 -> down/2 -> 8 ; c1: 4 -> 3 -> 2 ; c4: 8/2 = 4)
    assert feature_c1.shape == (N, 1, 2, 2), feature_c1.shape
    assert feature_c4.shape == (N, 1, 4, 4), feature_c4.shape

    # numerical check against plain-JAX f32 reference (kernel matmuls / activations are bf16)
    ref1, ref4 = _ref_forward(raw_params, input1, input2)
    err1 = float(jnp.max(jnp.abs(feature_c1 - ref1)))
    err4 = float(jnp.max(jnp.abs(feature_c4 - ref4)))
    assert jnp.allclose(feature_c1, ref1, rtol=5e-2, atol=5e-2), err1
    assert jnp.allclose(feature_c4, ref4, rtol=5e-2, atol=5e-2), err4

    print("KERNEL_OK")
</pallas_src>

<mosaic_0001>
module attributes {stable_mosaic.version = 11 : i64} {
  func.func @_trunk_c4_kernel(%arg0: i32, %arg1: memref<16x32x12xbf16, #tpu.memory_space<vmem>>, %arg2: memref<12x128xbf16, #tpu.memory_space<vmem>>, %arg3: memref<1x128xf32, #tpu.memory_space<vmem>>, %arg4: memref<4x128x128xbf16, #tpu.memory_space<vmem>>, %arg5: memref<1x128xf32, #tpu.memory_space<vmem>>, %arg6: memref<4x128x128xbf16, #tpu.memory_space<vmem>>, %arg7: memref<1x128xf32, #tpu.memory_space<vmem>>, %arg8: memref<4x32x128xbf16, #tpu.memory_space<vmem>>, %arg9: memref<32x128xf32, #tpu.memory_space<vmem>>) attributes {dimension_semantics = [#tpu.dimension_semantics<parallel>], iteration_bounds = array<i64: 2>, scalar_prefetch = 0 : i64, scratch_operands = 0 : i64, tpu.core_type = #tpu.core_type<tc>, window_params = [{transform_indices = @transform_0, window_bounds = array<i64: 16, 32, 12>}, {pipeline_mode = #tpu.pipeline_mode<synchronous>, transform_indices = @transform_1, window_bounds = array<i64: 12, 128>}, {pipeline_mode = #tpu.pipeline_mode<synchronous>, transform_indices = @transform_2, window_bounds = array<i64: 1, 128>}, {pipeline_mode = #tpu.pipeline_mode<synchronous>, transform_indices = @transform_3, window_bounds = array<i64: 4, 128, 128>}, {pipeline_mode = #tpu.pipeline_mode<synchronous>, transform_indices = @transform_4, window_bounds = array<i64: 1, 128>}, {pipeline_mode = #tpu.pipeline_mode<synchronous>, transform_indices = @transform_5, window_bounds = array<i64: 4, 128, 128>}, {pipeline_mode = #tpu.pipeline_mode<synchronous>, transform_indices = @transform_6, window_bounds = array<i64: 1, 128>}, {transform_indices = @transform_7, window_bounds = array<i64: 4, 32, 128>}, {transform_indices = @transform_8, window_bounds = array<i64: 32, 128>}]} {
    %c0 = arith.constant 0 : index
    %c0_0 = arith.constant 0 : index
    %0 = vector.load %arg2[%c0, %c0_0] : memref<12x128xbf16, #tpu.memory_space<vmem>>, vector<12x128xbf16>
    %c0_1 = arith.constant 0 : index
    %c0_2 = arith.constant 0 : index
    %1 = vector.load %arg3[%c0_1, %c0_2] : memref<1x128xf32, #tpu.memory_space<vmem>>, vector<1x128xf32>
    %c0_3 = arith.constant 0 : index
    %c0_4 = arith.constant 0 : index
    %2 = vector.load %arg5[%c0_3, %c0_4] : memref<1x128xf32, #tpu.memory_space<vmem>>, vector<1x128xf32>
    %c0_5 = arith.constant 0 : index
    %c0_6 = arith.constant 0 : index
    %c0_7 = arith.constant 0 : index
    %3 = vector.load %arg1[%c0_5, %c0_6, %c0_7] : memref<16x32x12xbf16, #tpu.memory_space<vmem>>, vector<1x32x12xbf16>
    %4 = vector.shape_cast %3 : vector<1x32x12xbf16> to vector<32x12xbf16>
    %cst = arith.constant dense<0.000000e+00> : vector<32x128xf32>
    %5 = tpu.matmul %4, %0, %cst {dimension_numbers = #tpu.dot_dimension_numbers<[1], [0], [0], [1], [0, 0, 1, 1], [], []>} : vector<32x12xbf16>, vector<12x128xbf16>, vector<32x128xf32> -> vector<32x128xf32>
    %6 = vector.broadcast %1 : vector<1x128xf32> to vector<32x128xf32>
    %7 = arith.addf %5, %6 : vector<32x128xf32>
    %cst_8 = arith.constant 2.000000e-01 : f32
    %8 = vector.broadcast %cst_8 : f32 to vector<32x128xf32>
    %9 = arith.mulf %8, %7 : vector<32x128xf32>
    %10 = arith.maximumf %7, %9 : vector<32x128xf32>
    %11 = arith.truncf %10 : vector<32x128xf32> to vector<32x128xbf16>
    %c0_9 = arith.constant 0 : index
    %c0_10 = arith.constant 0 : index
    %c0_11 = arith.constant 0 : index
    %12 = vector.load %arg4[%c0_9, %c0_10, %c0_11] : memref<4x128x128xbf16, #tpu.memory_space<vmem>>, vector<1x128x128xbf16>
    %13 = vector.shape_cast %12 : vector<1x128x128xbf16> to vector<128x128xbf16>
    %cst_12 = arith.constant dense<0.000000e+00> : vector<32x128xf32>
    %14 = tpu.matmul %11, %13, %cst_12 {dimension_numbers = #tpu.dot_dimension_numbers<[1], [0], [0], [1], [0, 0, 1, 1], [], []>} : vector<32x128xbf16>, vector<128x128xbf16>, vector<32x128xf32> -> vector<32x128xf32>
    %c1 = arith.constant 1 : index
    %c0_13 = arith.constant 0 : index
    %c0_14 = arith.constant 0 : index
    %15 = vector.load %arg1[%c1, %c0_13, %c0_14] : memref<16x32x12xbf16, #tpu.memory_space<vmem>>, vector<1x32x12xbf16>
    %16 = vector.shape_cast %15 : vector<1x32x12xbf16> to vector<32x12xbf16>
    %cst_15 = arith.constant dense<0.000000e+00> : vector<32x128xf32>
    %17 = tpu.matmul %16, %0, %cst_15 {dimension_numbers = #tpu.dot_dimension_numbers<[1], [0], [0], [1], [0, 0, 1, 1], [], []>} : vector<32x12xbf16>, vector<12x128xbf16>, vector<32x128xf32> -> vector<32x128xf32>
    %18 = vector.broadcast %1 : vector<1x128xf32> to vector<32x128xf32>
    %19 = arith.addf %17, %18 : vector<32x128xf32>
    %cst_16 = arith.constant 2.000000e-01 : f32
    %20 = vector.broadcast %cst_16 : f32 to vector<32x128xf32>
    %21 = arith.mulf %20, %19 : vector<32x128xf32>
    %22 = arith.maximumf %19, %21 : vector<32x128xf32>
    %23 = arith.truncf %22 : vector<32x128xf32> to vector<32x128xbf16>
    %c1_17 = arith.constant 1 : index
    %c0_18 = arith.constant 0 : index
    %c0_19 = arith.constant 0 : index
    %24 = vector.load %arg4[%c1_17, %c0_18, %c0_19] : memref<4x128x128xbf16, #tpu.memory_space<vmem>>, vector<1x128x128xbf16>
    %25 = vector.shape_cast %24 : vector<1x128x128xbf16> to vector<128x128xbf16>
    %cst_20 = arith.constant dense<0.000000e+00> : vector<32x128xf32>
    %26 = tpu.matmul %23, %25, %cst_20 {dimension_numbers = #tpu.dot_dimension_numbers<[1], [0], [0], [1], [0, 0, 1, 1], [], []>} : vector<32x128xbf16>, vector<128x128xbf16>, vector<32x128xf32> -> vector<32x128xf32>
    %27 = arith.addf %14, %26 : vector<32x128xf32>
    %c2 = arith.constant 2 : index
    %c0_21 = arith.constant 0 : index
    %c0_22 = arith.constant 0 : index
    %28 = vector.load %arg1[%c2, %c0_21, %c0_22] : memref<16x32x12xbf16, #tpu.memory_space<vmem>>, vector<1x32x12xbf16>
    %29 = vector.shape_cast %28 : vector<1x32x12xbf16> to vector<32x12xbf16>
    %cst_23 = arith.constant dense<0.000000e+00> : vector<32x128xf32>
    %30 = tpu.matmul %29, %0, %cst_23 {dimension_numbers = #tpu.dot_dimension_numbers<[1], [0], [0], [1], [0, 0, 1, 1], [], []>} : vector<32x12xbf16>, vector<12x128xbf16>, vector<32x128xf32> -> vector<32x128xf32>
    %31 = vector.broadcast %1 : vector<1x128xf32> to vector<32x128xf32>
    %32 = arith.addf %30, %31 : vector<32x128xf32>
    %cst_24 = arith.constant 2.000000e-01 : f32
    %33 = vector.broadcast %cst_24 : f32 to vector<32x128xf32>
    %34 = arith.mulf %33, %32 : vector<32x128xf32>
    %35 = arith.maximumf %32, %34 : vector<32x128xf32>
    %36 = arith.truncf %35 : vector<32x128xf32> to vector<32x128xbf16>
    %c2_25 = arith.constant 2 : index
    %c0_26 = arith.constant 0 : index
    %c0_27 = arith.constant 0 : index
    %37 = vector.load %arg4[%c2_25, %c0_26, %c0_27] : memref<4x128x128xbf16, #tpu.memory_space<vmem>>, vector<1x128x128xbf16>
    %38 = vector.shape_cast %37 : vector<1x128x128xbf16> to vector<128x128xbf16>
    %cst_28 = arith.constant dense<0.000000e+00> : vector<32x128xf32>
    %39 = tpu.matmul %36, %38, %cst_28 {dimension_numbers = #tpu.dot_dimension_numbers<[1], [0], [0], [1], [0, 0, 1, 1], [], []>} : vector<32x128xbf16>, vector<128x128xbf16>, vector<32x128xf32> -> vector<32x128xf32>
    %40 = arith.addf %27, %39 : vector<32x128xf32>
    %c3 = arith.constant 3 : index
    %c0_29 = arith.constant 0 : index
    %c0_30 = arith.constant 0 : index
    %41 = vector.load %arg1[%c3, %c0_29, %c0_30] : memref<16x32x12xbf16, #tpu.memory_space<vmem>>, vector<1x32x12xbf16>
    %42 = vector.shape_cast %41 : vector<1x32x12xbf16> to vector<32x12xbf16>
    %cst_31 = arith.constant dense<0.000000e+00> : vector<32x128xf32>
    %43 = tpu.matmul %42, %0, %cst_31 {dimension_numbers = #tpu.dot_dimension_numbers<[1], [0], [0], [1], [0, 0, 1, 1], [], []>} : vector<32x12xbf16>, vector<12x128xbf16>, vector<32x128xf32> -> vector<32x128xf32>
    %44 = vector.broadcast %1 : vector<1x128xf32> to vector<32x128xf32>
    %45 = arith.addf %43, %44 : vector<32x128xf32>
    %cst_32 = arith.constant 2.000000e-01 : f32
    %46 = vector.broadcast %cst_32 : f32 to vector<32x128xf32>
    %47 = arith.mulf %46, %45 : vector<32x128xf32>
    %48 = arith.maximumf %45, %47 : vector<32x128xf32>
    %49 = arith.truncf %48 : vector<32x128xf32> to vector<32x128xbf16>
    %c3_33 = arith.constant 3 : index
    %c0_34 = arith.constant 0 : index
    %c0_35 = arith.constant 0 : index
    %50 = vector.load %arg4[%c3_33, %c0_34, %c0_35] : memref<4x128x128xbf16, #tpu.memory_space<vmem>>, vector<1x128x128xbf16>
    %51 = vector.shape_cast %50 : vector<1x128x128xbf16> to vector<128x128xbf16>
    %cst_36 = arith.constant dense<0.000000e+00> : vector<32x128xf32>
    %52 = tpu.matmul %49, %51, %cst_36 {dimension_numbers = #tpu.dot_dimension_numbers<[1], [0], [0], [1], [0, 0, 1, 1], [], []>} : vector<32x128xbf16>, vector<128x128xbf16>, vector<32x128xf32> -> vector<32x128xf32>
    %53 = arith.addf %40, %52 : vector<32x128xf32>
    %54 = vector.broadcast %2 : vector<1x128xf32> to vector<32x128xf32>
    %55 = arith.addf %53, %54 : vector<32x128xf32>
    %cst_37 = arith.constant 2.000000e-01 : f32
    %56 = vector.broadcast %cst_37 : f32 to vector<32x128xf32>
    %57 = arith.mulf %56, %55 : vector<32x128xf32>
    %58 = arith.maximumf %55, %57 : vector<32x128xf32>
    %59 = arith.truncf %58 : vector<32x128xf32> to vector<32x128xbf16>
    %c0_38 = arith.constant 0 : index
    %c0_39 = arith.constant 0 : index
    %c0_40 = arith.constant 0 : index
    %60 = vector.load %arg8[%c0_38, %c0_39, %c0_40] : memref<4x32x128xbf16, #tpu.memory_space<vmem>>, vector<1x32x128xbf16>
    %61 = vector.shape_cast %60 : vector<1x32x128xbf16> to vector<32x128xbf16>
    %62 = vector.shape_cast %59 : vector<32x128xbf16> to vector<1x32x128xbf16>
    tpu.vector_store %arg8[%c0_38, %c0_39, %c0_40], %62 {strides = array<i32>} : memref<4x32x128xbf16, #tpu.memory_space<vmem>>, vector<1x32x128xbf16>,
    %c0_41 = arith.constant 0 : index
    %c0_42 = arith.constant 0 : index
    %c0_43 = arith.constant 0 : index
    %63 = vector.load %arg6[%c0_41, %c0_42, %c0_43] : memref<4x128x128xbf16, #tpu.memory_space<vmem>>, vector<1x128x128xbf16>
    %64 = vector.shape_cast %63 : vector<1x128x128xbf16> to vector<128x128xbf16>
    %cst_44 = arith.constant dense<0.000000e+00> : vector<32x128xf32>
    %65 = tpu.matmul %59, %64, %cst_44 {dimension_numbers = #tpu.dot_dimension_numbers<[1], [0], [0], [1], [0, 0, 1, 1], [], []>} : vector<32x128xbf16>, vector<128x128xbf16>, vector<32x128xf32> -> vector<32x128xf32>
    %c4 = arith.constant 4 : index
    %c0_45 = arith.constant 0 : index
    %c0_46 = arith.constant 0 : index
    %66 = vector.load %arg1[%c4, %c0_45, %c0_46] : memref<16x32x12xbf16, #tpu.memory_space<vmem>>, vector<1x32x12xbf16>
    %67 = vector.shape_cast %66 : vector<1x32x12xbf16> to vector<32x12xbf16>
    %cst_47 = arith.constant dense<0.000000e+00> : vector<32x128xf32>
    %68 = tpu.matmul %67, %0, %cst_47 {dimension_numbers = #tpu.dot_dimension_numbers<[1], [0], [0], [1], [0, 0, 1, 1], [], []>} : vector<32x12xbf16>, vector<12x128xbf16>, vector<32x128xf32> -> vector<32x128xf32>
    %69 = vector.broadcast %1 : vector<1x128xf32> to vector<32x128xf32>
    %70 = arith.addf %68, %69 : vector<32x128xf32>
    %cst_48 = arith.constant 2.000000e-01 : f32
    %71 = vector.broadcast %cst_48 : f32 to vector<32x128xf32>
    %72 = arith.mulf %71, %70 : vector<32x128xf32>
    %73 = arith.maximumf %70, %72 : vector<32x128xf32>
    %74 = arith.truncf %73 : vector<32x128xf32> to vector<32x128xbf16>
    %c0_49 = arith.constant 0 : index
    %c0_50 = arith.constant 0 : index
    %c0_51 = arith.constant 0 : index
    %75 = vector.load %arg4[%c0_49, %c0_50, %c0_51] : memref<4x128x128xbf16, #tpu.memory_space<vmem>>, vector<1x128x128xbf16>
    %76 = vector.shape_cast %75 : vector<1x128x128xbf16> to vector<128x128xbf16>
    %cst_52 = arith.constant dense<0.000000e+00> : vector<32x128xf32>
    %77 = tpu.matmul %74, %76, %cst_52 {dimension_numbers = #tpu.dot_dimension_numbers<[1], [0], [0], [1], [0, 0, 1, 1], [], []>} : vector<32x128xbf16>, vector<128x128xbf16>, vector<32x128xf32> -> vector<32x128xf32>
    %c5 = arith.constant 5 : index
    %c0_53 = arith.constant 0 : index
    %c0_54 = arith.constant 0 : index
    %78 = vector.load %arg1[%c5, %c0_53, %c0_54] : memref<16x32x12xbf16, #tpu.memory_space<vmem>>, vector<1x32x12xbf16>
    %79 = vector.shape_cast %78 : vector<1x32x12xbf16> to vector<32x12xbf16>
    %cst_55 = arith.constant dense<0.000000e+00> : vector<32x128xf32>
    %80 = tpu.matmul %79, %0, %cst_55 {dimension_numbers = #tpu.dot_dimension_numbers<[1], [0], [0], [1], [0, 0, 1, 1], [], []>} : vector<32x12xbf16>, vector<12x128xbf16>, vector<32x128xf32> -> vector<32x128xf32>
    %81 = vector.broadcast %1 : vector<1x128xf32> to vector<32x128xf32>
    %82 = arith.addf %80, %81 : vector<32x128xf32>
    %cst_56 = arith.constant 2.000000e-01 : f32
    %83 = vector.broadcast %cst_56 : f32 to vector<32x128xf32>
    %84 = arith.mulf %83, %82 : vector<32x128xf32>
    %85 = arith.maximumf %82, %84 : vector<32x128xf32>
    %86 = arith.truncf %85 : vector<32x128xf32> to vector<32x128xbf16>
    %c1_57 = arith.constant 1 : index
    %c0_58 = arith.constant 0 : index
    %c0_59 = arith.constant 0 : index
    %87 = vector.load %arg4[%c1_57, %c0_58, %c0_59] : memref<4x128x128xbf16, #tpu.memory_space<vmem>>, vector<1x128x128xbf16>
    %88 = vector.shape_cast %87 : vector<1x128x128xbf16> to vector<128x128xbf16>
    %cst_60 = arith.constant dense<0.000000e+00> : vector<32x128xf32>
    %89 = tpu.matmul %86, %88, %cst_60 {dimension_numbers = #tpu.dot_dimension_numbers<[1], [0], [0], [1], [0, 0, 1, 1], [], []>} : vector<32x128xbf16>, vector<128x128xbf16>, vector<32x128xf32> -> vector<32x128xf32>
    %90 = arith.addf %77, %89 : vector<32x128xf32>
    %c6 = arith.constant 6 : index
    %c0_61 = arith.constant 0 : index
    %c0_62 = arith.constant 0 : index
    %91 = vector.load %arg1[%c6, %c0_61, %c0_62] : memref<16x32x12xbf16, #tpu.memory_space<vmem>>, vector<1x32x12xbf16>
    %92 = vector.shape_cast %91 : vector<1x32x12xbf16> to vector<32x12xbf16>
    %cst_63 = arith.constant dense<0.000000e+00> : vector<32x128xf32>
    %93 = tpu.matmul %92, %0, %cst_63 {dimension_numbers = #tpu.dot_dimension_numbers<[1], [0], [0], [1], [0, 0, 1, 1], [], []>} : vector<32x12xbf16>, vector<12x128xbf16>, vector<32x128xf32> -> vector<32x128xf32>
    %94 = vector.broadcast %1 : vector<1x128xf32> to vector<32x128xf32>
    %95 = arith.addf %93, %94 : vector<32x128xf32>
    %cst_64 = arith.constant 2.000000e-01 : f32
    %96 = vector.broadcast %cst_64 : f32 to vector<32x128xf32>
    %97 = arith.mulf %96, %95 : vector<32x128xf32>
    %98 = arith.maximumf %95, %97 : vector<32x128xf32>
    %99 = arith.truncf %98 : vector<32x128xf32> to vector<32x128xbf16>
    %c2_65 = arith.constant 2 : index
    %c0_66 = arith.constant 0 : index
    %c0_67 = arith.constant 0 : index
    %100 = vector.load %arg4[%c2_65, %c0_66, %c0_67] : memref<4x128x128xbf16, #tpu.memory_space<vmem>>, vector<1x128x128xbf16>
    %101 = vector.shape_cast %100 : vector<1x128x128xbf16> to vector<128x128xbf16>
    %cst_68 = arith.constant dense<0.000000e+00> : vector<32x128xf32>
    %102 = tpu.matmul %99, %101, %cst_68 {dimension_numbers = #tpu.dot_dimension_numbers<[1], [0], [0], [1], [0, 0, 1, 1], [], []>} : vector<32x128xbf16>, vector<128x128xbf16>, vector<32x128xf32> -> vector<32x128xf32>
    %103 = arith.addf %90, %102 : vector<32x128xf32>
    %c7 = arith.constant 7 : index
    %c0_69 = arith.constant 0 : index
    %c0_70 = arith.constant 0 : index
    %104 = vector.load %arg1[%c7, %c0_69, %c0_70] : memref<16x32x12xbf16, #tpu.memory_space<vmem>>, vector<1x32x12xbf16>
    %105 = vector.shape_cast %104 : vector<1x32x12xbf16> to vector<32x12xbf16>
    %cst_71 = arith.constant dense<0.000000e+00> : vector<32x128xf32>
    %106 = tpu.matmul %105, %0, %cst_71 {dimension_numbers = #tpu.dot_dimension_numbers<[1], [0], [0], [1], [0, 0, 1, 1], [], []>} : vector<32x12xbf16>, vector<12x128xbf16>, vector<32x128xf32> -> vector<32x128xf32>
    %107 = vector.broadcast %1 : vector<1x128xf32> to vector<32x128xf32>
    %108 = arith.addf %106, %107 : vector<32x128xf32>
    %cst_72 = arith.constant 2.000000e-01 : f32
    %109 = vector.broadcast %cst_72 : f32 to vector<32x128xf32>
    %110 = arith.mulf %109, %108 : vector<32x128xf32>
    %111 = arith.maximumf %108, %110 : vector<32x128xf32>
    %112 = arith.truncf %111 : vector<32x128xf32> to vector<32x128xbf16>
    %c3_73 = arith.constant 3 : index
    %c0_74 = arith.constant 0 : index
    %c0_75 = arith.constant 0 : index
    %113 = vector.load %arg4[%c3_73, %c0_74, %c0_75] : memref<4x128x128xbf16, #tpu.memory_space<vmem>>, vector<1x128x128xbf16>
    %114 = vector.shape_cast %113 : vector<1x128x128xbf16> to vector<128x128xbf16>
    %cst_76 = arith.constant dense<0.000000e+00> : vector<32x128xf32>
    %115 = tpu.matmul %112, %114, %cst_76 {dimension_numbers = #tpu.dot_dimension_numbers<[1], [0], [0], [1], [0, 0, 1, 1], [], []>} : vector<32x128xbf16>, vector<128x128xbf16>, vector<32x128xf32> -> vector<32x128xf32>
    %116 = arith.addf %103, %115 : vector<32x128xf32>
    %117 = vector.broadcast %2 : vector<1x128xf32> to vector<32x128xf32>
    %118 = arith.addf %116, %117 : vector<32x128xf32>
    %cst_77 = arith.constant 2.000000e-01 : f32
    %119 = vector.broadcast %cst_77 : f32 to vector<32x128xf32>
    %120 = arith.mulf %119, %118 : vector<32x128xf32>
    %121 = arith.maximumf %118, %120 : vector<32x128xf32>
    %122 = arith.truncf %121 : vector<32x128xf32> to vector<32x128xbf16>
    %c1_78 = arith.constant 1 : index
    %c0_79 = arith.constant 0 : index
    %c0_80 = arith.constant 0 : index
    %123 = vector.load %arg8[%c1_78, %c0_79, %c0_80] : memref<4x32x128xbf16, #tpu.memory_space<vmem>>, vector<1x32x128xbf16>
    %124 = vector.shape_cast %123 : vector<1x32x128xbf16> to vector<32x128xbf16>
    %125 = vector.shape_cast %122 : vector<32x128xbf16> to vector<1x32x128xbf16>
    tpu.vector_store %arg8[%c1_78, %c0_79, %c0_80], %125 {strides = array<i32>} : memref<4x32x128xbf16, #tpu.memory_space<vmem>>, vector<1x32x128xbf16>,
    %c1_81 = arith.constant 1 : index
    %c0_82 = arith.constant 0 : index
    %c0_83 = arith.constant 0 : index
    %126 = vector.load %arg6[%c1_81, %c0_82, %c0_83] : memref<4x128x128xbf16, #tpu.memory_space<vmem>>, vector<1x128x128xbf16>
    %127 = vector.shape_cast %126 : vector<1x128x128xbf16> to vector<128x128xbf16>
    %cst_84 = arith.constant dense<0.000000e+00> : vector<32x128xf32>
    %128 = tpu.matmul %122, %127, %cst_84 {dimension_numbers = #tpu.dot_dimension_numbers<[1], [0], [0], [1], [0, 0, 1, 1], [], []>} : vector<32x128xbf16>, vector<128x128xbf16>, vector<32x128xf32> -> vector<32x128xf32>
    %129 = arith.addf %65, %128 : vector<32x128xf32>
    %c8 = arith.constant 8 : index
    %c0_85 = arith.constant 0 : index
    %c0_86 = arith.constant 0 : index
    %130 = vector.load %arg1[%c8, %c0_85, %c0_86] : memref<16x32x12xbf16, #tpu.memory_space<vmem>>, vector<1x32x12xbf16>
    %131 = vector.shape_cast %130 : vector<1x32x12xbf16> to vector<32x12xbf16>
    %cst_87 = arith.constant dense<0.000000e+00> : vector<32x128xf32>
    %132 = tpu.matmul %131, %0, %cst_87 {dimension_numbers = #tpu.dot_dimension_numbers<[1], [0], [0], [1], [0, 0, 1, 1], [], []>} : vector<32x12xbf16>, vector<12x128xbf16>, vector<32x128xf32> -> vector<32x128xf32>
    %133 = vector.broadcast %1 : vector<1x128xf32> to vector<32x128xf32>
    %134 = arith.addf %132, %133 : vector<32x128xf32>
    %cst_88 = arith.constant 2.000000e-01 : f32
    %135 = vector.broadcast %cst_88 : f32 to vector<32x128xf32>
    %136 = arith.mulf %135, %134 : vector<32x128xf32>
    %137 = arith.maximumf %134, %136 : vector<32x128xf32>
    %138 = arith.truncf %137 : vector<32x128xf32> to vector<32x128xbf16>
    %c0_89 = arith.constant 0 : index
    %c0_90 = arith.constant 0 : index
    %c0_91 = arith.constant 0 : index
    %139 = vector.load %arg4[%c0_89, %c0_90, %c0_91] : memref<4x128x128xbf16, #tpu.memory_space<vmem>>, vector<1x128x128xbf16>
    %140 = vector.shape_cast %139 : vector<1x128x128xbf16> to vector<128x128xbf16>
    %cst_92 = arith.constant dense<0.000000e+00> : vector<32x128xf32>
    %141 = tpu.matmul %138, %140, %cst_92 {dimension_numbers = #tpu.dot_dimension_numbers<[1], [0], [0], [1], [0, 0, 1, 1], [], []>} : vector<32x128xbf16>, vector<128x128xbf16>, vector<32x128xf32> -> vector<32x128xf32>
    %c9 = arith.constant 9 : index
    %c0_93 = arith.constant 0 : index
    %c0_94 = arith.constant 0 : index
    %142 = vector.load %arg1[%c9, %c0_93, %c0_94] : memref<16x32x12xbf16, #tpu.memory_space<vmem>>, vector<1x32x12xbf16>
    %143 = vector.shape_cast %142 : vector<1x32x12xbf16> to vector<32x12xbf16>
    %cst_95 = arith.constant dense<0.000000e+00> : vector<32x128xf32>
    %144 = tpu.matmul %143, %0, %cst_95 {dimension_numbers = #tpu.dot_dimension_numbers<[1], [0], [0], [1], [0, 0, 1, 1], [], []>} : vector<32x12xbf16>, vector<12x128xbf16>, vector<32x128xf32> -> vector<32x128xf32>
    %145 = vector.broadcast %1 : vector<1x128xf32> to vector<32x128xf32>
    %146 = arith.addf %144, %145 : vector<32x128xf32>
    %cst_96 = arith.constant 2.000000e-01 : f32
    %147 = vector.broadcast %cst_96 : f32 to vector<32x128xf32>
    %148 = arith.mulf %147, %146 : vector<32x128xf32>
    %149 = arith.maximumf %146, %148 : vector<32x128xf32>
    %150 = arith.truncf %149 : vector<32x128xf32> to vector<32x128xbf16>
    %c1_97 = arith.constant 1 : index
    %c0_98 = arith.constant 0 : index
    %c0_99 = arith.constant 0 : index
    %151 = vector.load %arg4[%c1_97, %c0_98, %c0_99] : memref<4x128x128xbf16, #tpu.memory_space<vmem>>, vector<1x128x128xbf16>
    %152 = vector.shape_cast %151 : vector<1x128x128xbf16> to vector<128x128xbf16>
    %cst_100 = arith.constant dense<0.000000e+00> : vector<32x128xf32>
    %153 = tpu.matmul %150, %152, %cst_100 {dimension_numbers = #tpu.dot_dimension_numbers<[1], [0], [0], [1], [0, 0, 1, 1], [], []>} : vector<32x128xbf16>, vector<128x128xbf16>, vector<32x128xf32> -> vector<32x128xf32>
    %154 = arith.addf %141, %153 : vector<32x128xf32>
    %c10 = arith.constant 10 : index
    %c0_101 = arith.constant 0 : index
    %c0_102 = arith.constant 0 : index
    %155 = vector.load %arg1[%c10, %c0_101, %c0_102] : memref<16x32x12xbf16, #tpu.memory_space<vmem>>, vector<1x32x12xbf16>
    %156 = vector.shape_cast %155 : vector<1x32x12xbf16> to vector<32x12xbf16>
    %cst_103 = arith.constant dense<0.000000e+00> : vector<32x128xf32>
    %157 = tpu.matmul %156, %0, %cst_103 {dimension_numbers = #tpu.dot_dimension_numbers<[1], [0], [0], [1], [0, 0, 1, 1], [], []>} : vector<32x12xbf16>, vector<12x128xbf16>, vector<32x128xf32> -> vector<32x128xf32>
    %158 = vector.broadcast %1 : vector<1x128xf32> to vector<32x128xf32>
    %159 = arith.addf %157, %158 : vector<32x128xf32>
    %cst_104 = arith.constant 2.000000e-01 : f32
    %160 = vector.broadcast %cst_104 : f32 to vector<32x128xf32>
    %161 = arith.mulf %160, %159 : vector<32x128xf32>
    %162 = arith.maximumf %159, %161 : vector<32x128xf32>
    %163 = arith.truncf %162 : vector<32x128xf32> to vector<32x128xbf16>
    %c2_105 = arith.constant 2 : index
    %c0_106 = arith.constant 0 : index
    %c0_107 = arith.constant 0 : index
    %164 = vector.load %arg4[%c2_105, %c0_106, %c0_107] : memref<4x128x128xbf16, #tpu.memory_space<vmem>>, vector<1x128x128xbf16>
    %165 = vector.shape_cast %164 : vector<1x128x128xbf16> to vector<128x128xbf16>
    %cst_108 = arith.constant dense<0.000000e+00> : vector<32x128xf32>
    %166 = tpu.matmul %163, %165, %cst_108 {dimension_numbers = #tpu.dot_dimension_numbers<[1], [0], [0], [1], [0, 0, 1, 1], [], []>} : vector<32x128xbf16>, vector<128x128xbf16>, vector<32x128xf32> -> vector<32x128xf32>
    %167 = arith.addf %154, %166 : vector<32x128xf32>
    %c11 = arith.constant 11 : index
    %c0_109 = arith.constant 0 : index
    %c0_110 = arith.constant 0 : index
    %168 = vector.load %arg1[%c11, %c0_109, %c0_110] : memref<16x32x12xbf16, #tpu.memory_space<vmem>>, vector<1x32x12xbf16>
    %169 = vector.shape_cast %168 : vector<1x32x12xbf16> to vector<32x12xbf16>
    %cst_111 = arith.constant dense<0.000000e+00> : vector<32x128xf32>
    %170 = tpu.matmul %169, %0, %cst_111 {dimension_numbers = #tpu.dot_dimension_numbers<[1], [0], [0], [1], [0, 0, 1, 1], [], []>} : vector<32x12xbf16>, vector<12x128xbf16>, vector<32x128xf32> -> vector<32x128xf32>
    %171 = vector.broadcast %1 : vector<1x128xf32> to vector<32x128xf32>
    %172 = arith.addf %170, %171 : vector<32x128xf32>
    %cst_112 = arith.constant 2.000000e-01 : f32
    %173 = vector.broadcast %cst_112 : f32 to vector<32x128xf32>
    %174 = arith.mulf %173, %172 : vector<32x128xf32>
    %175 = arith.maximumf %172, %174 : vector<32x128xf32>
    %176 = arith.truncf %175 : vector<32x128xf32> to vector<32x128xbf16>
    %c3_113 = arith.constant 3 : index
    %c0_114 = arith.constant 0 : index
    %c0_115 = arith.constant 0 : index
    %177 = vector.load %arg4[%c3_113, %c0_114, %c0_115] : memref<4x128x128xbf16, #tpu.memory_space<vmem>>, vector<1x128x128xbf16>
    %178 = vector.shape_cast %177 : vector<1x128x128xbf16> to vector<128x128xbf16>
    %cst_116 = arith.constant dense<0.000000e+00> : vector<32x128xf32>
    %179 = tpu.matmul %176, %178, %cst_116 {dimension_numbers = #tpu.dot_dimension_numbers<[1], [0], [0], [1], [0, 0, 1, 1], [], []>} : vector<32x128xbf16>, vector<128x128xbf16>, vector<32x128xf32> -> vector<32x128xf32>
    %180 = arith.addf %167, %179 : vector<32x128xf32>
    %181 = vector.broadcast %2 : vector<1x128xf32> to vector<32x128xf32>
    %182 = arith.addf %180, %181 : vector<32x128xf32>
    %cst_117 = arith.constant 2.000000e-01 : f32
    %183 = vector.broadcast %cst_117 : f32 to vector<32x128xf32>
    %184 = arith.mulf %183, %182 : vector<32x128xf32>
    %185 = arith.maximumf %182, %184 : vector<32x128xf32>
    %186 = arith.truncf %185 : vector<32x128xf32> to vector<32x128xbf16>
    %c2_118 = arith.constant 2 : index
    %c0_119 = arith.constant 0 : index
    %c0_120 = arith.constant 0 : index
    %187 = vector.load %arg8[%c2_118, %c0_119, %c0_120] : memref<4x32x128xbf16, #tpu.memory_space<vmem>>, vector<1x32x128xbf16>
    %188 = vector.shape_cast %187 : vector<1x32x128xbf16> to vector<32x128xbf16>
    %189 = vector.shape_cast %186 : vector<32x128xbf16> to vector<1x32x128xbf16>
    tpu.vector_store %arg8[%c2_118, %c0_119, %c0_120], %189 {strides = array<i32>} : memref<4x32x128xbf16, #tpu.memory_space<vmem>>, vector<1x32x128xbf16>,
    %c2_121 = arith.constant 2 : index
    %c0_122 = arith.constant 0 : index
    %c0_123 = arith.constant 0 : index
    %190 = vector.load %arg6[%c2_121, %c0_122, %c0_123] : memref<4x128x128xbf16, #tpu.memory_space<vmem>>, vector<1x128x128xbf16>
    %191 = vector.shape_cast %190 : vector<1x128x128xbf16> to vector<128x128xbf16>
    %cst_124 = arith.constant dense<0.000000e+00> : vector<32x128xf32>
    %192 = tpu.matmul %186, %191, %cst_124 {dimension_numbers = #tpu.dot_dimension_numbers<[1], [0], [0], [1], [0, 0, 1, 1], [], []>} : vector<32x128xbf16>, vector<128x128xbf16>, vector<32x128xf32> -> vector<32x128xf32>
    %193 = arith.addf %129, %192 : vector<32x128xf32>
    %c12 = arith.constant 12 : index
    %c0_125 = arith.constant 0 : index
    %c0_126 = arith.constant 0 : index
    %194 = vector.load %arg1[%c12, %c0_125, %c0_126] : memref<16x32x12xbf16, #tpu.memory_space<vmem>>, vector<1x32x12xbf16>
    %195 = vector.shape_cast %194 : vector<1x32x12xbf16> to vector<32x12xbf16>
    %cst_127 = arith.constant dense<0.000000e+00> : vector<32x128xf32>
    %196 = tpu.matmul %195, %0, %cst_127 {dimension_numbers = #tpu.dot_dimension_numbers<[1], [0], [0], [1], [0, 0, 1, 1], [], []>} : vector<32x12xbf16>, vector<12x128xbf16>, vector<32x128xf32> -> vector<32x128xf32>
    %197 = vector.broadcast %1 : vector<1x128xf32> to vector<32x128xf32>
    %198 = arith.addf %196, %197 : vector<32x128xf32>
    %cst_128 = arith.constant 2.000000e-01 : f32
    %199 = vector.broadcast %cst_128 : f32 to vector<32x128xf32>
    %200 = arith.mulf %199, %198 : vector<32x128xf32>
    %201 = arith.maximumf %198, %200 : vector<32x128xf32>
    %202 = arith.truncf %201 : vector<32x128xf32> to vector<32x128xbf16>
    %c0_129 = arith.constant 0 : index
    %c0_130 = arith.constant 0 : index
    %c0_131 = arith.constant 0 : index
    %203 = vector.load %arg4[%c0_129, %c0_130, %c0_131] : memref<4x128x128xbf16, #tpu.memory_space<vmem>>, vector<1x128x128xbf16>
    %204 = vector.shape_cast %203 : vector<1x128x128xbf16> to vector<128x128xbf16>
    %cst_132 = arith.constant dense<0.000000e+00> : vector<32x128xf32>
    %205 = tpu.matmul %202, %204, %cst_132 {dimension_numbers = #tpu.dot_dimension_numbers<[1], [0], [0], [1], [0, 0, 1, 1], [], []>} : vector<32x128xbf16>, vector<128x128xbf16>, vector<32x128xf32> -> vector<32x128xf32>
    %c13 = arith.constant 13 : index
    %c0_133 = arith.constant 0 : index
    %c0_134 = arith.constant 0 : index
    %206 = vector.load %arg1[%c13, %c0_133, %c0_134] : memref<16x32x12xbf16, #tpu.memory_space<vmem>>, vector<1x32x12xbf16>
    %207 = vector.shape_cast %206 : vector<1x32x12xbf16> to vector<32x12xbf16>
    %cst_135 = arith.constant dense<0.000000e+00> : vector<32x128xf32>
    %208 = tpu.matmul %207, %0, %cst_135 {dimension_numbers = #tpu.dot_dimension_numbers<[1], [0], [0], [1], [0, 0, 1, 1], [], []>} : vector<32x12xbf16>, vector<12x128xbf16>, vector<32x128xf32> -> vector<32x128xf32>
    %209 = vector.broadcast %1 : vector<1x128xf32> to vector<32x128xf32>
    %210 = arith.addf %208, %209 : vector<32x128xf32>
    %cst_136 = arith.constant 2.000000e-01 : f32
    %211 = vector.broadcast %cst_136 : f32 to vector<32x128xf32>
    %212 = arith.mulf %211, %210 : vector<32x128xf32>
    %213 = arith.maximumf %210, %212 : vector<32x128xf32>
    %214 = arith.truncf %213 : vector<32x128xf32> to vector<32x128xbf16>
    %c1_137 = arith.constant 1 : index
    %c0_138 = arith.constant 0 : index
    %c0_139 = arith.constant 0 : index
    %215 = vector.load %arg4[%c1_137, %c0_138, %c0_139] : memref<4x128x128xbf16, #tpu.memory_space<vmem>>, vector<1x128x128xbf16>
    %216 = vector.shape_cast %215 : vector<1x128x128xbf16> to vector<128x128xbf16>
    %cst_140 = arith.constant dense<0.000000e+00> : vector<32x128xf32>
    %217 = tpu.matmul %214, %216, %cst_140 {dimension_numbers = #tpu.dot_dimension_numbers<[1], [0], [0], [1], [0, 0, 1, 1], [], []>} : vector<32x128xbf16>, vector<128x128xbf16>, vector<32x128xf32> -> vector<32x128xf32>
    %218 = arith.addf %205, %217 : vector<32x128xf32>
    %c14 = arith.constant 14 : index
    %c0_141 = arith.constant 0 : index
    %c0_142 = arith.constant 0 : index
    %219 = vector.load %arg1[%c14, %c0_141, %c0_142] : memref<16x32x12xbf16, #tpu.memory_space<vmem>>, vector<1x32x12xbf16>
    %220 = vector.shape_cast %219 : vector<1x32x12xbf16> to vector<32x12xbf16>
    %cst_143 = arith.constant dense<0.000000e+00> : vector<32x128xf32>
    %221 = tpu.matmul %220, %0, %cst_143 {dimension_numbers = #tpu.dot_dimension_numbers<[1], [0], [0], [1], [0, 0, 1, 1], [], []>} : vector<32x12xbf16>, vector<12x128xbf16>, vector<32x128xf32> -> vector<32x128xf32>
    %222 = vector.broadcast %1 : vector<1x128xf32> to vector<32x128xf32>
    %223 = arith.addf %221, %222 : vector<32x128xf32>
    %cst_144 = arith.constant 2.000000e-01 : f32
    %224 = vector.broadcast %cst_144 : f32 to vector<32x128xf32>
    %225 = arith.mulf %224, %223 : vector<32x128xf32>
    %226 = arith.maximumf %223, %225 : vector<32x128xf32>
    %227 = arith.truncf %226 : vector<32x128xf32> to vector<32x128xbf16>
    %c2_145 = arith.constant 2 : index
    %c0_146 = arith.constant 0 : index
    %c0_147 = arith.constant 0 : index
    %228 = vector.load %arg4[%c2_145, %c0_146, %c0_147] : memref<4x128x128xbf16, #tpu.memory_space<vmem>>, vector<1x128x128xbf16>
    %229 = vector.shape_cast %228 : vector<1x128x128xbf16> to vector<128x128xbf16>
    %cst_148 = arith.constant dense<0.000000e+00> : vector<32x128xf32>
    %230 = tpu.matmul %227, %229, %cst_148 {dimension_numbers = #tpu.dot_dimension_numbers<[1], [0], [0], [1], [0, 0, 1, 1], [], []>} : vector<32x128xbf16>, vector<128x128xbf16>, vector<32x128xf32> -> vector<32x128xf32>
    %231 = arith.addf %218, %230 : vector<32x128xf32>
    %c15 = arith.constant 15 : index
    %c0_149 = arith.constant 0 : index
    %c0_150 = arith.constant 0 : index
    %232 = vector.load %arg1[%c15, %c0_149, %c0_150] : memref<16x32x12xbf16, #tpu.memory_space<vmem>>, vector<1x32x12xbf16>
    %233 = vector.shape_cast %232 : vector<1x32x12xbf16> to vector<32x12xbf16>
    %cst_151 = arith.constant dense<0.000000e+00> : vector<32x128xf32>
    %234 = tpu.matmul %233, %0, %cst_151 {dimension_numbers = #tpu.dot_dimension_numbers<[1], [0], [0], [1], [0, 0, 1, 1], [], []>} : vector<32x12xbf16>, vector<12x128xbf16>, vector<32x128xf32> -> vector<32x128xf32>
    %235 = vector.broadcast %1 : vector<1x128xf32> to vector<32x128xf32>
    %236 = arith.addf %234, %235 : vector<32x128xf32>
    %cst_152 = arith.constant 2.000000e-01 : f32
    %237 = vector.broadcast %cst_152 : f32 to vector<32x128xf32>
    %238 = arith.mulf %237, %236 : vector<32x128xf32>
    %239 = arith.maximumf %236, %238 : vector<32x128xf32>
    %240 = arith.truncf %239 : vector<32x128xf32> to vector<32x128xbf16>
    %c3_153 = arith.constant 3 : index
    %c0_154 = arith.constant 0 : index
    %c0_155 = arith.constant 0 : index
    %241 = vector.load %arg4[%c3_153, %c0_154, %c0_155] : memref<4x128x128xbf16, #tpu.memory_space<vmem>>, vector<1x128x128xbf16>
    %242 = vector.shape_cast %241 : vector<1x128x128xbf16> to vector<128x128xbf16>
    %cst_156 = arith.constant dense<0.000000e+00> : vector<32x128xf32>
    %243 = tpu.matmul %240, %242, %cst_156 {dimension_numbers = #tpu.dot_dimension_numbers<[1], [0], [0], [1], [0, 0, 1, 1], [], []>} : vector<32x128xbf16>, vector<128x128xbf16>, vector<32x128xf32> -> vector<32x128xf32>
    %244 = arith.addf %231, %243 : vector<32x128xf32>
    %245 = vector.broadcast %2 : vector<1x128xf32> to vector<32x128xf32>
    %246 = arith.addf %244, %245 : vector<32x128xf32>
    %cst_157 = arith.constant 2.000000e-01 : f32
    %247 = vector.broadcast %cst_157 : f32 to vector<32x128xf32>
    %248 = arith.mulf %247, %246 : vector<32x128xf32>
    %249 = arith.maximumf %246, %248 : vector<32x128xf32>
    %250 = arith.truncf %249 : vector<32x128xf32> to vector<32x128xbf16>
    %c3_158 = arith.constant 3 : index
    %c0_159 = arith.constant 0 : index
    %c0_160 = arith.constant 0 : index
    %251 = vector.load %arg8[%c3_158, %c0_159, %c0_160] : memref<4x32x128xbf16, #tpu.memory_space<vmem>>, vector<1x32x128xbf16>
    %252 = vector.shape_cast %251 : vector<1x32x128xbf16> to vector<32x128xbf16>
    %253 = vector.shape_cast %250 : vector<32x128xbf16> to vector<1x32x128xbf16>
    tpu.vector_store %arg8[%c3_158, %c0_159, %c0_160], %253 {strides = array<i32>} : memref<4x32x128xbf16, #tpu.memory_space<vmem>>, vector<1x32x128xbf16>,
    %c3_161 = arith.constant 3 : index
    %c0_162 = arith.constant 0 : index
    %c0_163 = arith.constant 0 : index
    %254 = vector.load %arg6[%c3_161, %c0_162, %c0_163] : memref<4x128x128xbf16, #tpu.memory_space<vmem>>, vector<1x128x128xbf16>
    %255 = vector.shape_cast %254 : vector<1x128x128xbf16> to vector<128x128xbf16>
    %cst_164 = arith.constant dense<0.000000e+00> : vector<32x128xf32>
    %256 = tpu.matmul %250, %255, %cst_164 {dimension_numbers = #tpu.dot_dimension_numbers<[1], [0], [0], [1], [0, 0, 1, 1], [], []>} : vector<32x128xbf16>, vector<128x128xbf16>, vector<32x128xf32> -> vector<32x128xf32>
    %257 = arith.addf %193, %256 : vector<32x128xf32>
    %c0_165 = arith.constant 0 : index
    %c0_166 = arith.constant 0 : index
    %258 = vector.load %arg7[%c0_165, %c0_166] : memref<1x128xf32, #tpu.memory_space<vmem>>, vector<1x128xf32>
    %259 = vector.broadcast %258 : vector<1x128xf32> to vector<32x128xf32>
    %260 = arith.addf %257, %259 : vector<32x128xf32>
    %c0_167 = arith.constant 0 : index
    %c0_168 = arith.constant 0 : index
    %261 = vector.load %arg9[%c0_167, %c0_168] : memref<32x128xf32, #tpu.memory_space<vmem>>, vector<32x128xf32>
    tpu.vector_store %arg9[%c0_167, %c0_168], %260 {strides = array<i32>} : memref<32x128xf32, #tpu.memory_space<vmem>>, vector<32x128xf32>,
    return
  }
  func.func @transform_0(%arg0: i32) -> (i32, i32, i32) {
    %c0_i32 = arith.constant 0 : i32
    %c0_i32_0 = arith.constant 0 : i32
    %c0_i32_1 = arith.constant 0 : i32
    return %c0_i32, %arg0, %c0_i32_0 : i32, i32, i32
  }
  func.func @transform_1(%arg0: i32) -> (i32, i32) {
    %c0_i32 = arith.constant 0 : i32
    %c0_i32_0 = arith.constant 0 : i32
    %c0_i32_1 = arith.constant 0 : i32
    return %c0_i32, %c0_i32_0 : i32, i32
  }
  func.func @transform_2(%arg0: i32) -> (i32, i32) {
    %c0_i32 = arith.constant 0 : i32
    %c0_i32_0 = arith.constant 0 : i32
    %c0_i32_1 = arith.constant 0 : i32
    return %c0_i32, %c0_i32_0 : i32, i32
  }
  func.func @transform_3(%arg0: i32) -> (i32, i32, i32) {
    %c0_i32 = arith.constant 0 : i32
    %c0_i32_0 = arith.constant 0 : i32
    %c0_i32_1 = arith.constant 0 : i32
    %c0_i32_2 = arith.constant 0 : i32
    return %c0_i32, %c0_i32_0, %c0_i32_1 : i32, i32, i32
  }
  func.func @transform_4(%arg0: i32) -> (i32, i32) {
    %c0_i32 = arith.constant 0 : i32
    %c0_i32_0 = arith.constant 0 : i32
    %c0_i32_1 = arith.constant 0 : i32
    return %c0_i32, %c0_i32_0 : i32, i32
  }
  func.func @transform_5(%arg0: i32) -> (i32, i32, i32) {
    %c0_i32 = arith.constant 0 : i32
    %c0_i32_0 = arith.constant 0 : i32
    %c0_i32_1 = arith.constant 0 : i32
    %c0_i32_2 = arith.constant 0 : i32
    return %c0_i32, %c0_i32_0, %c0_i32_1 : i32, i32, i32
  }
  func.func @transform_6(%arg0: i32) -> (i32, i32) {
    %c0_i32 = arith.constant 0 : i32
    %c0_i32_0 = arith.constant 0 : i32
    %c0_i32_1 = arith.constant 0 : i32
    return %c0_i32, %c0_i32_0 : i32, i32
  }
  func.func @transform_7(%arg0: i32) -> (i32, i32, i32) {
    %c0_i32 = arith.constant 0 : i32
    %c0_i32_0 = arith.constant 0 : i32
    %c0_i32_1 = arith.constant 0 : i32
    return %c0_i32, %arg0, %c0_i32_0 : i32, i32, i32
  }
  func.func @transform_8(%arg0: i32) -> (i32, i32) {
    %c0_i32 = arith.constant 0 : i32
    %c0_i32_0 = arith.constant 0 : i32
    return %arg0, %c0_i32 : i32, i32
  }
}

module attributes {stable_mosaic.version = 11 : i64} {
  func.func @_conv_matmul_kernel(%arg0: i32, %arg1: memref<32x512xbf16, #tpu.memory_space<vmem>>, %arg2: memref<512x128xbf16, #tpu.memory_space<vmem>>, %arg3: memref<1x128xf32, #tpu.memory_space<vmem>>, %arg4: memref<32x128xbf16, #tpu.memory_space<vmem>>) attributes {dimension_semantics = [#tpu.dimension_semantics<parallel>], iteration_bounds = array<i64: 1>, scalar_prefetch = 0 : i64, scratch_operands = 0 : i64, tpu.core_type = #tpu.core_type<tc>, window_params = [{transform_indices = @transform_0, window_bounds = array<i64: 32, 512>}, {pipeline_mode = #tpu.pipeline_mode<synchronous>, transform_indices = @transform_1, window_bounds = array<i64: 512, 128>}, {pipeline_mode = #tpu.pipeline_mode<synchronous>, transform_indices = @transform_2, window_bounds = array<i64: 1, 128>}, {transform_indices = @transform_3, window_bounds = array<i64: 32, 128>}]} {
    %c0 = arith.constant 0 : index
    %c0_0 = arith.constant 0 : index
    %0 = vector.load %arg1[%c0, %c0_0] : memref<32x512xbf16, #tpu.memory_space<vmem>>, vector<32x512xbf16>
    %c0_1 = arith.constant 0 : index
    %c0_2 = arith.constant 0 : index
    %1 = vector.load %arg2[%c0_1, %c0_2] : memref<512x128xbf16, #tpu.memory_space<vmem>>, vector<512x128xbf16>
    %cst = arith.constant dense<0.000000e+00> : vector<32x128xf32>
    %2 = tpu.matmul %0, %1, %cst {dimension_numbers = #tpu.dot_dimension_numbers<[1], [0], [0], [1], [0, 0, 1, 1], [], []>} : vector<32x512xbf16>, vector<512x128xbf16>, vector<32x128xf32> -> vector<32x128xf32>
    %c0_3 = arith.constant 0 : index
    %c0_4 = arith.constant 0 : index
    %3 = vector.load %arg3[%c0_3, %c0_4] : memref<1x128xf32, #tpu.memory_space<vmem>>, vector<1x128xf32>
    %4 = vector.broadcast %3 : vector<1x128xf32> to vector<32x128xf32>
    %5 = arith.addf %2, %4 : vector<32x128xf32>
    %cst_5 = arith.constant 2.000000e-01 : f32
    %6 = vector.broadcast %cst_5 : f32 to vector<32x128xf32>
    %7 = arith.mulf %6, %5 : vector<32x128xf32>
    %8 = arith.maximumf %5, %7 : vector<32x128xf32>
    %9 = arith.truncf %8 : vector<32x128xf32> to vector<32x128xbf16>
    %c0_6 = arith.constant 0 : index
    %c0_7 = arith.constant 0 : index
    %10 = vector.load %arg4[%c0_6, %c0_7] : memref<32x128xbf16, #tpu.memory_space<vmem>>, vector<32x128xbf16>
    tpu.vector_store %arg4[%c0_6, %c0_7], %9 {strides = array<i32>} : memref<32x128xbf16, #tpu.memory_space<vmem>>, vector<32x128xbf16>,
    return
  }
  func.func @transform_0(%arg0: i32) -> (i32, i32) {
    %c0_i32 = arith.constant 0 : i32
    %c0_i32_0 = arith.constant 0 : i32
    return %arg0, %c0_i32 : i32, i32
  }
  func.func @transform_1(%arg0: i32) -> (i32, i32) {
    %c0_i32 = arith.constant 0 : i32
    %c0_i32_0 = arith.constant 0 : i32
    %c0_i32_1 = arith.constant 0 : i32
    return %c0_i32, %c0_i32_0 : i32, i32
  }
  func.func @transform_2(%arg0: i32) -> (i32, i32) {
    %c0_i32 = arith.constant 0 : i32
    %c0_i32_0 = arith.constant 0 : i32
    %c0_i32_1 = arith.constant 0 : i32
    return %c0_i32, %c0_i32_0 : i32, i32
  }
  func.func @transform_3(%arg0: i32) -> (i32, i32) {
    %c0_i32 = arith.constant 0 : i32
    %c0_i32_0 = arith.constant 0 : i32
    return %arg0, %c0_i32 : i32, i32
  }
}

module attributes {stable_mosaic.version = 11 : i64} {
  func.func @_conv_matmul_kernel(%arg0: i32, %arg1: memref<16x2048xbf16, #tpu.memory_space<vmem>>, %arg2: memref<2048x128xbf16, #tpu.memory_space<vmem>>, %arg3: memref<1x128xf32, #tpu.memory_space<vmem>>, %arg4: memref<16x128xf32, #tpu.memory_space<vmem>>) attributes {dimension_semantics = [#tpu.dimension_semantics<parallel>], iteration_bounds = array<i64: 1>, scalar_prefetch = 0 : i64, scratch_operands = 0 : i64, tpu.core_type = #tpu.core_type<tc>, window_params = [{transform_indices = @transform_0, window_bounds = array<i64: 16, 2048>}, {pipeline_mode = #tpu.pipeline_mode<synchronous>, transform_indices = @transform_1, window_bounds = array<i64: 2048, 128>}, {pipeline_mode = #tpu.pipeline_mode<synchronous>, transform_indices = @transform_2, window_bounds = array<i64: 1, 128>}, {transform_indices = @transform_3, window_bounds = array<i64: 16, 128>}]} {
    %c0 = arith.constant 0 : index
    %c0_0 = arith.constant 0 : index
    %0 = vector.load %arg1[%c0, %c0_0] : memref<16x2048xbf16, #tpu.memory_space<vmem>>, vector<16x2048xbf16>
    %c0_1 = arith.constant 0 : index
    %c0_2 = arith.constant 0 : index
    %1 = vector.load %arg2[%c0_1, %c0_2] : memref<2048x128xbf16, #tpu.memory_space<vmem>>, vector<2048x128xbf16>
    %cst = arith.constant dense<0.000000e+00> : vector<16x128xf32>
    %2 = tpu.matmul %0, %1, %cst {dimension_numbers = #tpu.dot_dimension_numbers<[1], [0], [0], [1], [0, 0, 1, 1], [], []>} : vector<16x2048xbf16>, vector<2048x128xbf16>, vector<16x128xf32> -> vector<16x128xf32>
    %c0_3 = arith.constant 0 : index
    %c0_4 = arith.constant 0 : index
    %3 = vector.load %arg3[%c0_3, %c0_4] : memref<1x128xf32, #tpu.memory_space<vmem>>, vector<1x128xf32>
    %4 = vector.broadcast %3 : vector<1x128xf32> to vector<16x128xf32>
    %5 = arith.addf %2, %4 : vector<16x128xf32>
    %c0_5 = arith.constant 0 : index
    %c0_6 = arith.constant 0 : index
    %6 = vector.load %arg4[%c0_5, %c0_6] : memref<16x128xf32, #tpu.memory_space<vmem>>, vector<16x128xf32>
    tpu.vector_store %arg4[%c0_5, %c0_6], %5 {strides = array<i32>} : memref<16x128xf32, #tpu.memory_space<vmem>>, vector<16x128xf32>,
    return
  }
  func.func @transform_0(%arg0: i32) -> (i32, i32) {
    %c0_i32 = arith.constant 0 : i32
    %c0_i32_0 = arith.constant 0 : i32
    return %arg0, %c0_i32 : i32, i32
  }
  func.func @transform_1(%arg0: i32) -> (i32, i32) {
    %c0_i32 = arith.constant 0 : i32
    %c0_i32_0 = arith.constant 0 : i32
    %c0_i32_1 = arith.constant 0 : i32
    return %c0_i32, %c0_i32_0 : i32, i32
  }
  func.func @transform_2(%arg0: i32) -> (i32, i32) {
    %c0_i32 = arith.constant 0 : i32
    %c0_i32_0 = arith.constant 0 : i32
    %c0_i32_1 = arith.constant 0 : i32
    return %c0_i32, %c0_i32_0 : i32, i32
  }
  func.func @transform_3(%arg0: i32) -> (i32, i32) {
    %c0_i32 = arith.constant 0 : i32
    %c0_i32_0 = arith.constant 0 : i32
    return %arg0, %c0_i32 : i32, i32
  }
}

</mosaic_0001>

<bundles_post_ra>
// kernel: forward.4
= control target key start
LH: loop header
LB: loop body
LE: loop exit
PB: predicated region body
PF: predicated region fallthrough
CT: control target
= control target key end

     0   :  { %s4971_s27 = smov 0   ;;  %s4973_s28 = smov 0   ;;  %s5912_s0 = inlined_call_operand.vmem [shape: bf16[16,64,12], index: 0, kind: input, shape index: {}]   ;;  %s5913_s1 = inlined_call_operand.vmem [shape: bf16[12,128], index: 1, kind: input, shape index: {}]   ;;  %s5914_s2 = inlined_call_operand.vmem [shape: f32[1,128], index: 2, kind: input, shape index: {}]   ;;  %s5915_s3 = inlined_call_operand.vmem [shape: bf16[4,128,128], index: 3, kind: input, shape index: {}]   ;;  %s5916_s4 = inlined_call_operand.vmem [shape: f32[1,128], index: 4, kind: input, shape index: {}]   ;;  %s5917_s5 = inlined_call_operand.vmem [shape: bf16[4,128,128], index: 5, kind: input, shape index: {}]   ;;  %s5918_s6 = inlined_call_operand.vmem [shape: f32[1,128], index: 6, kind: input, shape index: {}]   ;;  %s5919_s7 = inlined_call_operand.vmem [shape: bf16[4,64,128], index: 7, kind: output, shape index: {0}]   ;;  %s5920_s8 = inlined_call_operand.vmem [shape: f32[64,128], index: 8, kind: output, shape index: {1}]  }
   0x1   :  { %s4975_s29 = smov 0  }
   0x2 LB: > { %s4987_s30 = sadd.s32 4294967295, %s4924_s29   ;;  %s4990_s9 = sadd.s32 1, %s4924_s29   ;;  %s4924_s29 = sphi %s4975_s29, %s5924_s29   ;;  %s4920_s28 = sphi %s4973_s28, %s5923_s28   ;;  %s4916_s27 = sphi %s4971_s27, %s5922_s27  }
   0x3   : > { %s23_s10 = ssub.s32 %s4924_s29, %s4990_s9  ;;  %s26_s11 = sadd.s32 1, %s4920_s28 }
   0x4   : > { %p24_p0 = scmp.eq.s32.totalorder %s23_s10, 0  ;;  %p33_p1 = scmp.ne.s32.totalorder %s4920_s28, %s4916_s27 }
   0x5   : > { %p34_p2 = scmp.eq.s32.totalorder %s4924_s29, 0  ;;  %p189_p3 = scmp.eq.s32.totalorder %s4987_s30, 1 }
   0x6   : > { %s5000_s12 = scalar_select %p24_p0, %s4920_s28, %s26_s11  }
   0x7   : > { %p35_p4 = por %p34_p2, %p33_p1  ;;  %p5002_p5 = por %p189_p3, %p33_p1 }
   0x8   : > { %p3485_p6 = scmp.ge.s32.totalorder %s4924_s29, 2 }
   0xa   : > { %255 = sbr.rel (%p3485_p6) target bundleno = 51 (0x33), region = 40 }
   0xf   : > { %258 = sbr.rel (!%p35_p4) target bundleno = 51 (0x33), region = 44  ;;  %s260_s14 = sand.u32 (%p35_p4), 1, %s4920_s28  }
  0x10   : > { %s4615_s15 = sshll.u32 (%p35_p4), %s4924_s29, 4  ;;  %s3486_s16 = sshll.u32 (%p35_p4), %s260_s14, 8 }
  0x11   : > { %s5012_s19 = scalar_lea.vmem (%p35_p4), %s5912_s0, %s4615_s15  ;;  %s5017_s20 = scalar_lea.vmem (%p35_p4), [#allocation2], %s3486_s16 }
  0x12   : > { %v282_v0 = vld [vmem:[%s5012_s19] sm:$0xff] (%p35_p4)   ;;  %v286_v1 = vld [vmem:[%s5012_s19 + $0x8] sm:$0xff] (%p35_p4)  }
  0x13   : > { %v290_v2 = vld [vmem:[%s5012_s19 + $0x20] sm:$0xff] (%p35_p4)   ;;  %283 = vst [vmem:[%s5017_s20] sm:$0xff] (%p35_p4), %v282_v0   ;;  %v294_v3 = vld [vmem:[%s5012_s19 + $0x28] sm:$0xff] (%p35_p4)  }
  0x14   : > { %287 = vst [vmem:[%s5017_s20 + $0x8] sm:$0xff] %v286_v1   ;;  %v298_v4 = vld [vmem:[%s5012_s19 + $0x40] sm:$0xff]   ;;  %v302_v5 = vld [vmem:[%s5012_s19 + $0x48] sm:$0xff]  }
  0x15   : > { %291 = vst [vmem:[%s5017_s20 + $0x10] sm:$0xff] %v290_v2   ;;  %v306_v6 = vld [vmem:[%s5012_s19 + $0x60] sm:$0xff]   ;;  %v310_v7 = vld [vmem:[%s5012_s19 + $0x68] sm:$0xff]  }
  0x16   : > { %295 = vst [vmem:[%s5017_s20 + $0x18] sm:$0xff] %v294_v3   ;;  %v314_v8 = vld [vmem:[%s5012_s19 + $0x80] sm:$0xff]   ;;  %v318_v9 = vld [vmem:[%s5012_s19 + $0x88] sm:$0xff]  }
  0x17   : > { %299 = vst [vmem:[%s5017_s20 + $0x20] sm:$0xff] %v298_v4   ;;  %v322_v10 = vld [vmem:[%s5012_s19 + $0xa0] sm:$0xff]   ;;  %v326_v11 = vld [vmem:[%s5012_s19 + $0xa8] sm:$0xff]  }
  0x18   : > { %303 = vst [vmem:[%s5017_s20 + $0x28] sm:$0xff] %v302_v5   ;;  %v330_v12 = vld [vmem:[%s5012_s19 + $0xc0] sm:$0xff]   ;;  %v334_v13 = vld [vmem:[%s5012_s19 + $0xc8] sm:$0xff]  }
  0x19   : > { %307 = vst [vmem:[%s5017_s20 + $0x30] sm:$0xff] %v306_v6   ;;  %v338_v14 = vld [vmem:[%s5012_s19 + $0xe0] sm:$0xff]   ;;  %v342_v15 = vld [vmem:[%s5012_s19 + $0xe8] sm:$0xff]  }
  0x1a   : > { %311 = vst [vmem:[%s5017_s20 + $0x38] sm:$0xff] %v310_v7   ;;  %v346_v16 = vld [vmem:[%s5012_s19 + $0x100] sm:$0xff]   ;;  %v350_v17 = vld [vmem:[%s5012_s19 + $0x108] sm:$0xff]  }
  0x1b   : > { %315 = vst [vmem:[%s5017_s20 + $0x40] sm:$0xff] %v314_v8   ;;  %v354_v18 = vld [vmem:[%s5012_s19 + $0x120] sm:$0xff]   ;;  %v358_v19 = vld [vmem:[%s5012_s19 + $0x128] sm:$0xff]  }
  0x1c   : > { %319 = vst [vmem:[%s5017_s20 + $0x48] sm:$0xff] %v318_v9   ;;  %v362_v20 = vld [vmem:[%s5012_s19 + $0x140] sm:$0xff]   ;;  %v366_v21 = vld [vmem:[%s5012_s19 + $0x148] sm:$0xff]  }
  0x1d   : > { %323 = vst [vmem:[%s5017_s20 + $0x50] sm:$0xff] %v322_v10   ;;  %v370_v22 = vld [vmem:[%s5012_s19 + $0x160] sm:$0xff]   ;;  %v374_v23 = vld [vmem:[%s5012_s19 + $0x168] sm:$0xff]  }
  0x1e   : > { %327 = vst [vmem:[%s5017_s20 + $0x58] sm:$0xff] %v326_v11   ;;  %v378_v24 = vld [vmem:[%s5012_s19 + $0x180] sm:$0xff]   ;;  %v382_v25 = vld [vmem:[%s5012_s19 + $0x188] sm:$0xff]  }
  0x1f   : > { %331 = vst [vmem:[%s5017_s20 + $0x60] sm:$0xff] %v330_v12   ;;  %v386_v26 = vld [vmem:[%s5012_s19 + $0x1a0] sm:$0xff]   ;;  %v390_v27 = vld [vmem:[%s5012_s19 + $0x1a8] sm:$0xff]  }
  0x20   : > { %335 = vst [vmem:[%s5017_s20 + $0x68] sm:$0xff] %v334_v13   ;;  %v394_v28 = vld [vmem:[%s5012_s19 + $0x1c0] sm:$0xff]   ;;  %v398_v29 = vld [vmem:[%s5012_s19 + $0x1c8] sm:$0xff]  }
  0x21   : > { %339 = vst [vmem:[%s5017_s20 + $0x70] sm:$0xff] %v338_v14   ;;  %v402_v30 = vld [vmem:[%s5012_s19 + $0x1e0] sm:$0xff]   ;;  %v406_v31 = vld [vmem:[%s5012_s19 + $0x1e8] sm:$0xff]  }
  0x22   : > { %343 = vst [vmem:[%s5017_s20 + $0x78] sm:$0xff] %v342_v15  }
  0x23   : > { %347 = vst [vmem:[%s5017_s20 + $0x80] sm:$0xff] %v346_v16  }
  0x24   : > { %351 = vst [vmem:[%s5017_s20 + $0x88] sm:$0xff] %v350_v17  }
  0x25   : > { %355 = vst [vmem:[%s5017_s20 + $0x90] sm:$0xff] %v354_v18  }
  0x26   : > { %359 = vst [vmem:[%s5017_s20 + $0x98] sm:$0xff] %v358_v19  }
  0x27   : > { %363 = vst [vmem:[%s5017_s20 + $0xa0] sm:$0xff] %v362_v20  }
  0x28   : > { %367 = vst [vmem:[%s5017_s20 + $0xa8] sm:$0xff] %v366_v21  }
  0x29   : > { %371 = vst [vmem:[%s5017_s20 + $0xb0] sm:$0xff] %v370_v22  }
  0x2a   : > { %375 = vst [vmem:[%s5017_s20 + $0xb8] sm:$0xff] %v374_v23  }
  0x2b   : > { %379 = vst [vmem:[%s5017_s20 + $0xc0] sm:$0xff] %v378_v24  }
  0x2c   : > { %383 = vst [vmem:[%s5017_s20 + $0xc8] sm:$0xff] %v382_v25  }
  0x2d   : > { %387 = vst [vmem:[%s5017_s20 + $0xd0] sm:$0xff] %v386_v26  }
  0x2e   : > { %391 = vst [vmem:[%s5017_s20 + $0xd8] sm:$0xff] %v390_v27  }
  0x2f   : > { %395 = vst [vmem:[%s5017_s20 + $0xe0] sm:$0xff] %v394_v28  }
  0x30   : > { %399 = vst [vmem:[%s5017_s20 + $0xe8] sm:$0xff] %v398_v29  }
  0x31   : > { %403 = vst [vmem:[%s5017_s20 + $0xf0] sm:$0xff] %v402_v30  }
  0x32   : > { %407 = vst [vmem:[%s5017_s20 + $0xf8] sm:$0xff] %v406_v31  }
  0x33 PF: > { %p3489_p7 = scmp.ge.s32.totalorder %s4924_s29, 1  ;;  %p560_p8 = scmp.lt.s32.totalorder %s4924_s29, 3 }
  0x35   : > { %p561_p9 = pnand %p3489_p7, %p560_p8 }
  0x36   : > { %s567_s25 = sand.u32 (!%p561_p9), 1, %s4916_s27   ;;  %s3492_s14 = sshll.u32 (!%p561_p9), %s4987_s30, 2 }
  0x37   : > { %564 = sbr.rel (%p561_p9) target bundleno = 1608 (0x648), region = 85  ;;  %s3490_s26 = sshll.u32 (!%p561_p9), %s567_s25, 8 }
  0x38   : > { %s5099_s15 = scalar_lea.vmem (!%p561_p9), [#allocation2], %s3490_s26  ;;  %s3491_s18 = sshll.u32 (!%p561_p9), %s567_s25, 6 }
  0x39   : > { %s5383_s19 = scalar_lea.vmem (!%p561_p9), [#allocation3], %s3491_s18  ;;  %p607_p10 = scmp.lt.s32.totalorder (!%p561_p9), %s3492_s14, 7 }
  0x3c   : > { %v3504_v32 = vld [vmem:[%s5913_s1] sm:$0xf]  ;;  %v4616_v33 = vld [vmem:[%s5913_s1] sm:$0x30]  ;;  %vm646_vm0 = vcmask 1045504   ;;  %v4636_v35 = vld [vmem:[%s5915_s3 + $0x78] sm:$0xff] }
  0x3d   : > { %v3505_v34 = vor.u32 %v4616_v33, %v3504_v32  ;;  %v4626_v36 = vld [vmem:[%s5915_s3 + $0x38] sm:$0xff]  ;;  %v4617_v38 = vld [vmem:[%s5099_s15] sm:$0xff]  ;;  %v4627_v39 = vld [vmem:[%s5099_s15 + $0x10] sm:$0xff]  ;;  %4857 = vmatpush.bf16.msra.mxu2 %v4636_v35  ;;  %vm639_vm1 = vcmask 97280   ;;  %s5926_s14 = smov (!%p607_p10, %s3492_s14), 7  ;;  %s4809_s21 = sshll.u32 (%p5002_p5), %s4987_s30, 4 }
  0x3e   : > { %877 = vmatpush.bf16.msra.mxu3 %v4626_v36  ;;  %v4625_v40 = vld [vmem:[%s5915_s3 + $0x30] sm:$0xff]  ;;  %v4624_v42 = vld [vmem:[%s5915_s3 + $0x28] sm:$0xff]  ;;  %v4623_v44 = vld [vmem:[%s5915_s3 + $0x20] sm:$0xff]  ;;  %s3493_s16 = sshll.u32 %s5926_s14, 3  ;;  %s3295_s23 = scalar_lea.vmem (%p5002_p5), %s5919_s7, %s4809_s21 }
  0x3f   : > { %v5097_v37 = vsel %vm646_vm0, %v3505_v34, 0  ;;  %v4635_v41 = vld [vmem:[%s5915_s3 + $0x70] sm:$0xff]  ;;  %v4634_v43 = vld [vmem:[%s5915_s3 + $0x68] sm:$0xff]  ;;  %v4633_v45 = vld [vmem:[%s5915_s3 + $0x60] sm:$0xff]  ;;  %s610_s20 = scalar_lea.vmem %s5920_s8, %s3493_s16 }
  0x40   : > { %657 = vmatpush.bf16.msra.mxu0 %v5097_v37  ;;  %723 = vmatpush.bf16.msra.mxu1 %v5097_v37  ;;  %v4628_v46 = vld [vmem:[%s5099_s15 + $0x18] sm:$0xff]  ;;  %v4618_v47 = vld [vmem:[%s5099_s15 + $0x8] sm:$0xff]  ;;  %v4631_v50 = vld [vmem:[%s5915_s3 + $0x50] sm:$0xff] }
  0x41   : > { %4858 = vmatpush.bf16.msra.mxu2 %v4635_v41  ;;  %v4632_v48 = vld [vmem:[%s5915_s3 + $0x58] sm:$0xff]  ;;  %v4621_v51 = vld [vmem:[%s5915_s3 + $0x10] sm:$0xff]  ;;  %v4630_v52 = vld [vmem:[%s5915_s3 + $0x48] sm:$0xff] }
  0x42   : > { %878 = vmatpush.bf16.msra.mxu3 %v4625_v40  ;;  %v4622_v49 = vld [vmem:[%s5915_s3 + $0x18] sm:$0xff]  ;;  %v4620_v53 = vld [vmem:[%s5915_s3 + $0x8] sm:$0xff]  ;;  %v4629_v54 = vld [vmem:[%s5915_s3 + $0x40] sm:$0xff] }
  0x43   : > { %3506 = vmatmul.msk.bf16.vlgmr.msra.gmra.mxu0 %vm639_vm1, %v4617_v38  ;;  %3520 = vmatmul.msk.bf16.vlgmr.msra.gmra.mxu1 %vm639_vm1, %v4627_v39  ;;  %v4619_v55 = vld [vmem:[%s5915_s3] sm:$0xff]  ;;  %v4638_v28 = vld [vmem:[%s5099_s15 + $0x28] sm:$0xff]  ;;  %v4647_v29 = vld [vmem:[%s5099_s15 + $0x30] sm:$0xff] }
  0x44   : > { %810 = vmatpush.bf16.msrb.mxu0 %v4636_v35  ;;  %v5158_v58 = vld [vmem:[%s5914_s2] ss:$0 sm:$0xff]  ;;  %v4648_v32 = vld [vmem:[%s5099_s15 + $0x38] sm:$0xff]  ;;  %v4645_v35 = vld [vmem:[%s5915_s3 + $0xb0] sm:$0xff] }
  0x45   : > { %4859 = vmatpush.bf16.msra.mxu2 %v4634_v43  ;;  %v4637_v19 = vld [vmem:[%s5099_s15 + $0x20] sm:$0xff]  ;;  %v4646_v33 = vld [vmem:[%s5915_s3 + $0xb8] sm:$0xff]  ;;  %v4644_v36 = vld [vmem:[%s5915_s3 + $0xa8] sm:$0xff] }
  0x46   : > { %879 = vmatpush.bf16.msra.mxu3 %v4624_v42  ;;  %v4665_v34 = vld [vmem:[%s5099_s15 + $0x40] sm:$0xff]  ;;  %1011 = vmatpush.bf16.msrb.mxu1 %v4646_v33  ;;  %v4642_v39 = vld [vmem:[%s5915_s3 + $0x98] sm:$0xff]  ;;  %v4666_v40 = vld [vmem:[%s5099_s15 + $0x48] sm:$0xff] }
  0x47   : > { %v4643_v38 = vld [vmem:[%s5915_s3 + $0xa0] sm:$0xff]  ;;  %v4656_v42 = vld [vmem:[%s5915_s3 + $0xf8] sm:$0xff] }
  0x48   : > { %811 = vmatpush.bf16.msrb.mxu0 %v4635_v41  ;;  %v4641_v41 = vld [vmem:[%s5915_s3 + $0x90] sm:$0xff]  ;;  %v4694_v33 = vld [vmem:[%s5915_s3 + $0xb8] sm:$0xff] }
  0x49   : > { %4860 = vmatpush.bf16.msra.mxu2 %v4633_v45 }
  0x4a   : > { %880 = vmatpush.bf16.msra.mxu3 %v4623_v44  ;;  %1012 = vmatpush.bf16.msrb.mxu1 %v4645_v35  ;;  %v4655_v44 = vld [vmem:[%s5915_s3 + $0xf0] sm:$0xff]  ;;  %v4692_v35 = vld [vmem:[%s5915_s3 + $0xa8] sm:$0xff] }
  0x4c   : > { %812 = vmatpush.bf16.msrb.mxu0 %v4634_v43  ;;  %v4640_v43 = vld [vmem:[%s5915_s3 + $0x88] sm:$0xff] }
  0x4d   : > { %4861 = vmatpush.bf16.msra.mxu2 %v4632_v48 }
  0x4e   : > { %881 = vmatpush.bf16.msra.mxu3 %v4622_v49  ;;  %1013 = vmatpush.bf16.msrb.mxu1 %v4644_v36  ;;  %v4653_v49 = vld [vmem:[%s5915_s3 + $0xe0] sm:$0xff] }
  0x50   : > { %813 = vmatpush.bf16.msrb.mxu0 %v4633_v45  ;;  %v4639_v45 = vld [vmem:[%s5915_s3 + $0x80] sm:$0xff] }
  0x51   : > { %4862 = vmatpush.bf16.msra.mxu2 %v4631_v50 }
  0x52   : > { %882 = vmatpush.bf16.msra.mxu3 %v4621_v51  ;;  %1014 = vmatpush.bf16.msrb.mxu1 %v4643_v38 }
  0x53   : > { %3521 = vmatmul.msk.bf16.gmra.mxu1 %vm639_vm1, %v4628_v46  ;;  %3507 = vmatmul.msk.bf16.gmra.mxu0 %vm639_vm1, %v4618_v47  ;;  %v4654_v46 = vld [vmem:[%s5915_s3 + $0xe8] sm:$0xff] }
  0x54   : > { %814 = vmatpush.bf16.msrb.mxu0 %v4632_v48  ;;  %v4685_v48 = vld [vmem:[%s5099_s15 + $0x60] sm:$0xff] }
  0x55   : > { %4863 = vmatpush.bf16.msra.mxu2 %v4630_v52 }
  0x56   : > { %883 = vmatpush.bf16.msra.mxu3 %v4620_v53  ;;  %1015 = vmatpush.bf16.msrb.mxu1 %v4642_v39  ;;  %v4650_v53 = vld [vmem:[%s5915_s3 + $0xc8] sm:$0xff] }
  0x58   : > { %815 = vmatpush.bf16.msrb.mxu0 %v4631_v50  ;;  %v4652_v50 = vld [vmem:[%s5915_s3 + $0xd8] sm:$0xff] }
  0x59   : > { %4864 = vmatpush.bf16.msra.mxu2 %v4629_v54 }
  0x5a   : > { %884 = vmatpush.bf16.msra.mxu3 %v4619_v55  ;;  %1016 = vmatpush.bf16.msrb.mxu1 %v4641_v41  ;;  %v4686_v55 = vld [vmem:[%s5099_s15 + $0x68] sm:$0xff]  ;;  %v4691_v41 = vld [vmem:[%s5915_s3 + $0xa0] sm:$0xff] }
  0x5c   : > { %816 = vmatpush.bf16.msrb.mxu0 %v4630_v52  ;;  %v4651_v52 = vld [vmem:[%s5915_s3 + $0xd0] sm:$0xff] }
  0x5d   : > { %1062 = vmatpush.bf16.msrb.mxu2 %v5097_v37 }
  0x5e   : > { %1149 = vmatpush.bf16.msrb.mxu3 %v4656_v42  ;;  %1017 = vmatpush.bf16.msrb.mxu1 %v4640_v43  ;;  %v4690_v42 = vld [vmem:[%s5915_s3 + $0x98] sm:$0xff] }
  0x60   : > { %817 = vmatpush.bf16.msrb.mxu0 %v4629_v54 }
  0x62   : > { %1150 = vmatpush.bf16.msrb.mxu3 %v4655_v44  ;;  %1018 = vmatpush.bf16.msrb.mxu1 %v4639_v45  ;;  %v4689_v45 = vld [vmem:[%s5915_s3 + $0x90] sm:$0xff] }
  0x64   : > { %924 = vmatpush.bf16.msra.mxu0 %v5097_v37 }
  0x66   : > { %1305 = vmatpush.bf16.msra.mxu1 %v5097_v37  ;;  %1151 = vmatpush.bf16.msrb.mxu3 %v4654_v46 }
  0x6a   : > { %1152 = vmatpush.bf16.msrb.mxu3 %v4653_v49 }
  0x6e   : > { %1153 = vmatpush.bf16.msrb.mxu3 %v4652_v50 }
  0x72   : > { %1154 = vmatpush.bf16.msrb.mxu3 %v4651_v52 }
  0x76   : > { %1155 = vmatpush.bf16.msrb.mxu3 %v4650_v53 }
  0xc0   : > { %v659_v56 = vpop.f32.mrf.mxu0  ;;  %v725_v57 = vpop.f32.mrf.mxu1 }
  0xc1   : > { %v660_v59 = vadd.f32 %v5158_v58, %v659_v56  ;;  %v726_v60 = vadd.f32 %v5158_v58, %v725_v57  ;;  %v4649_v56 = vld [vmem:[%s5915_s3 + $0xc0] sm:$0xff] }
  0xc2   : > { %1156 = vmatpush.bf16.msrb.mxu3 %v4649_v56  ;;  %v4684_v56 = vld [vmem:[%s5915_s3 + $0x78] sm:$0xff] }
  0xc3   : > { %v669_v61 = vmul.f32 0.2, %v660_v59  ;;  %v735_v0 = vmul.f32 0.2, %v726_v60 }
  0xc5   : > { %v673_v3 = vmax.f32 %v660_v59, %v669_v61  ;;  %v739_v6 = vmax.f32 %v726_v60, %v735_v0 }
  0xc8   : > { %v661_v62 = vpop.f32.mrf.mxu0  ;;  %v727_v63 = vpop.f32.mrf.mxu1 }
  0xc9   : > { %v662_v1 = vadd.f32 %v5158_v58, %v661_v62  ;;  %v728_v2 = vadd.f32 %v5158_v58, %v727_v63 }
  0xcb   : > { %v670_v4 = vmul.f32 0.2, %v662_v1  ;;  %v736_v5 = vmul.f32 0.2, %v728_v2 }
  0xcd   : > { %v740_v7 = vmax.f32 %v728_v2, %v736_v5  ;;  %v674_v8 = vmax.f32 %v662_v1, %v670_v4 }
  0xcf   : > { %v743_v9 = vpack.c.bf16 %v740_v7, %v739_v6  ;;  %v677_v10 = vpack.c.bf16 %v674_v8, %v673_v3 }
  0xd0   : > { %v730_v11 = vpop.f32.mrf.mxu1  ;;  %v664_v21 = vpop.f32.mrf.mxu0 }
  0xd1   : > { %818 = vmatmul.bf16.vlgmr.msrb.gmra.mxu0 %v743_v9  ;;  %885 = vmatmul.bf16.vlgmr.msra.gmra.mxu3 %v677_v10  ;;  %v731_v12 = vadd.f32 %v5158_v58, %v730_v11  ;;  %v665_v22 = vadd.f32 %v5158_v58, %v664_v21 }
  0xd2   : > { %1239 = vmatpush.bf16.msrb.mxu0 %v5097_v37 }
  0xd3   : > { %v737_v13 = vmul.f32 0.2, %v731_v12  ;;  %v671_v23 = vmul.f32 0.2, %v665_v22 }
  0xd5   : > { %v741_v16 = vmax.f32 %v731_v12, %v737_v13  ;;  %v675_v26 = vmax.f32 %v665_v22, %v671_v23 }
  0xd8   : > { %v732_v14 = vpop.f32.mrf.mxu1  ;;  %v666_v24 = vpop.f32.mrf.mxu0 }
  0xd9   : > { %v733_v15 = vadd.f32 %v5158_v58, %v732_v14  ;;  %v667_v25 = vadd.f32 %v5158_v58, %v666_v24 }
  0xdb   : > { %v738_v17 = vmul.f32 0.2, %v733_v15  ;;  %v672_v27 = vmul.f32 0.2, %v667_v25 }
  0xdd   : > { %v742_v18 = vmax.f32 %v733_v15, %v738_v17  ;;  %v676_v30 = vmax.f32 %v667_v25, %v672_v27  ;;  %v4675_v25 = vld [vmem:[%s5099_s15 + $0x50] sm:$0xff] }
  0xdf   : > { %v744_v20 = vpack.c.bf16 %v742_v18, %v741_v16  ;;  %v678_v31 = vpack.c.bf16 %v676_v30, %v675_v26 }
  0xe1   : > { %823 = vmatmul.bf16.vlgmr.msra.gmra.mxu2 %v744_v20  ;;  %3614 = vmatmul.msk.bf16.vlgmr.msra.gmra.mxu0 %vm639_vm1, %v4637_v19 }
  0xe2   : > { %1505 = vmatpush.bf16.msra.mxu0 %v5097_v37  ;;  %890 = vmatmul.bf16.gmra.mxu3 %v678_v31 }
  0xe3   : > { %1391 = vmatpush.bf16.msra.mxu2 %v4684_v56  ;;  %v5373_v56 = vld [vmem:[%s5916_s4] ss:$0 sm:$0xff] }
  0xf1   : > { %3615 = vmatmul.msk.bf16.gmra.mxu0 %vm639_vm1, %v4638_v28  ;;  %3676 = vmatmul.msk.bf16.vlgmr.msrb.gmra.mxu2 %vm639_vm1, %v4647_v29 }
 0x101   : > { %3677 = vmatmul.msk.bf16.gmra.mxu2 %vm639_vm1, %v4648_v32  ;;  %3738 = vmatmul.msk.bf16.vlgmr.msrb.gmra.mxu0 %vm639_vm1, %v4665_v34  ;;  %v4676_v32 = vld [vmem:[%s5099_s15 + $0x58] sm:$0xff]  ;;  %v4693_v34 = vld [vmem:[%s5915_s3 + $0xb0] sm:$0xff] }
 0x111   : > { %3739 = vmatmul.msk.bf16.gmra.mxu0 %vm639_vm1, %v4666_v40 }
 0x121   : > { %3846 = vmatmul.msk.bf16.vlgmr.msra.gmra.mxu0 %vm639_vm1, %v4685_v48  ;;  %v4688_v48 = vld [vmem:[%s5915_s3 + $0x88] sm:$0xff] }
 0x131   : > { %3847 = vmatmul.msk.bf16.gmra.mxu0 %vm639_vm1, %v4686_v55 }
 0x14e   : > { %v5216_v47 = vpop.f32.mrf.mxu0 }
 0x156   : > { %v5226_v51 = vpop.f32.mrf.mxu0 }
 0x15e   : > { %v926_v54 = vpop.f32.mrf.mxu0 }
 0x15f   : > { %v927_v57 = vadd.f32 %v5158_v58, %v926_v54  ;;  %v4687_v54 = vld [vmem:[%s5915_s3 + $0x80] sm:$0xff] }
 0x161   : > { %v936_v61 = vmul.f32 0.2, %v927_v57 }
 0x163   : > { %v940_v0 = vmax.f32 %v927_v57, %v936_v61  ;;  %v4674_v57 = vld [vmem:[%s5915_s3 + $0x38] sm:$0xff] }
 0x164   : > { %v5240_v59 = vpop.f32.mrf.mxu2  ;;  %v4664_v61 = vld [vmem:[%s5917_s5 + $0x38] sm:$0xff]  ;;  %1458 = vmatpush.bf16.msra.mxu3 %v4674_v57 }
 0x166   : > { %v928_v60 = vpop.f32.mrf.mxu0 }
 0x167   : > { %v929_v62 = vadd.f32 %v5158_v58, %v928_v60 }
 0x169   : > { %v937_v63 = vmul.f32 0.2, %v929_v62 }
 0x16b   : > { %v941_v1 = vmax.f32 %v929_v62, %v937_v63  ;;  %v4683_v63 = vld [vmem:[%s5915_s3 + $0x70] sm:$0xff] }
 0x16c   : > { %v5243_v2 = vpop.f32.mrf.mxu2  ;;  %1392 = vmatpush.bf16.msra.mxu2 %v4683_v63 }
 0x16d   : > { %v944_v3 = vpack.c.bf16 %v941_v1, %v940_v0  ;;  %v4673_v0 = vld [vmem:[%s5915_s3 + $0x30] sm:$0xff] }
 0x16e   : > { %v931_v4 = vpop.f32.mrf.mxu0  ;;  %1459 = vmatpush.bf16.msra.mxu3 %v4673_v0 }
 0x16f   : > { %1019 = vmatmul.bf16.vlgmr.msrb.gmra.mxu1 %v944_v3  ;;  %v932_v5 = vadd.f32 %v5158_v58, %v931_v4  ;;  %v4663_v3 = vld [vmem:[%s5917_s5 + $0x30] sm:$0xff]  ;;  %v5304_v4 = vpop.f32.mrf.mxu3 }
 0x170   : > { %1591 = vmatpush.bf16.msrb.mxu1 %v4694_v33 }
 0x171   : > { %v938_v8 = vmul.f32 0.2, %v932_v5 }
 0x173   : > { %v942_v12 = vmax.f32 %v932_v5, %v938_v8  ;;  %v4682_v5 = vld [vmem:[%s5915_s3 + $0x68] sm:$0xff] }
 0x174   : > { %v1064_v6 = vpop.f32.mrf.mxu2  ;;  %1592 = vmatpush.bf16.msrb.mxu1 %v4693_v34  ;;  %1393 = vmatpush.bf16.msra.mxu2 %v4682_v5 }
 0x175   : > { %v1065_v9 = vadd.f32 %v5158_v58, %v1064_v6  ;;  %v4672_v6 = vld [vmem:[%s5915_s3 + $0x28] sm:$0xff] }
 0x176   : > { %v933_v7 = vpop.f32.mrf.mxu0  ;;  %1460 = vmatpush.bf16.msra.mxu3 %v4672_v6 }
 0x177   : > { %v934_v10 = vadd.f32 %v5158_v58, %v933_v7  ;;  %v1074_v13 = vmul.f32 0.2, %v1065_v9 }
 0x178   : > { %1593 = vmatpush.bf16.msrb.mxu1 %v4692_v35 }
 0x179   : > { %v939_v11 = vmul.f32 0.2, %v934_v10  ;;  %v1078_v18 = vmax.f32 %v1065_v9, %v1074_v13  ;;  %v4662_v9 = vld [vmem:[%s5917_s5 + $0x28] sm:$0xff] }
 0x17b   : > { %v943_v14 = vmax.f32 %v934_v10, %v939_v11  ;;  %v4681_v11 = vld [vmem:[%s5915_s3 + $0x60] sm:$0xff] }
 0x17c   : > { %v1066_v15 = vpop.f32.mrf.mxu2  ;;  %1594 = vmatpush.bf16.msrb.mxu1 %v4691_v41  ;;  %1394 = vmatpush.bf16.msra.mxu2 %v4681_v11  ;;  %v4667_v41 = vld [vmem:[%s5915_s3] sm:$0xff] }
 0x17d   : > { %v1067_v16 = vadd.f32 %v5158_v58, %v1066_v15  ;;  %v945_v17 = vpack.c.bf16 %v943_v14, %v942_v12  ;;  %v4671_v12 = vld [vmem:[%s5915_s3 + $0x20] sm:$0xff] }
 0x17e   : > { %v1241_v36 = vpop.f32.mrf.mxu0  ;;  %1461 = vmatpush.bf16.msra.mxu3 %v4671_v12  ;;  %v4661_v15 = vld [vmem:[%s5917_s5 + $0x20] sm:$0xff] }
 0x17f   : > { %v1075_v19 = vmul.f32 0.2, %v1067_v16  ;;  %1024 = vmatmul.bf16.gmra.mxu1 %v945_v17 }
 0x180   : > { %1595 = vmatpush.bf16.msrb.mxu1 %v4690_v42 }
 0x181   : > { %v1079_v20 = vmax.f32 %v1067_v16, %v1075_v19  ;;  %v4670_v19 = vld [vmem:[%s5915_s3 + $0x18] sm:$0xff] }
 0x182   : > { %1462 = vmatpush.bf16.msra.mxu3 %v4670_v19 }
 0x183   : > { %v1082_v21 = vpack.c.bf16 %v1079_v20, %v1078_v18  ;;  %v4680_v18 = vld [vmem:[%s5915_s3 + $0x58] sm:$0xff]  ;;  %v1242_v20 = vadd.f32 %v5158_v58, %v1241_v36  ;;  %v4658_v36 = vld [vmem:[%s5917_s5 + $0x8] sm:$0xff] }
 0x184   : > { %v1069_v22 = vpop.f32.mrf.mxu2  ;;  %1596 = vmatpush.bf16.msrb.mxu1 %v4689_v45  ;;  %1395 = vmatpush.bf16.msra.mxu2 %v4680_v18 }
 0x185   : > { %1157 = vmatmul.bf16.vlgmr.msrb.gmra.mxu3 %v1082_v21  ;;  %v1070_v23 = vadd.f32 %v5158_v58, %v1069_v22 }
 0x186   : > { %v1243_v38 = vpop.f32.mrf.mxu0 }
 0x187   : > { %v1076_v24 = vmul.f32 0.2, %v1070_v23  ;;  %v1244_v21 = vadd.f32 %v5158_v58, %v1243_v38  ;;  %v4677_v38 = vld [vmem:[%s5915_s3 + $0x40] sm:$0xff] }
 0x188   : > { %1597 = vmatpush.bf16.msrb.mxu1 %v4688_v48 }
 0x189   : > { %v1080_v28 = vmax.f32 %v1070_v23, %v1076_v24  ;;  %v888_v23 = vpop.f32.mrf.mxu3  ;;  %v4660_v24 = vld [vmem:[%s5917_s5 + $0x18] sm:$0xff] }
 0x18a   : > { %v889_v63 = vadd.f32 %v888_v23, %v5226_v51 }
 0x18c   : > { %v1071_v26 = vpop.f32.mrf.mxu2  ;;  %1598 = vmatpush.bf16.msrb.mxu1 %v4687_v54 }
 0x18d   : > { %v1072_v27 = vadd.f32 %v5158_v58, %v1071_v26  ;;  %v4669_v26 = vld [vmem:[%s5915_s3 + $0x10] sm:$0xff] }
 0x18e   : > { %v5264_v39 = vpop.f32.mrf.mxu0  ;;  %1463 = vmatpush.bf16.msra.mxu3 %v4669_v26 }
 0x18f   : > { %v1077_v29 = vmul.f32 0.2, %v1072_v27  ;;  %3752 = vmatmul.msk.bf16.vlgmr.msra.gmra.mxu1 %vm639_vm1, %v4675_v25  ;;  %v4679_v25 = vld [vmem:[%s5915_s3 + $0x50] sm:$0xff]  ;;  %v1247_v45 = vadd.f32 %v5158_v58, %v5264_v39 }
 0x190   : > { %1928 = vmatpush.bf16.msra.mxu1 %v4664_v61  ;;  %1396 = vmatpush.bf16.msra.mxu2 %v4679_v25 }
 0x191   : > { %v1081_v30 = vmax.f32 %v1072_v27, %v1077_v29  ;;  %v1251_v27 = vmul.f32 0.2, %v1242_v20  ;;  %v4659_v29 = vld [vmem:[%s5917_s5 + $0x10] sm:$0xff]  ;;  %v891_v35 = vpop.f32.mrf.mxu3 }
 0x193   : > { %v1083_v31 = vpack.c.bf16 %v1081_v30, %v1080_v28  ;;  %v1252_v28 = vmul.f32 0.2, %v1244_v21  ;;  %v1255_v33 = vmax.f32 %v1242_v20, %v1251_v27 }
 0x194   : > { %1929 = vmatpush.bf16.msra.mxu1 %v4663_v3 }
 0x195   : > { %1162 = vmatmul.bf16.gmra.mxu3 %v1083_v31  ;;  %v4678_v31 = vld [vmem:[%s5915_s3 + $0x48] sm:$0xff]  ;;  %v1256_v34 = vmax.f32 %v1244_v21, %v1252_v28 }
 0x196   : > { %v5266_v40 = vpop.f32.mrf.mxu0  ;;  %1397 = vmatpush.bf16.msra.mxu2 %v4678_v31 }
 0x197   : > { %v1259_v42 = vpack.c.bf16 %v1256_v34, %v1255_v33  ;;  %v1249_v48 = vadd.f32 %v5158_v58, %v5266_v40 }
 0x198   : > { %1930 = vmatpush.bf16.msra.mxu1 %v4662_v9  ;;  %v892_v9 = vadd.f32 %v891_v35, %v5240_v59 }
 0x19a   : > { %1398 = vmatpush.bf16.msra.mxu2 %v4677_v38 }
 0x19c   : > { %1931 = vmatpush.bf16.msra.mxu1 %v4661_v15 }
 0x19e   : > { %v1507_v43 = vpop.f32.mrf.mxu0  ;;  %1642 = vmatpush.bf16.msrb.mxu2 %v5097_v37 }
 0x19f   : > { %3753 = vmatmul.msk.bf16.gmra.mxu1 %vm639_vm1, %v4676_v32  ;;  %v1508_v44 = vadd.f32 %v5158_v58, %v1507_v43  ;;  %v4668_v32 = vld [vmem:[%s5915_s3 + $0x8] sm:$0xff]  ;;  %v4657_v43 = vld [vmem:[%s5917_s5] sm:$0xff] }
 0x1a0   : > { %1932 = vmatpush.bf16.msra.mxu1 %v4660_v24  ;;  %1464 = vmatpush.bf16.msra.mxu3 %v4668_v32 }
 0x1a1   : > { %v1517_v46 = vmul.f32 0.2, %v1508_v44 }
 0x1a3   : > { %v1521_v52 = vmax.f32 %v1508_v44, %v1517_v46  ;;  %v893_v46 = vpop.f32.mrf.mxu3 }
 0x1a4   : > { %1933 = vmatpush.bf16.msra.mxu1 %v4659_v29  ;;  %1465 = vmatpush.bf16.msra.mxu3 %v4667_v41  ;;  %v894_v25 = vadd.f32 %v893_v46, %v5243_v2 }
 0x1a6   : > { %v1509_v49 = vpop.f32.mrf.mxu0 }
 0x1a7   : > { %v1510_v50 = vadd.f32 %v5158_v58, %v1509_v49  ;;  %1466 = vmatmul.bf16.vlgmr.msra.gmra.mxu3 %v1259_v42  ;;  %v1253_v49 = vmul.f32 0.2, %v1247_v45 }
 0x1a8   : > { %1934 = vmatpush.bf16.msra.mxu1 %v4658_v36 }
 0x1a9   : > { %v1518_v53 = vmul.f32 0.2, %v1510_v50  ;;  %v1257_v54 = vmax.f32 %v1247_v45, %v1253_v49 }
 0x1ab   : > { %v1522_v55 = vmax.f32 %v1510_v50, %v1518_v53  ;;  %v1254_v53 = vmul.f32 0.2, %v1249_v48 }
 0x1ac   : > { %1935 = vmatpush.bf16.msra.mxu1 %v4657_v43 }
 0x1ad   : > { %v1525_v60 = vpack.c.bf16 %v1522_v55, %v1521_v52  ;;  %v887_v52 = vadd.f32 %v5304_v4, %v5216_v47  ;;  %v1258_v39 = vmax.f32 %v1249_v48, %v1254_v53  ;;  %v4695_v53 = vld [vmem:[%s5099_s15 + $0x70] sm:$0xff] }
 0x1ae   : > { %v1512_v62 = vpop.f32.mrf.mxu0 }
 0x1af   : > { %1599 = vmatmul.bf16.vlgmr.msrb.gmra.mxu1 %v1525_v60  ;;  %v1513_v1 = vadd.f32 %v5158_v58, %v1512_v62  ;;  %v1260_v40 = vpack.c.bf16 %v1258_v39, %v1257_v54  ;;  %v4696_v54 = vld [vmem:[%s5099_s15 + $0x78] sm:$0xff]  ;;  %v4701_v39 = vld [vmem:[%s5915_s3 + $0xe0] sm:$0xff] }
 0x1b1   : > { %v1519_v7 = vmul.f32 0.2, %v1513_v1 }
 0x1b3   : > { %v1523_v13 = vmax.f32 %v1513_v1, %v1519_v7 }
 0x1b6   : > { %v1514_v8 = vpop.f32.mrf.mxu0 }
 0x1b7   : > { %v1515_v10 = vadd.f32 %v5158_v58, %v1514_v8  ;;  %1471 = vmatmul.bf16.gmra.mxu3 %v1260_v40  ;;  %v4700_v40 = vld [vmem:[%s5915_s3 + $0xd8] sm:$0xff] }
 0x1b9   : > { %v1520_v14 = vmul.f32 0.2, %v1515_v10 }
 0x1bb   : > { %v1524_v16 = vmax.f32 %v1515_v10, %v1520_v14 }
 0x1bd   : > { %v1526_v22 = vpack.c.bf16 %v1524_v16, %v1523_v13 }
 0x1bf   : > { %1604 = vmatmul.bf16.gmra.mxu1 %v1526_v22 }
 0x1ec   : > { %v1020_v17 = vpop.f32.mrf.mxu1 }
 0x1ed   : > { %v1030_v55 = vadd.f32 %v1020_v17, %v887_v52 }
 0x1f4   : > { %v1022_v30 = vpop.f32.mrf.mxu1 }
 0x1f5   : > { %v1031_v47 = vadd.f32 %v1022_v30, %v889_v63 }
 0x1fc   : > { %v1025_v44 = vpop.f32.mrf.mxu1 }
 0x1fd   : > { %v1032_v51 = vadd.f32 %v1025_v44, %v892_v9 }
 0x204   : > { %v1027_v50 = vpop.f32.mrf.mxu1 }
 0x205   : > { %v1033_v27 = vadd.f32 %v1027_v50, %v894_v25  ;;  %v4711_v25 = vld [vmem:[%s5917_s5 + $0x70] sm:$0xff] }
 0x208   : > { %v1158_v57 = vpop.f32.mrf.mxu3 }
 0x209   : > { %v1168_v60 = vadd.f32 %v1158_v57, %v1030_v55  ;;  %v4704_v55 = vld [vmem:[%s5915_s3 + $0xf8] sm:$0xff]  ;;  %v4703_v57 = vld [vmem:[%s5915_s3 + $0xf0] sm:$0xff] }
 0x20a   : > { %1728 = vmatpush.bf16.msrb.mxu3 %v4704_v55  ;;  %v4730_v55 = vld [vmem:[%s5915_s3 + $0x68] sm:$0xff] }
 0x20b   : > { %v1175_v61 = vadd.f32 %v5373_v56, %v1168_v60  ;;  %v4702_v60 = vld [vmem:[%s5915_s3 + $0xe8] sm:$0xff] }
 0x20c   : > { %v1307_v62 = vpop.f32.mrf.mxu1 }
 0x20d   : > { %v1179_v0 = vmul.f32 0.2, %v1175_v61  ;;  %v1308_v1 = vadd.f32 %v5158_v58, %v1307_v62  ;;  %v4699_v62 = vld [vmem:[%s5915_s3 + $0xd0] sm:$0xff] }
 0x20e   : > { %1729 = vmatpush.bf16.msrb.mxu3 %v4703_v57  ;;  %v4720_v57 = vld [vmem:[%s5915_s3 + $0x28] sm:$0xff] }
 0x20f   : > { %v1183_v5 = vmax.f32 %v1175_v61, %v1179_v0  ;;  %v1317_v7 = vmul.f32 0.2, %v1308_v1  ;;  %v4697_v0 = vld [vmem:[%s5915_s3 + $0xc0] sm:$0xff] }
 0x210   : > { %v1160_v3 = vpop.f32.mrf.mxu3 }
 0x211   : > { %v1169_v4 = vadd.f32 %v1160_v3, %v1031_v47  ;;  %v1187_v12 = vpack.c.bf16 %v1183_v5, %v1183_v5  ;;  %v1321_v15 = vmax.f32 %v1308_v1, %v1317_v7  ;;  %v4698_v47 = vld [vmem:[%s5915_s3 + $0xc8] sm:$0xff]  ;;  %v4713_v3 = vld [vmem:[%s5099_s15 + $0x80] sm:$0xff] }
 0x212   : > { %1730 = vmatpush.bf16.msrb.mxu3 %v4702_v60  ;;  %v4739_v60 = vld [vmem:[%s5915_s3 + $0xa0] sm:$0xff] }
 0x213   : > { %v1176_v6 = vadd.f32 %v5373_v56, %v1169_v4  ;;  %v1872_v21 = vunpack.c.l.b16 %v1187_v12 }
 0x214   : > { %v1309_v8 = vpop.f32.mrf.mxu1 }
 0x215   : > { %v1180_v10 = vmul.f32 0.2, %v1176_v6  ;;  %v1310_v11 = vadd.f32 %v5158_v58, %v1309_v8 }
 0x216   : > { %1731 = vmatpush.bf16.msrb.mxu3 %v4701_v39 }
 0x217   : > { %v1184_v13 = vmax.f32 %v1176_v6, %v1180_v10  ;;  %v1318_v14 = vmul.f32 0.2, %v1310_v11  ;;  %v4714_v6 = vld [vmem:[%s5099_s15 + $0x88] sm:$0xff] }
 0x218   : > { %v1163_v16 = vpop.f32.mrf.mxu3 }
 0x219   : > { %v1188_v17 = vpack.c.bf16 %v1184_v13, %v1184_v13  ;;  %v4813_v18 = vpack.c.bf16 %v1184_v13, %v1183_v5  ;;  %v1322_v19 = vmax.f32 %v1310_v11, %v1318_v14  ;;  %v1170_v20 = vadd.f32 %v1163_v16, %v1032_v51 }
 0x21a   : > { %1732 = vmatpush.bf16.msrb.mxu3 %v4700_v40 }
 0x21b   : > { %4814 = vst [vmem:[%s5383_s19] sm:$0xff] %v4813_v18   ;;  %v1873_v59 = vunpack.c.l.b16 %v1188_v17  ;;  %v1325_v22 = vpack.c.bf16 %v1322_v19, %v1321_v15  ;;  %v1177_v23 = vadd.f32 %v5373_v56, %v1170_v20  ;;  %v4733_v15 = vld [vmem:[%s5099_s15 + $0xa0] sm:$0xff] }
 0x21c   : > { %v1312_v24 = vpop.f32.mrf.mxu1 }
 0x21d   : > { %1399 = vmatmul.bf16.vlgmr.msra.gmra.mxu2 %v1325_v22  ;;  %v1876_v26 = vpack.c.b16 %v1873_v59, %v1872_v21  ;;  %v1181_v28 = vmul.f32 0.2, %v1177_v23  ;;  %v1313_v30 = vadd.f32 %v5158_v58, %v1312_v24  ;;  %v4712_v24 = vld [vmem:[%s5917_s5 + $0x78] sm:$0xff] }
 0x21e   : > { %1975 = vmatpush.bf16.msra.mxu2 %v5097_v37  ;;  %1733 = vmatpush.bf16.msrb.mxu3 %v4699_v62 }
 0x21f   : > { %1936 = vmatmul.bf16.vlgmr.msra.gmra.mxu1 %v1876_v26  ;;  %v1185_v32 = vmax.f32 %v1177_v23, %v1181_v28  ;;  %v1319_v35 = vmul.f32 0.2, %v1313_v30  ;;  %v4734_v23 = vld [vmem:[%s5099_s15 + $0xa8] sm:$0xff]  ;;  %1849 = vmatpush.bf16.msrb.mxu0 %v4712_v24  ;;  %v4724_v28 = vld [vmem:[%s5099_s15 + $0x98] sm:$0xff] }
 0x220   : > { %v1165_v29 = vpop.f32.mrf.mxu3  ;;  %v4710_v26 = vld [vmem:[%s5917_s5 + $0x68] sm:$0xff] }
 0x221   : > { %v1171_v31 = vadd.f32 %v1165_v29, %v1033_v27  ;;  %v1189_v42 = vpack.c.bf16 %v1185_v32, %v1185_v32  ;;  %v1323_v43 = vmax.f32 %v1313_v30, %v1319_v35  ;;  %v4723_v27 = vld [vmem:[%s5099_s15 + $0x90] sm:$0xff] }
 0x222   : > { %1734 = vmatpush.bf16.msrb.mxu3 %v4698_v47  ;;  %v4707_v35 = vld [vmem:[%s5917_s5 + $0x50] sm:$0xff] }
 0x223   : > { %v1178_v33 = vadd.f32 %v5373_v56, %v1171_v31  ;;  %v1874_v49 = vunpack.c.l.b16 %v1189_v42  ;;  %1850 = vmatpush.bf16.msrb.mxu0 %v4711_v25  ;;  %v4709_v31 = vld [vmem:[%s5917_s5 + $0x60] sm:$0xff]  ;;  %v4742_v42 = vld [vmem:[%s5915_s3 + $0xb8] sm:$0xff] }
 0x224   : > { %v1314_v34 = vpop.f32.mrf.mxu1 }
 0x225   : > { %v1182_v36 = vmul.f32 0.2, %v1178_v33  ;;  %v1315_v2 = vadd.f32 %v5158_v58, %v1314_v34 }
 0x226   : > { %1735 = vmatpush.bf16.msrb.mxu3 %v4697_v0  ;;  %v4729_v0 = vld [vmem:[%s5915_s3 + $0x60] sm:$0xff] }
 0x227   : > { %v1186_v38 = vmax.f32 %v1178_v33, %v1182_v36  ;;  %v1320_v41 = vmul.f32 0.2, %v1315_v2  ;;  %1851 = vmatpush.bf16.msrb.mxu0 %v4710_v26  ;;  %v4708_v33 = vld [vmem:[%s5917_s5 + $0x58] sm:$0xff] }
 0x229   : > { %v4818_v44 = vpack.c.bf16 %v1186_v38, %v1185_v32  ;;  %v1324_v45 = vmax.f32 %v1315_v2, %v1320_v41  ;;  %v1190_v46 = vpack.c.bf16 %v1186_v38, %v1186_v38  ;;  %v4706_v2 = vld [vmem:[%s5917_s5 + $0x48] sm:$0xff]  ;;  %v4705_v41 = vld [vmem:[%s5917_s5 + $0x40] sm:$0xff] }
 0x22a   : > { %2041 = vmatpush.bf16.msra.mxu3 %v5097_v37  ;;  %v1467_v29 = vpop.f32.mrf.mxu3 }
 0x22b   : > { %4850 = vst [vmem:[%s5383_s19 + $0x8] sm:$0xff] %v4818_v44   ;;  %v1326_v48 = vpack.c.bf16 %v1324_v45, %v1323_v43  ;;  %v1875_v50 = vunpack.c.l.b16 %v1190_v46  ;;  %1852 = vmatpush.bf16.msrb.mxu0 %v4709_v31  ;;  %v4732_v43 = vld [vmem:[%s5915_s3 + $0x78] sm:$0xff]  ;;  %v4741_v45 = vld [vmem:[%s5915_s3 + $0xb0] sm:$0xff]  ;;  %v4735_v31 = vld [vmem:[%s5915_s3 + $0x80] sm:$0xff] }
 0x22c   : > { %v4722_v44 = vld [vmem:[%s5915_s3 + $0x38] sm:$0xff]  ;;  %v1600_v46 = vpop.f32.mrf.mxu1 }
 0x22d   : > { %1404 = vmatmul.bf16.gmra.mxu2 %v1326_v48  ;;  %v1877_v52 = vpack.c.b16 %v1875_v50, %v1874_v49  ;;  %2194 = vmatpush.bf16.msrb.mxu1 %v4722_v44  ;;  %v4731_v50 = vld [vmem:[%s5915_s3 + $0x70] sm:$0xff] }
 0x22f   : > { %1941 = vmatmul.bf16.gmra.mxu1 %v1877_v52  ;;  %1853 = vmatpush.bf16.msrb.mxu0 %v4708_v33  ;;  %v4721_v52 = vld [vmem:[%s5915_s3 + $0x30] sm:$0xff] }
 0x231   : > { %2195 = vmatpush.bf16.msrb.mxu1 %v4721_v52  ;;  %v4715_v52 = vld [vmem:[%s5915_s3] sm:$0xff] }
 0x232   : > { %v1469_v32 = vpop.f32.mrf.mxu3 }
 0x233   : > { %1854 = vmatpush.bf16.msrb.mxu0 %v4707_v35 }
 0x234   : > { %v1602_v62 = vpop.f32.mrf.mxu1 }
 0x235   : > { %2196 = vmatpush.bf16.msrb.mxu1 %v4720_v57 }
 0x237   : > { %1855 = vmatpush.bf16.msrb.mxu0 %v4706_v2 }
 0x23a   : > { %v1472_v36 = vpop.f32.mrf.mxu3 }
 0x23b   : > { %1856 = vmatpush.bf16.msrb.mxu0 %v4705_v41 }
 0x23c   : > { %v1605_v24 = vpop.f32.mrf.mxu1 }
 0x23d   : > { %3908 = vmatmul.msk.bf16.vlgmr.msrb.gmra.mxu2 %vm639_vm1, %v4695_v53  ;;  %v4740_v53 = vld [vmem:[%s5915_s3 + $0xa8] sm:$0xff] }
 0x23e   : > { %2241 = vmatpush.bf16.msrb.mxu2 %v5097_v37 }
 0x23f   : > { %2127 = vmatpush.bf16.msra.mxu0 %v4732_v43 }
 0x242   : > { %v5485_v48 = vpop.f32.mrf.mxu3 }
 0x243   : > { %2128 = vmatpush.bf16.msra.mxu0 %v4731_v50  ;;  %v4725_v50 = vld [vmem:[%s5915_s3 + $0x40] sm:$0xff] }
 0x247   : > { %2129 = vmatpush.bf16.msra.mxu0 %v4730_v55 }
 0x24b   : > { %2130 = vmatpush.bf16.msra.mxu0 %v4729_v0 }
 0x24d   : > { %3909 = vmatmul.msk.bf16.gmra.mxu2 %vm639_vm1, %v4696_v54 }
 0x25d   : > { %4054 = vmatmul.msk.bf16.vlgmr.msra.gmra.mxu2 %vm639_vm1, %v4713_v3  ;;  %v4719_v3 = vld [vmem:[%s5915_s3 + $0x20] sm:$0xff] }
 0x25e   : > { %2197 = vmatpush.bf16.msrb.mxu1 %v4719_v3 }
 0x26d   : > { %4055 = vmatmul.msk.bf16.gmra.mxu2 %vm639_vm1, %v4714_v6 }
 0x27d   : > { %4162 = vmatmul.msk.bf16.vlgmr.msrb.gmra.mxu2 %vm639_vm1, %v4733_v15 }
 0x28d   : > { %4163 = vmatmul.msk.bf16.gmra.mxu2 %vm639_vm1, %v4734_v23 }
 0x2a0   : > { %v5410_v61 = vpop.f32.mrf.mxu2 }
 0x2a1   : > { %v1468_v54 = vadd.f32 %v1467_v29, %v5410_v61 }
 0x2a3   : > { %v1610_v39 = vadd.f32 %v1600_v46, %v1468_v54 }
 0x2a8   : > { %v5418_v63 = vpop.f32.mrf.mxu2 }
 0x2a9   : > { %v1470_v6 = vadd.f32 %v1469_v32, %v5418_v63 }
 0x2b0   : > { %v5427_v1 = vpop.f32.mrf.mxu2 }
 0x2b8   : > { %v5431_v4 = vpop.f32.mrf.mxu2 }
 0x2c0   : > { %v1644_v5 = vpop.f32.mrf.mxu2 }
 0x2c1   : > { %v1645_v7 = vadd.f32 %v5158_v58, %v1644_v5  ;;  %v4738_v5 = vld [vmem:[%s5915_s3 + $0x98] sm:$0xff] }
 0x2c3   : > { %v1654_v9 = vmul.f32 0.2, %v1645_v7 }
 0x2c5   : > { %v1658_v51 = vmax.f32 %v1645_v7, %v1654_v9  ;;  %v4728_v9 = vld [vmem:[%s5915_s3 + $0x58] sm:$0xff] }
 0x2c6   : > { %2131 = vmatpush.bf16.msra.mxu0 %v4728_v9  ;;  %v5574_v9 = vld [vmem:[%s5914_s2] ss:$0 sm:$0xff] }
 0x2c8   : > { %v1646_v8 = vpop.f32.mrf.mxu2 }
 0x2c9   : > { %v1647_v10 = vadd.f32 %v5158_v58, %v1646_v8 }
 0x2cb   : > { %v1655_v11 = vmul.f32 0.2, %v1647_v10 }
 0x2cd   : > { %v1659_v12 = vmax.f32 %v1647_v10, %v1655_v11  ;;  %v4718_v10 = vld [vmem:[%s5915_s3 + $0x18] sm:$0xff]  ;;  %v4737_v11 = vld [vmem:[%s5915_s3 + $0x90] sm:$0xff] }
 0x2ce   : > { %2198 = vmatpush.bf16.msrb.mxu1 %v4718_v10 }
 0x2cf   : > { %v1662_v13 = vpack.c.bf16 %v1659_v12, %v1658_v51  ;;  %v1611_v51 = vadd.f32 %v1602_v62, %v1470_v6 }
 0x2d0   : > { %v1649_v14 = vpop.f32.mrf.mxu2 }
 0x2d1   : > { %1736 = vmatmul.bf16.vlgmr.msrb.gmra.mxu3 %v1662_v13  ;;  %v1650_v16 = vadd.f32 %v5158_v58, %v1649_v14 }
 0x2d2   : > { %2327 = vmatpush.bf16.msrb.mxu3 %v4742_v42 }
 0x2d3   : > { %v1656_v18 = vmul.f32 0.2, %v1650_v16 }
 0x2d5   : > { %v1660_v21 = vmax.f32 %v1650_v16, %v1656_v18  ;;  %v4727_v18 = vld [vmem:[%s5915_s3 + $0x50] sm:$0xff] }
 0x2d6   : > { %2328 = vmatpush.bf16.msrb.mxu3 %v4741_v45  ;;  %2132 = vmatpush.bf16.msra.mxu0 %v4727_v18 }
 0x2d8   : > { %v1651_v17 = vpop.f32.mrf.mxu2 }
 0x2d9   : > { %v1652_v19 = vadd.f32 %v5158_v58, %v1651_v17 }
 0x2da   : > { %2329 = vmatpush.bf16.msrb.mxu3 %v4740_v53  ;;  %v1475_v53 = vadd.f32 %v5485_v48, %v5431_v4 }
 0x2db   : > { %v1657_v20 = vmul.f32 0.2, %v1652_v19 }
 0x2dd   : > { %v1661_v59 = vmax.f32 %v1652_v19, %v1657_v20  ;;  %v4717_v19 = vld [vmem:[%s5915_s3 + $0x10] sm:$0xff]  ;;  %v4736_v20 = vld [vmem:[%s5915_s3 + $0x88] sm:$0xff] }
 0x2de   : > { %2330 = vmatpush.bf16.msrb.mxu3 %v4739_v60  ;;  %2199 = vmatpush.bf16.msrb.mxu1 %v4717_v19 }
 0x2df   : > { %v1663_v22 = vpack.c.bf16 %v1661_v59, %v1660_v21  ;;  %v1473_v21 = vadd.f32 %v1472_v36, %v5427_v1  ;;  %v4716_v1 = vld [vmem:[%s5915_s3 + $0x8] sm:$0xff] }
 0x2e0   : > { %v1977_v30 = vpop.f32.mrf.mxu2 }
 0x2e1   : > { %1741 = vmatmul.bf16.gmra.mxu3 %v1663_v22  ;;  %v1978_v12 = vadd.f32 %v5158_v58, %v1977_v30  ;;  %v4726_v30 = vld [vmem:[%s5915_s3 + $0x48] sm:$0xff] }
 0x2e2   : > { %2331 = vmatpush.bf16.msrb.mxu3 %v4738_v5  ;;  %2133 = vmatpush.bf16.msra.mxu0 %v4726_v30 }
 0x2e3   : > { %v1987_v25 = vmul.f32 0.2, %v1978_v12  ;;  %2200 = vmatpush.bf16.msrb.mxu1 %v4716_v1 }
 0x2e5   : > { %v1991_v36 = vmax.f32 %v1978_v12, %v1987_v25 }
 0x2e6   : > { %2332 = vmatpush.bf16.msrb.mxu3 %v4737_v11  ;;  %2134 = vmatpush.bf16.msra.mxu0 %v4725_v50 }
 0x2e7   : > { %2201 = vmatpush.bf16.msrb.mxu1 %v4715_v52 }
 0x2e8   : > { %v1979_v34 = vpop.f32.mrf.mxu2 }
 0x2e9   : > { %v1980_v14 = vadd.f32 %v5158_v58, %v1979_v34  ;;  %v1612_v34 = vadd.f32 %v1605_v24, %v1473_v21 }
 0x2ea   : > { %2333 = vmatpush.bf16.msrb.mxu3 %v4736_v20 }
 0x2eb   : > { %v1988_v26 = vmul.f32 0.2, %v1980_v14 }
 0x2ed   : > { %v1992_v2 = vmax.f32 %v1980_v14, %v1988_v26 }
 0x2ee   : > { %2334 = vmatpush.bf16.msrb.mxu3 %v4735_v31 }
 0x2ef   : > { %v1995_v60 = vpack.c.bf16 %v1992_v2, %v1991_v36 }
 0x2f0   : > { %v5468_v38 = vpop.f32.mrf.mxu2 }
 0x2f1   : > { %4068 = vmatmul.msk.bf16.vlgmr.msra.gmra.mxu3 %vm639_vm1, %v4723_v27  ;;  %v1983_v4 = vadd.f32 %v5158_v58, %v5468_v38  ;;  %2202 = vmatmul.bf16.vlgmr.msrb.gmra.mxu1 %v1995_v60  ;;  %v4751_v60 = vld [vmem:[%s5915_s3 + $0xf0] sm:$0xff] }
 0x2f2   : > { %2636 = vmatpush.bf16.msra.mxu3 %v5097_v37 }
 0x2f3   : > { %v1989_v10 = vmul.f32 0.2, %v1983_v4 }
 0x2f5   : > { %v1993_v14 = vmax.f32 %v1983_v4, %v1989_v10  ;;  %v4761_v10 = vld [vmem:[%s5099_s15 + $0xc0] sm:$0xff] }
 0x2f8   : > { %v5487_v49 = vpop.f32.mrf.mxu2 }
 0x2f9   : > { %v1985_v3 = vadd.f32 %v5158_v58, %v5487_v49 }
 0x300   : > { %v2243_v47 = vpop.f32.mrf.mxu2 }
 0x301   : > { %4069 = vmatmul.msk.bf16.gmra.mxu3 %vm639_vm1, %v4724_v28  ;;  %v2244_v8 = vadd.f32 %v5158_v58, %v2243_v47 }
 0x303   : > { %v2253_v16 = vmul.f32 0.2, %v2244_v8 }
 0x305   : > { %v2257_v28 = vmax.f32 %v2244_v8, %v2253_v16 }
 0x308   : > { %v2245_v17 = vpop.f32.mrf.mxu2 }
 0x309   : > { %v2246_v23 = vadd.f32 %v5158_v58, %v2245_v17 }
 0x30b   : > { %v2254_v29 = vmul.f32 0.2, %v2246_v23 }
 0x30d   : > { %v2258_v35 = vmax.f32 %v2246_v23, %v2254_v29 }
 0x30f   : > { %v2261_v45 = vpack.c.bf16 %v2258_v35, %v2257_v28 }
 0x310   : > { %v2248_v46 = vpop.f32.mrf.mxu2 }
 0x311   : > { %2335 = vmatmul.bf16.vlgmr.msrb.gmra.mxu3 %v2261_v45  ;;  %v4772_v45 = vld [vmem:[%s5099_s15 + $0xd8] sm:$0xff] }
 0x312   : > { %2902 = vmatpush.bf16.msrb.mxu3 %v5097_v37 }
 0x318   : > { %v2250_v6 = vpop.f32.mrf.mxu2 }
 0x319   : > { %v2251_v38 = vadd.f32 %v5574_v9, %v2250_v6  ;;  %v4745_v6 = vld [vmem:[%s5915_s3 + $0xc0] sm:$0xff] }
 0x31b   : > { %v2256_v12 = vmul.f32 0.2, %v2251_v38 }
 0x31d   : > { %v2260_v49 = vmax.f32 %v2251_v38, %v2256_v12  ;;  %v4779_v38 = vld [vmem:[%s5915_s3 + $0x70] sm:$0xff] }
 0x354   : > { %v1737_v40 = vpop.f32.mrf.mxu3 }
 0x355   : > { %v1747_v61 = vadd.f32 %v1737_v40, %v1610_v39  ;;  %v2249_v40 = vadd.f32 %v5158_v58, %v2248_v46 }
 0x357   : > { %v1751_v7 = vadd.f32 %v5373_v56, %v1747_v61  ;;  %v1607_v61 = vpop.f32.mrf.mxu1  ;;  %v2255_v5 = vmul.f32 0.2, %v2249_v40 }
 0x358   : > { %v1613_v47 = vadd.f32 %v1607_v61, %v1475_v53  ;;  %v4750_v61 = vld [vmem:[%s5915_s3 + $0xe8] sm:$0xff] }
 0x359   : > { %v1755_v63 = vmul.f32 0.2, %v1751_v7 }
 0x35b   : > { %v1759_v59 = vmax.f32 %v1751_v7, %v1755_v63  ;;  %v1990_v63 = vmul.f32 0.2, %v1985_v3 }
 0x35c   : > { %v1739_v13 = vpop.f32.mrf.mxu3 }
 0x35d   : > { %v1748_v15 = vadd.f32 %v1739_v13, %v1611_v51  ;;  %v1763_v32 = vpack.c.bf16 %v1759_v59, %v1759_v59  ;;  %v2259_v51 = vmax.f32 %v2249_v40, %v2255_v5  ;;  %v1994_v17 = vmax.f32 %v1985_v3, %v1990_v63  ;;  %v4746_v5 = vld [vmem:[%s5915_s3 + $0xc8] sm:$0xff] }
 0x35e   : > { %v4778_v63 = vld [vmem:[%s5915_s3 + $0x68] sm:$0xff] }
 0x35f   : > { %v1752_v22 = vadd.f32 %v5373_v56, %v1748_v15  ;;  %v1793_v54 = vunpack.c.l.b16 %v1763_v32  ;;  %v2262_v19 = vpack.c.bf16 %v2260_v49, %v2259_v51  ;;  %v5591_v46 = vpop.f32.mrf.mxu1  ;;  %v4777_v51 = vld [vmem:[%s5915_s3 + $0x60] sm:$0xff] }
 0x361   : > { %v1756_v27 = vmul.f32 0.2, %v1752_v22  ;;  %2340 = vmatmul.bf16.gmra.mxu3 %v2262_v19 }
 0x363   : > { %v1760_v33 = vmax.f32 %v1752_v22, %v1756_v27  ;;  %v1996_v22 = vpack.c.bf16 %v1994_v17, %v1993_v14  ;;  %v4762_v14 = vld [vmem:[%s5099_s15 + $0xc8] sm:$0xff] }
 0x364   : > { %v1742_v41 = vpop.f32.mrf.mxu3 }
 0x365   : > { %v1764_v42 = vpack.c.bf16 %v1760_v33, %v1760_v33  ;;  %v4823_v43 = vpack.c.bf16 %v1760_v33, %v1759_v59  ;;  %v1749_v44 = vadd.f32 %v1742_v41, %v1612_v34  ;;  %2207 = vmatmul.bf16.gmra.mxu1 %v1996_v22 }
 0x367   : > { %4851 = vst [vmem:[%s5383_s19 + $0x10] sm:$0xff] %v4823_v43   ;;  %v1794_v55 = vunpack.c.l.b16 %v1764_v42  ;;  %v1753_v57 = vadd.f32 %v5373_v56, %v1749_v44  ;;  %v4743_v42 = vld [vmem:[%s5099_s15 + $0xb0] sm:$0xff]  ;;  %v4744_v43 = vld [vmem:[%s5099_s15 + $0xb8] sm:$0xff]  ;;  %v5595_v52 = vpop.f32.mrf.mxu1 }
 0x368   : > { %v4771_v44 = vld [vmem:[%s5099_s15 + $0xd0] sm:$0xff] }
 0x369   : > { %v1797_v39 = vpack.c.b16 %v1794_v55, %v1793_v54  ;;  %v1757_v62 = vmul.f32 0.2, %v1753_v57 }
 0x36b   : > { %1857 = vmatmul.bf16.vlgmr.msrb.gmra.mxu0 %v1797_v39  ;;  %v1761_v7 = vmax.f32 %v1753_v57, %v1757_v62  ;;  %v4752_v57 = vld [vmem:[%s5915_s3 + $0xf8] sm:$0xff] }
 0x36c   : > { %v1744_v48 = vpop.f32.mrf.mxu3  ;;  %2378 = vmatpush.bf16.msrb.mxu0 %v5097_v37  ;;  %2464 = vmatpush.bf16.msra.mxu1 %v4752_v57 }
 0x36d   : > { %v1750_v0 = vadd.f32 %v1744_v48, %v1613_v47  ;;  %v1765_v58 = vpack.c.bf16 %v1761_v7, %v1761_v7  ;;  %v4749_v47 = vld [vmem:[%s5915_s3 + $0xe0] sm:$0xff]  ;;  %v4748_v48 = vld [vmem:[%s5915_s3 + $0xd8] sm:$0xff] }
 0x36f   : > { %v1754_v8 = vadd.f32 %v5373_v56, %v1750_v0  ;;  %v1795_v20 = vunpack.c.l.b16 %v1765_v58  ;;  %v5599_v54 = vpop.f32.mrf.mxu1  ;;  %v4747_v0 = vld [vmem:[%s5915_s3 + $0xd0] sm:$0xff] }
 0x370   : > { %2465 = vmatpush.bf16.msra.mxu1 %v4751_v60  ;;  %v4775_v58 = vld [vmem:[%s5915_s3 + $0x50] sm:$0xff] }
 0x371   : > { %v1758_v11 = vmul.f32 0.2, %v1754_v8  ;;  %4338 = vmatmul.msk.bf16.vlgmr.msra.gmra.mxu3 %vm639_vm1, %v4761_v10  ;;  %v4792_v10 = vld [vmem:[%s5099_s15 + $0xf8] sm:$0xff] }
 0x373   : > { %v1762_v13 = vmax.f32 %v1754_v8, %v1758_v11  ;;  %v4780_v8 = vld [vmem:[%s5915_s3 + $0x78] sm:$0xff] }
 0x374   : > { %v2043_v15 = vpop.f32.mrf.mxu3  ;;  %2466 = vmatpush.bf16.msra.mxu1 %v4750_v61 }
 0x375   : > { %v4828_v16 = vpack.c.bf16 %v1762_v13, %v1761_v7  ;;  %v1766_v18 = vpack.c.bf16 %v1762_v13, %v1762_v13  ;;  %v2044_v25 = vadd.f32 %v5574_v9, %v2043_v15  ;;  %v4776_v13 = vld [vmem:[%s5915_s3 + $0x58] sm:$0xff] }
 0x377   : > { %4852 = vst [vmem:[%s5383_s19 + $0x18] sm:$0xff] %v4828_v16   ;;  %v1796_v21 = vunpack.c.l.b16 %v1766_v18  ;;  %v2053_v27 = vmul.f32 0.2, %v2044_v25  ;;  %v1944_v39 = vpop.f32.mrf.mxu1  ;;  %v4774_v16 = vld [vmem:[%s5915_s3 + $0x48] sm:$0xff] }
 0x378   : > { %2467 = vmatpush.bf16.msra.mxu1 %v4749_v47 }
 0x379   : > { %v1798_v59 = vpack.c.b16 %v1796_v21, %v1795_v20  ;;  %v2057_v30 = vmax.f32 %v2044_v25, %v2053_v27  ;;  %v4773_v20 = vld [vmem:[%s5915_s3 + $0x40] sm:$0xff] }
 0x37a   : > { %v4781_v25 = vld [vmem:[%s5099_s15 + $0xe0] sm:$0xff] }
 0x37b   : > { %1862 = vmatmul.bf16.gmra.mxu0 %v1798_v59 }
 0x37c   : > { %v2045_v23 = vpop.f32.mrf.mxu3  ;;  %2468 = vmatpush.bf16.msra.mxu1 %v4748_v48 }
 0x37d   : > { %v2046_v24 = vadd.f32 %v5574_v9, %v2045_v23 }
 0x37f   : > { %v2054_v26 = vmul.f32 0.2, %v2046_v24 }
 0x380   : > { %2469 = vmatpush.bf16.msra.mxu1 %v4747_v0  ;;  %v4760_v0 = vld [vmem:[%s5917_s5 + $0xb8] sm:$0xff] }
 0x381   : > { %v2058_v29 = vmax.f32 %v2046_v24, %v2054_v26  ;;  %4339 = vmatmul.msk.bf16.gmra.mxu3 %vm639_vm1, %v4762_v14  ;;  %2585 = vmatpush.bf16.msra.mxu2 %v4760_v0  ;;  %v4756_v14 = vld [vmem:[%s5917_s5 + $0x98] sm:$0xff]  ;;  %v4785_v0 = vld [vmem:[%s5915_s3 + $0x90] sm:$0xff] }
 0x383   : > { %v2061_v1 = vpack.c.bf16 %v2058_v29, %v2057_v30 }
 0x384   : > { %v2048_v28 = vpop.f32.mrf.mxu3  ;;  %2470 = vmatpush.bf16.msra.mxu1 %v4746_v5  ;;  %v4759_v5 = vld [vmem:[%s5917_s5 + $0xb0] sm:$0xff] }
 0x385   : > { %v2049_v33 = vadd.f32 %v5574_v9, %v2048_v28  ;;  %2586 = vmatpush.bf16.msra.mxu2 %v4759_v5 }
 0x387   : > { %v2055_v35 = vmul.f32 0.2, %v2049_v33 }
 0x388   : > { %2471 = vmatpush.bf16.msra.mxu1 %v4745_v6  ;;  %v4758_v6 = vld [vmem:[%s5917_s5 + $0xa8] sm:$0xff] }
 0x389   : > { %v2059_v2 = vmax.f32 %v2049_v33, %v2055_v35  ;;  %2587 = vmatpush.bf16.msra.mxu2 %v4758_v6 }
 0x38b   : > { %2135 = vmatmul.bf16.vlgmr.msra.gmra.mxu0 %v2061_v1 }
 0x38c   : > { %v2050_v31 = vpop.f32.mrf.mxu3  ;;  %2702 = vmatpush.bf16.msra.mxu0 %v5097_v37  ;;  %2788 = vmatpush.bf16.msrb.mxu1 %v4780_v8  ;;  %v4791_v8 = vld [vmem:[%s5099_s15 + $0xf0] sm:$0xff] }
 0x38d   : > { %v2051_v32 = vadd.f32 %v5574_v9, %v2050_v31 }
 0x38f   : > { %v2056_v34 = vmul.f32 0.2, %v2051_v32 }
 0x390   : > { %2789 = vmatpush.bf16.msrb.mxu1 %v4779_v38 }
 0x391   : > { %v2060_v36 = vmax.f32 %v2051_v32, %v2056_v34  ;;  %4446 = vmatmul.msk.bf16.vlgmr.msrb.gmra.mxu3 %vm639_vm1, %v4781_v25  ;;  %v4782_v34 = vld [vmem:[%s5099_s15 + $0xe8] sm:$0xff] }
 0x392   : > { %v4768_v25 = vld [vmem:[%s5915_s3 + $0x28] sm:$0xff] }
 0x393   : > { %v2062_v41 = vpack.c.bf16 %v2060_v36, %v2059_v2 }
 0x394   : > { %2790 = vmatpush.bf16.msrb.mxu1 %v4778_v63  ;;  %v2336_v38 = vpop.f32.mrf.mxu3 }
 0x398   : > { %2791 = vmatpush.bf16.msrb.mxu1 %v4777_v51  ;;  %v2203_v51 = vpop.f32.mrf.mxu1 }
 0x39b   : > { %2140 = vmatmul.bf16.gmra.mxu0 %v2062_v41 }
 0x39c   : > { %2792 = vmatpush.bf16.msrb.mxu1 %v4776_v13  ;;  %v2338_v63 = vpop.f32.mrf.mxu3  ;;  %v4757_v13 = vld [vmem:[%s5917_s5 + $0xa0] sm:$0xff] }
 0x39d   : > { %2588 = vmatpush.bf16.msra.mxu2 %v4757_v13 }
 0x3a0   : > { %2793 = vmatpush.bf16.msrb.mxu1 %v4775_v58  ;;  %v2205_v58 = vpop.f32.mrf.mxu1 }
 0x3a1   : > { %4447 = vmatmul.msk.bf16.gmra.mxu3 %vm639_vm1, %v4782_v34  ;;  %2589 = vmatpush.bf16.msra.mxu2 %v4756_v14  ;;  %v4788_v34 = vld [vmem:[%s5915_s3 + $0xa8] sm:$0xff] }
 0x3a4   : > { %2794 = vmatpush.bf16.msrb.mxu1 %v4774_v16 }
 0x3a8   : > { %2795 = vmatpush.bf16.msrb.mxu1 %v4773_v20 }
 0x3ab   : > { %4224 = vmatmul.msk.bf16.vlgmr.msrb.gmra.mxu0 %vm639_vm1, %v4743_v42 }
 0x3bb   : > { %4225 = vmatmul.msk.bf16.gmra.mxu0 %vm639_vm1, %v4744_v43 }
 0x3cb   : > { %4352 = vmatmul.msk.bf16.vlgmr.msra.gmra.mxu0 %vm639_vm1, %v4771_v44 }
 0x3db   : > { %4353 = vmatmul.msk.bf16.gmra.mxu0 %vm639_vm1, %v4772_v45 }
 0x3e2   : > { %v2208_v16 = vpop.f32.mrf.mxu1 }
 0x3e8   : > { %v5593_v50 = vpop.f32.mrf.mxu0 }
 0x3f0   : > { %v5597_v53 = vpop.f32.mrf.mxu0 }
 0x3f8   : > { %v5601_v55 = vpop.f32.mrf.mxu0 }
 0x400   : > { %v1865_v40 = vpop.f32.mrf.mxu0 }
 0x401   : > { %v5612_v62 = vadd.f32 %v1944_v39, %v1865_v40 }
 0x408   : > { %v5617_v4 = vpop.f32.mrf.mxu0 }
 0x410   : > { %v5625_v3 = vpop.f32.mrf.mxu0 }
 0x418   : > { %v5633_v7 = vpop.f32.mrf.mxu0 }
 0x420   : > { %v5642_v11 = vpop.f32.mrf.mxu0 }
 0x428   : > { %v2380_v12 = vpop.f32.mrf.mxu0 }
 0x429   : > { %v2381_v49 = vadd.f32 %v5574_v9, %v2380_v12  ;;  %v2341_v12 = vpop.f32.mrf.mxu3 }
 0x42b   : > { %v2390_v17 = vmul.f32 0.2, %v2381_v49 }
 0x42d   : > { %v2394_v21 = vmax.f32 %v2381_v49, %v2390_v17 }
 0x430   : > { %v2382_v15 = vpop.f32.mrf.mxu0 }
 0x431   : > { %v2383_v18 = vadd.f32 %v5574_v9, %v2382_v15  ;;  %v5694_v49 = vpop.f32.mrf.mxu3  ;;  %v4755_v15 = vld [vmem:[%s5917_s5 + $0x90] sm:$0xff] }
 0x432   : > { %2590 = vmatpush.bf16.msra.mxu2 %v4755_v15  ;;  %v4800_v15 = vld [vmem:[%s5915_s3 + $0xf8] sm:$0xff] }
 0x433   : > { %v2391_v19 = vmul.f32 0.2, %v2383_v18 }
 0x435   : > { %v2395_v59 = vmax.f32 %v2383_v18, %v2391_v19  ;;  %v4754_v18 = vld [vmem:[%s5917_s5 + $0x88] sm:$0xff]  ;;  %v4753_v19 = vld [vmem:[%s5917_s5 + $0x80] sm:$0xff] }
 0x436   : > { %2591 = vmatpush.bf16.msra.mxu2 %v4754_v18 }
 0x437   : > { %v2398_v22 = vpack.c.bf16 %v2395_v59, %v2394_v21  ;;  %v4770_v21 = vld [vmem:[%s5915_s3 + $0x38] sm:$0xff]  ;;  %v2210_v59 = vpop.f32.mrf.mxu1 }
 0x438   : > { %v2385_v23 = vpop.f32.mrf.mxu0 }
 0x439   : > { %2472 = vmatmul.bf16.vlgmr.msra.gmra.mxu1 %v2398_v22  ;;  %v2386_v24 = vadd.f32 %v5574_v9, %v2385_v23  ;;  %v5702_v17 = vpop.f32.mrf.mxu3  ;;  %v4769_v22 = vld [vmem:[%s5915_s3 + $0x30] sm:$0xff]  ;;  %v2204_v23 = vadd.f32 %v2203_v51, %v5617_v4  ;;  %v4767_v4 = vld [vmem:[%s5915_s3 + $0x20] sm:$0xff] }
 0x43a   : > { %3039 = vmatpush.bf16.msra.mxu1 %v5097_v37  ;;  %2592 = vmatpush.bf16.msra.mxu2 %v4753_v19 }
 0x43b   : > { %v2392_v27 = vmul.f32 0.2, %v2386_v24 }
 0x43d   : > { %v2396_v30 = vmax.f32 %v2386_v24, %v2392_v27  ;;  %v2346_v27 = vadd.f32 %v2336_v38, %v2204_v23 }
 0x43e   : > { %2855 = vmatpush.bf16.msrb.mxu2 %v4770_v21  ;;  %v4799_v21 = vld [vmem:[%s5915_s3 + $0xf0] sm:$0xff] }
 0x440   : > { %v2387_v26 = vpop.f32.mrf.mxu0 }
 0x441   : > { %v2388_v28 = vadd.f32 %v5574_v9, %v2387_v26  ;;  %v5710_v20 = vpop.f32.mrf.mxu3  ;;  %v4790_v26 = vld [vmem:[%s5915_s3 + $0xb8] sm:$0xff] }
 0x442   : > { %2856 = vmatpush.bf16.msrb.mxu2 %v4769_v22  ;;  %2988 = vmatpush.bf16.msrb.mxu0 %v4790_v26 }
 0x443   : > { %v2393_v29 = vmul.f32 0.2, %v2388_v28 }
 0x445   : > { %v2397_v1 = vmax.f32 %v2388_v28, %v2393_v29 }
 0x446   : > { %2857 = vmatpush.bf16.msrb.mxu2 %v4768_v25 }
 0x447   : > { %v2399_v31 = vpack.c.bf16 %v2397_v1, %v2396_v30  ;;  %v4789_v30 = vld [vmem:[%s5915_s3 + $0xb0] sm:$0xff]  ;;  %v2206_v1 = vadd.f32 %v2205_v58, %v5625_v3 }
 0x448   : > { %v2704_v32 = vpop.f32.mrf.mxu0  ;;  %2989 = vmatpush.bf16.msrb.mxu0 %v4789_v30  ;;  %v4765_v3 = vld [vmem:[%s5915_s3 + $0x10] sm:$0xff] }
 0x449   : > { %2477 = vmatmul.bf16.gmra.mxu1 %v2399_v31  ;;  %v2705_v33 = vadd.f32 %v5574_v9, %v2704_v32  ;;  %v5719_v24 = vpop.f32.mrf.mxu3 }
 0x44a   : > { %2858 = vmatpush.bf16.msrb.mxu2 %v4767_v4 }
 0x44b   : > { %v2714_v37 = vmul.f32 0.2, %v2705_v33 }
 0x44c   : > { %2990 = vmatpush.bf16.msrb.mxu0 %v4788_v34 }
 0x44d   : > { %v2718_v41 = vmax.f32 %v2705_v33, %v2714_v37  ;;  %v4766_v33 = vld [vmem:[%s5915_s3 + $0x18] sm:$0xff] }
 0x44e   : > { %2859 = vmatpush.bf16.msrb.mxu2 %v4766_v33 }
 0x450   : > { %v2706_v35 = vpop.f32.mrf.mxu0 }
 0x451   : > { %v2707_v36 = vadd.f32 %v5574_v9, %v2706_v35  ;;  %v5735_v32 = vpop.f32.mrf.mxu3  ;;  %v2347_v35 = vadd.f32 %v2338_v63, %v2206_v1 }
 0x452   : > { %2860 = vmatpush.bf16.msrb.mxu2 %v4765_v3  ;;  %v4797_v3 = vld [vmem:[%s5915_s3 + $0xe0] sm:$0xff] }
 0x453   : > { %v2715_v2 = vmul.f32 0.2, %v2707_v36 }
 0x455   : > { %v2719_v42 = vmax.f32 %v2707_v36, %v2715_v2  ;;  %v4787_v2 = vld [vmem:[%s5915_s3 + $0xa0] sm:$0xff] }
 0x456   : > { %2991 = vmatpush.bf16.msrb.mxu0 %v4787_v2 }
 0x457   : > { %v2722_v43 = vpack.c.bf16 %v2719_v42, %v2718_v41  ;;  %v2209_v42 = vadd.f32 %v2208_v16, %v5633_v7  ;;  %v4784_v16 = vld [vmem:[%s5915_s3 + $0x88] sm:$0xff] }
 0x458   : > { %v2709_v44 = vpop.f32.mrf.mxu0 }
 0x459   : > { %2796 = vmatmul.bf16.vlgmr.msrb.gmra.mxu1 %v2722_v43  ;;  %v2710_v45 = vadd.f32 %v5574_v9, %v2709_v44 }
 0x45b   : > { %v2716_v60 = vmul.f32 0.2, %v2710_v45 }
 0x45d   : > { %v2720_v61 = vmax.f32 %v2710_v45, %v2716_v60  ;;  %v4764_v45 = vld [vmem:[%s5915_s3 + $0x8] sm:$0xff]  ;;  %v2904_v60 = vpop.f32.mrf.mxu3 }
 0x45e   : > { %2861 = vmatpush.bf16.msrb.mxu2 %v4764_v45  ;;  %v2905_v38 = vadd.f32 %v5574_v9, %v2904_v60  ;;  %v4796_v45 = vld [vmem:[%s5915_s3 + $0xd8] sm:$0xff] }
 0x460   : > { %v2711_v57 = vpop.f32.mrf.mxu0  ;;  %v2914_v58 = vmul.f32 0.2, %v2905_v38 }
 0x461   : > { %v2712_v39 = vadd.f32 %v5574_v9, %v2711_v57 }
 0x462   : > { %v2918_v23 = vmax.f32 %v2905_v38, %v2914_v58 }
 0x463   : > { %v2717_v40 = vmul.f32 0.2, %v2712_v39 }
 0x465   : > { %v2721_v47 = vmax.f32 %v2712_v39, %v2717_v40  ;;  %v4786_v39 = vld [vmem:[%s5915_s3 + $0x98] sm:$0xff]  ;;  %v2348_v40 = vadd.f32 %v2341_v12, %v2209_v42  ;;  %v2906_v14 = vpop.f32.mrf.mxu3 }
 0x466   : > { %2992 = vmatpush.bf16.msrb.mxu0 %v4786_v39  ;;  %v2907_v19 = vadd.f32 %v5574_v9, %v2906_v14  ;;  %v2639_v39 = vadd.f32 %v5574_v9, %v5702_v17 }
 0x467   : > { %v2723_v48 = vpack.c.bf16 %v2721_v47, %v2720_v61 }
 0x468   : > { %v2915_v25 = vmul.f32 0.2, %v2907_v19 }
 0x469   : > { %2801 = vmatmul.bf16.gmra.mxu1 %v2723_v48  ;;  %v4763_v48 = vld [vmem:[%s5915_s3] sm:$0xff] }
 0x46a   : > { %2862 = vmatpush.bf16.msrb.mxu2 %v4763_v48  ;;  %2993 = vmatpush.bf16.msrb.mxu0 %v4785_v0  ;;  %v2648_v0 = vmul.f32 0.2, %v2639_v39 }
 0x46d   : > { %v2909_v1 = vpop.f32.mrf.mxu3 }
 0x46e   : > { %2994 = vmatpush.bf16.msrb.mxu0 %v4784_v16 }
 0x479   : > { %4508 = vmatmul.msk.bf16.vlgmr.msra.gmra.mxu1 %vm639_vm1, %v4791_v8 }
 0x489   : > { %4509 = vmatmul.msk.bf16.gmra.mxu1 %vm639_vm1, %v4792_v10  ;;  %v2211_v10 = vadd.f32 %v2210_v59, %v5642_v11  ;;  %v4783_v59 = vld [vmem:[%s5915_s3 + $0x80] sm:$0xff] }
 0x48a   : > { %2995 = vmatpush.bf16.msrb.mxu0 %v4783_v59 }
 0x48b   : > { %v2349_v11 = vadd.f32 %v5694_v49, %v2211_v10  ;;  %v5784_v49 = vld [vmem:[%s5916_s4] ss:$0 sm:$0xff] }
 0x48c   : > { %v4793_v10 = vld [vmem:[%s5915_s3 + $0xc0] sm:$0xff] }
 0x4b6   : > { %v2473_v28 = vpop.f32.mrf.mxu1 }
 0x4b7   : > { %v2483_v29 = vadd.f32 %v2473_v28, %v2346_v27  ;;  %v2919_v28 = vmax.f32 %v2907_v19, %v2915_v25 }
 0x4b9   : > { %v2487_v31 = vadd.f32 %v5373_v56, %v2483_v29  ;;  %v4798_v29 = vld [vmem:[%s5915_s3 + $0xe8] sm:$0xff]  ;;  %v2922_v30 = vpack.c.bf16 %v2919_v28, %v2918_v23 }
 0x4bb   : > { %v2491_v37 = vmul.f32 0.2, %v2487_v31  ;;  %2996 = vmatmul.bf16.vlgmr.msrb.gmra.mxu0 %v2922_v30 }
 0x4bd   : > { %v2495_v43 = vmax.f32 %v2487_v31, %v2491_v37 }
 0x4be   : > { %v2475_v36 = vpop.f32.mrf.mxu1 }
 0x4bf   : > { %v2484_v41 = vadd.f32 %v2475_v36, %v2347_v35  ;;  %v2499_v61 = vpack.c.bf16 %v2495_v43, %v2495_v43  ;;  %v2910_v36 = vadd.f32 %v5574_v9, %v2909_v1 }
 0x4c1   : > { %v2488_v44 = vadd.f32 %v5373_v56, %v2484_v41  ;;  %v2529_v63 = vunpack.c.l.b16 %v2499_v61 }
 0x4c3   : > { %v2492_v57 = vmul.f32 0.2, %v2488_v44 }
 0x4c5   : > { %v2496_v47 = vmax.f32 %v2488_v44, %v2492_v57  ;;  %v2911_v44 = vpop.f32.mrf.mxu3 }
 0x4c6   : > { %v2478_v7 = vpop.f32.mrf.mxu1  ;;  %v2912_v57 = vadd.f32 %v5574_v9, %v2911_v44 }
 0x4c7   : > { %v2500_v5 = vpack.c.bf16 %v2496_v47, %v2496_v47  ;;  %v4833_v6 = vpack.c.bf16 %v2496_v47, %v2495_v43  ;;  %v2485_v8 = vadd.f32 %v2478_v7, %v2348_v40  ;;  %v2916_v43 = vmul.f32 0.2, %v2910_v36  ;;  %v4795_v7 = vld [vmem:[%s5915_s3 + $0xd0] sm:$0xff] }
 0x4c8   : > { %v2641_v40 = vadd.f32 %v5574_v9, %v5710_v20  ;;  %v2917_v47 = vmul.f32 0.2, %v2912_v57  ;;  %v2652_v20 = vmax.f32 %v2639_v39, %v2648_v0 }
 0x4c9   : > { %4853 = vst [vmem:[%s5383_s19 + $0x20] sm:$0xff] %v4833_v6   ;;  %v2530_v51 = vunpack.c.l.b16 %v2500_v5  ;;  %v2489_v12 = vadd.f32 %v5373_v56, %v2485_v8  ;;  %v2920_v61 = vmax.f32 %v2910_v36, %v2916_v43  ;;  %v4794_v8 = vld [vmem:[%s5915_s3 + $0xc8] sm:$0xff]  ;;  %v1940_v36 = vadd.f32 %v5595_v52, %v5597_v53  ;;  %v4808_v43 = vld [vmem:[%s5917_s5 + $0xf8] sm:$0xff]  ;;  %v4807_v52 = vld [vmem:[%s5917_s5 + $0xf0] sm:$0xff] }
 0x4ca   : > { %v2921_v48 = vmax.f32 %v2912_v57, %v2917_v47  ;;  %v2649_v5 = vmul.f32 0.2, %v2641_v40  ;;  %3246 = vmatpush.bf16.msrb.mxu1 %v4808_v43  ;;  %4865 = vmatpush.bf16.msra.mxu3 %v4808_v43  ;;  %v4806_v53 = vld [vmem:[%s5917_s5 + $0xe8] sm:$0xff] }
 0x4cb   : > { %v2533_v13 = vpack.c.b16 %v2530_v51, %v2529_v63  ;;  %v2493_v18 = vmul.f32 0.2, %v2489_v12  ;;  %v4802_v57 = vld [vmem:[%s5917_s5 + $0xc8] sm:$0xff] }
 0x4cc   : > { %v2923_v6 = vpack.c.bf16 %v2921_v48, %v2920_v61  ;;  %v2653_v38 = vmax.f32 %v2641_v40, %v2649_v5  ;;  %v4801_v40 = vld [vmem:[%s5917_s5 + $0xc0] sm:$0xff] }
 0x4cd   : > { %2593 = vmatmul.bf16.vlgmr.msra.gmra.mxu2 %v2533_v13  ;;  %v2497_v26 = vmax.f32 %v2489_v12, %v2493_v18  ;;  %v2644_v12 = vadd.f32 %v5574_v9, %v5719_v24  ;;  %v2646_v13 = vadd.f32 %v5574_v9, %v5735_v32 }
 0x4ce   : > { %v2480_v56 = vpop.f32.mrf.mxu1  ;;  %3125 = vmatpush.bf16.msra.mxu2 %v4800_v15  ;;  %3001 = vmatmul.bf16.gmra.mxu0 %v2923_v6  ;;  %v2656_v63 = vpack.c.bf16 %v2653_v38, %v2652_v20 }
 0x4cf   : > { %v2486_v22 = vadd.f32 %v2480_v56, %v2349_v11  ;;  %v2501_v33 = vpack.c.bf16 %v2497_v26, %v2497_v26  ;;  %v2650_v58 = vmul.f32 0.2, %v2644_v12  ;;  %v2651_v14 = vmul.f32 0.2, %v2646_v13  ;;  %3247 = vmatpush.bf16.msrb.mxu1 %v4807_v52  ;;  %4866 = vmatpush.bf16.msra.mxu3 %v4807_v52 }
 0x4d1   : > { %v2490_v27 = vadd.f32 %v5784_v49, %v2486_v22  ;;  %v2531_v2 = vunpack.c.l.b16 %v2501_v33  ;;  %v2654_v16 = vmax.f32 %v2644_v12, %v2650_v58  ;;  %v2655_v11 = vmax.f32 %v2646_v13, %v2651_v14 }
 0x4d2   : > { %3126 = vmatpush.bf16.msra.mxu2 %v4799_v21  ;;  %v1938_v33 = vadd.f32 %v5591_v46, %v5593_v50 }
 0x4d3   : > { %v2494_v4 = vmul.f32 0.2, %v2490_v27  ;;  %v2657_v18 = vpack.c.bf16 %v2655_v11, %v2654_v16  ;;  %3248 = vmatpush.bf16.msrb.mxu1 %v4806_v53  ;;  %4867 = vmatpush.bf16.msra.mxu3 %v4806_v53 }
 0x4d5   : > { %v2498_v31 = vmax.f32 %v2490_v27, %v2494_v4 }
 0x4d6   : > { %v5790_v34 = vpop.f32.mrf.mxu1  ;;  %3127 = vmatpush.bf16.msra.mxu2 %v4798_v29 }
 0x4d7   : > { %v4838_v35 = vpack.c.bf16 %v2498_v31, %v2497_v26  ;;  %v2502_v37 = vpack.c.bf16 %v2498_v31, %v2498_v31 }
 0x4d9   : > { %4854 = vst [vmem:[%s5383_s19 + $0x28] sm:$0xff] %v4838_v35   ;;  %v2532_v41 = vunpack.c.l.b16 %v2502_v37 }
 0x4da   : > { %3128 = vmatpush.bf16.msra.mxu2 %v4797_v3 }
 0x4db   : > { %v2534_v42 = vpack.c.b16 %v2532_v41, %v2531_v2 }
 0x4dd   : > { %2598 = vmatmul.bf16.gmra.mxu2 %v2534_v42 }
 0x4de   : > { %v5801_v60 = vpop.f32.mrf.mxu1  ;;  %3129 = vmatpush.bf16.msra.mxu2 %v4796_v45  ;;  %v4803_v45 = vld [vmem:[%s5917_s5 + $0xd0] sm:$0xff] }
 0x4e2   : > { %3130 = vmatpush.bf16.msra.mxu2 %v4795_v7 }
 0x4e6   : > { %v5813_v17 = vpop.f32.mrf.mxu1  ;;  %3131 = vmatpush.bf16.msra.mxu2 %v4794_v8 }
 0x4ea   : > { %3132 = vmatpush.bf16.msra.mxu2 %v4793_v10 }
 0x4ed   : > { %2863 = vmatmul.bf16.vlgmr.msrb.gmra.mxu2 %v2656_v63 }
 0x4ee   : > { %v5818_v51 = vpop.f32.mrf.mxu1 }
 0x4f6   : > { %v3041_v15 = vpop.f32.mrf.mxu1 }
 0x4f7   : > { %v3042_v21 = vadd.f32 %v5574_v9, %v3041_v15 }
 0x4f9   : > { %v3051_v22 = vmul.f32 0.2, %v3042_v21 }
 0x4fb   : > { %v3055_v24 = vmax.f32 %v3042_v21, %v3051_v22 }
 0x4fd   : > { %2868 = vmatmul.bf16.gmra.mxu2 %v2657_v18 }
 0x4fe   : > { %v3043_v19 = vpop.f32.mrf.mxu1 }
 0x4ff   : > { %v3044_v56 = vadd.f32 %v5574_v9, %v3043_v19 }
 0x501   : > { %v3052_v59 = vmul.f32 0.2, %v3044_v56 }
 0x503   : > { %v3056_v25 = vmax.f32 %v3044_v56, %v3052_v59 }
 0x505   : > { %v3059_v26 = vpack.c.bf16 %v3056_v25, %v3055_v24 }
 0x506   : > { %v3046_v23 = vpop.f32.mrf.mxu1 }
 0x507   : > { %v3047_v28 = vadd.f32 %v5574_v9, %v3046_v23 }
 0x509   : > { %v3053_v4 = vmul.f32 0.2, %v3047_v28 }
 0x50b   : > { %v3057_v1 = vmax.f32 %v3047_v28, %v3053_v4 }
 0x50d   : > { %3133 = vmatmul.bf16.vlgmr.msra.gmra.mxu2 %v3059_v26 }
 0x50e   : > { %v3048_v32 = vpop.f32.mrf.mxu1 }
 0x50f   : > { %v3049_v27 = vadd.f32 %v5574_v9, %v3048_v32  ;;  %v1943_v9 = vadd.f32 %v5599_v54, %v5601_v55  ;;  %v4805_v55 = vld [vmem:[%s5917_s5 + $0xe0] sm:$0xff] }
 0x510   : > { %3249 = vmatpush.bf16.msrb.mxu1 %v4805_v55  ;;  %4868 = vmatpush.bf16.msra.mxu3 %v4805_v55 }
 0x511   : > { %v3054_v29 = vmul.f32 0.2, %v3049_v27 }
 0x513   : > { %v3058_v30 = vmax.f32 %v3049_v27, %v3054_v29 }
 0x515   : > { %v3060_v31 = vpack.c.bf16 %v3058_v30, %v3057_v1 }
 0x51d   : > { %3138 = vmatmul.bf16.gmra.mxu2 %v3060_v31 }
 0x538   : > { %v2997_v61 = vpop.f32.mrf.mxu0 }
 0x540   : > { %v2999_v0 = vpop.f32.mrf.mxu0 }
 0x54b   : > { %v3002_v13 = vpop.f32.mrf.mxu0 }
 0x550   : > { %v2594_v35 = vpop.f32.mrf.mxu2 }
 0x551   : > { %v5830_v37 = vadd.f32 %v2594_v35, %v1938_v33 }
 0x558   : > { %v2596_v3 = vpop.f32.mrf.mxu2 }
 0x559   : > { %v5834_v2 = vadd.f32 %v2596_v3, %v1940_v36 }
 0x560   : > { %v2599_v41 = vpop.f32.mrf.mxu2 }
 0x561   : > { %v5838_v42 = vadd.f32 %v2599_v41, %v1943_v9  ;;  %v4899_v9 = vld [vmem:[%s5918_s6] ss:$0 sm:$0xff] }
 0x568   : > { %v2601_v46 = vpop.f32.mrf.mxu2 }
 0x569   : > { %v5844_v50 = vadd.f32 %v2601_v46, %v5612_v62  ;;  %v4804_v62 = vld [vmem:[%s5917_s5 + $0xd8] sm:$0xff] }
 0x56a   : > { %3250 = vmatpush.bf16.msrb.mxu1 %v4804_v62  ;;  %4869 = vmatpush.bf16.msra.mxu3 %v4804_v62 }
 0x56e   : > { %3251 = vmatpush.bf16.msrb.mxu1 %v4803_v45  ;;  %4870 = vmatpush.bf16.msra.mxu3 %v4803_v45 }
 0x570   : > { %v2864_v54 = vpop.f32.mrf.mxu2 }
 0x571   : > { %v2865_v7 = vadd.f32 %v2864_v54, %v5790_v34 }
 0x572   : > { %3252 = vmatpush.bf16.msrb.mxu1 %v4802_v57  ;;  %4871 = vmatpush.bf16.msra.mxu3 %v4802_v57  ;;  %v3324_v57 = vld [vmem:[%s5383_s19 + $0x18] sm:$0xff] (%p5002_p5)  }
 0x573   : > { %v3007_v48 = vadd.f32 %v2997_v61, %v2865_v7  ;;  %3325 = vst [vmem:[%s3295_s23 + $0x28] sm:$0xff] (%p5002_p5), %v3324_v57  }
 0x576   : > { %3253 = vmatpush.bf16.msrb.mxu1 %v4801_v40  ;;  %4872 = vmatpush.bf16.msra.mxu3 %v4801_v40  ;;  %v3332_v40 = vld [vmem:[%s5383_s19 + $0x28] sm:$0xff] (%p5002_p5)  }
 0x577   : > { %3333 = vst [vmem:[%s3295_s23 + $0x48] sm:$0xff] (%p5002_p5), %v3332_v40  }
 0x578   : > { %v2866_v44 = vpop.f32.mrf.mxu2 }
 0x579   : > { %v2867_v8 = vadd.f32 %v2866_v44, %v5801_v60 }
 0x57b   : > { %v3008_v38 = vadd.f32 %v2999_v0, %v2867_v8 }
 0x580   : > { %v2869_v39 = vpop.f32.mrf.mxu2 }
 0x581   : > { %v2870_v58 = vadd.f32 %v2869_v39, %v5813_v17  ;;  %v3004_v17 = vpop.f32.mrf.mxu0  ;;  %v3328_v39 = vld [vmem:[%s5383_s19 + $0x20] sm:$0xff] (%p5002_p5)  }
 0x582   : > { %3329 = vst [vmem:[%s3295_s23 + $0x40] sm:$0xff] (%p5002_p5), %v3328_v39  }
 0x583   : > { %v3009_v16 = vadd.f32 %v3002_v13, %v2870_v58 }
 0x588   : > { %v2871_v47 = vpop.f32.mrf.mxu2 }
 0x589   : > { %v2872_v59 = vadd.f32 %v2871_v47, %v5818_v51 }
 0x58b   : > { %v3010_v26 = vadd.f32 %v3004_v17, %v2872_v59 }
 0x590   : > { %v3134_v5 = vpop.f32.mrf.mxu2 }
 0x591   : > { %v3144_v6 = vadd.f32 %v3134_v5, %v3007_v48 }
 0x593   : > { %v3148_v20 = vadd.f32 %v5784_v49, %v3144_v6 }
 0x595   : > { %v3152_v10 = vmul.f32 0.2, %v3148_v20 }
 0x597   : > { %v3156_v14 = vmax.f32 %v3148_v20, %v3152_v10 }
 0x598   : > { %v3136_v63 = vpop.f32.mrf.mxu2 }
 0x599   : > { %v3145_v12 = vadd.f32 %v3136_v63, %v3008_v38  ;;  %v3160_v11 = vpack.c.bf16 %v3156_v14, %v3156_v14 }
 0x59b   : > { %v3149_v15 = vadd.f32 %v5784_v49, %v3145_v12  ;;  %v3190_v22 = vunpack.c.l.b16 %v3160_v11 }
 0x59d   : > { %v3153_v34 = vmul.f32 0.2, %v3149_v15 }
 0x59f   : > { %v3157_v18 = vmax.f32 %v3149_v15, %v3153_v34 }
 0x5a0   : > { %v3139_v19 = vpop.f32.mrf.mxu2 }
 0x5a1   : > { %v3161_v56 = vpack.c.bf16 %v3157_v18, %v3157_v18  ;;  %v4843_v60 = vpack.c.bf16 %v3157_v18, %v3156_v14  ;;  %v3146_v21 = vadd.f32 %v3139_v19, %v3009_v16 }
 0x5a3   : > { %4855 = vst [vmem:[%s5383_s19 + $0x30] sm:$0xff] %v4843_v60   ;;  %v3191_v23 = vunpack.c.l.b16 %v3161_v56  ;;  %v3150_v25 = vadd.f32 %v5784_v49, %v3146_v21 }
 0x5a5   : > { %v3194_v24 = vpack.c.b16 %v3191_v23, %v3190_v22  ;;  %v3154_v32 = vmul.f32 0.2, %v3150_v25 }
 0x5a7   : > { %3254 = vmatmul.bf16.vlgmr.msrb.gmra.mxu1 %v3194_v24  ;;  %v3158_v29 = vmax.f32 %v3150_v25, %v3154_v32 }
 0x5a8   : > { %v3141_v27 = vpop.f32.mrf.mxu2 }
 0x5a9   : > { %v3147_v28 = vadd.f32 %v3141_v27, %v3010_v26  ;;  %v3162_v1 = vpack.c.bf16 %v3158_v29, %v3158_v29 }
 0x5aa   : > { %v3336_v61 = vld [vmem:[%s5383_s19 + $0x30] sm:$0xff] (%p5002_p5)  }
 0x5ab   : > { %v3151_v4 = vadd.f32 %v5784_v49, %v3147_v28  ;;  %v3192_v35 = vunpack.c.l.b16 %v3162_v1  ;;  %3337 = vst [vmem:[%s3295_s23 + $0x60] sm:$0xff] (%p5002_p5), %v3336_v61  }
 0x5ad   : > { %v3155_v30 = vmul.f32 0.2, %v3151_v4 }
 0x5af   : > { %v3159_v51 = vmax.f32 %v3151_v4, %v3155_v30 }
 0x5b1   : > { %v3163_v31 = vpack.c.bf16 %v3159_v51, %v3159_v51  ;;  %v4848_v33 = vpack.c.bf16 %v3159_v51, %v3158_v29 }
 0x5b3   : > { %4856 = vst [vmem:[%s5383_s19 + $0x38] sm:$0xff] %v4848_v33   ;;  %v3193_v36 = vunpack.c.l.b16 %v3163_v31 }
 0x5b5   : > { %v3195_v3 = vpack.c.b16 %v3193_v36, %v3192_v35 }
 0x5b7   : > { %3259 = vmatmul.bf16.vlgmr.msra.gmra.mxu3 %v3195_v3 }
 0x5ba   : > { %v3340_v47 = vld [vmem:[%s5383_s19 + $0x38] sm:$0xff] (%p5002_p5)  }
 0x5bb   : > { %3341 = vst [vmem:[%s3295_s23 + $0x68] sm:$0xff] (%p5002_p5), %v3340_v47  }
 0x624   : > { %v3255_v41 = vpop.f32.mrf.mxu1 }
 0x625   : > { %v3265_v49 = vadd.f32 %v3255_v41, %v5830_v37 }
 0x627   : > { %v3273_v43 = vadd.f32 %v4899_v9, %v3265_v49 }
 0x629   : > { %3277 = vst [vmem:[%s610_s20] sm:$0xff] %v3273_v43 }
 0x62c   : > { %v3257_v46 = vpop.f32.mrf.mxu1 }
 0x62d   : > { %v3266_v52 = vadd.f32 %v3257_v46, %v5834_v2  ;;  %v3312_v2 = vld [vmem:[%s5383_s19] sm:$0xff] (%p5002_p5)  }
 0x62e   : > { %3313 = vst [vmem:[%s3295_s23] sm:$0xff] (%p5002_p5), %v3312_v2  }
 0x62f   : > { %v3274_v53 = vadd.f32 %v4899_v9, %v3266_v52 }
 0x631   : > { %3278 = vst [vmem:[%s610_s20 + $0x8] sm:$0xff] %v3274_v53 }
 0x63a   : > { %v3260_v54 = vpop.f32.mrf.mxu3 }
 0x63b   : > { %v3267_v55 = vadd.f32 %v3260_v54, %v5838_v42  ;;  %v3316_v42 = vld [vmem:[%s5383_s19 + $0x8] sm:$0xff] (%p5002_p5)  }
 0x63c   : > { %3317 = vst [vmem:[%s3295_s23 + $0x8] sm:$0xff] (%p5002_p5), %v3316_v42  }
 0x63d   : > { %v3275_v62 = vadd.f32 %v4899_v9, %v3267_v55 }
 0x63f   : > { %3279 = vst [vmem:[%s610_s20 + $0x10] sm:$0xff] %v3275_v62 }
 0x642   : > { %v3262_v44 = vpop.f32.mrf.mxu3 }
 0x643   : > { %v3268_v45 = vadd.f32 %v3262_v44, %v5844_v50  ;;  %3292 = sbr.rel (!%p5002_p5) target bundleno = 1608 (0x648), region = 93  ;;  %v3320_v50 = vld [vmem:[%s5383_s19 + $0x10] sm:$0xff] (%p5002_p5)  }
 0x644   : > { %3321 = vst [vmem:[%s3295_s23 + $0x20] sm:$0xff] (%p5002_p5), %v3320_v50  }
 0x645   : > { %v3276_v37 = vadd.f32 %v4899_v9, %v3268_v45 }
 0x647   : > { %3280 = vst [vmem:[%s610_s20 + $0x18] sm:$0xff] %v3276_v37 }
 0x648 PF: > { %p16_p11 = scmp.ge.s32.totalorder %s4990_s9, 4   ;;  %s5922_s27 = smov %s4920_s28 }
 0x649   : > { %s5923_s28 = smov %s5000_s12  ;;  %s5924_s29 = smov %s4990_s9 }
 0x64a   :  { %18 = sbr.rel (!%p16_p11) target bundleno = 2 (0x2), region = 201 }

// kernel: forward.5
= control target key start
LH: loop header
LB: loop body
LE: loop exit
PB: predicated region body
PF: predicated region fallthrough
CT: control target
= control target key end

     0   :  { %s803_s1 = inlined_call_operand.vmem [shape: bf16[512,128], index: 1, kind: input, shape index: {}]   ;;  %s804_s2 = inlined_call_operand.vmem [shape: f32[1,128], index: 2, kind: input, shape index: {}]   ;;  %s805_s0 = inlined_call_operand.vmem [shape: bf16[32,512], index: 0, kind: input, shape index: {}]   ;;  %s806_s3 = inlined_call_operand.vmem [shape: bf16[32,128], index: 3, kind: output, shape index: {}]  }
   0x1   :  { %v593_v0 = vld [vmem:[%s803_s1 + $0x38] sm:$0xff]  ;;  %v592_v4 = vld [vmem:[%s803_s1 + $0x30] sm:$0xff]  ;;  %v591_v8 = vld [vmem:[%s803_s1 + $0x28] sm:$0xff] }
   0x2   :  { %v601_v1 = vld [vmem:[%s803_s1 + $0x78] sm:$0xff]  ;;  %322 = vmatpush.bf16.msra.mxu0 %v593_v0  ;;  %v600_v5 = vld [vmem:[%s803_s1 + $0x70] sm:$0xff]  ;;  %v599_v9 = vld [vmem:[%s803_s1 + $0x68] sm:$0xff] }
   0x3   :  { %v609_v2 = vld [vmem:[%s803_s1 + $0xb8] sm:$0xff]  ;;  %341 = vmatpush.bf16.msra.mxu1 %v601_v1  ;;  %v608_v6 = vld [vmem:[%s803_s1 + $0xb0] sm:$0xff]  ;;  %v607_v10 = vld [vmem:[%s803_s1 + $0xa8] sm:$0xff] }
   0x4   :  { %v617_v3 = vld [vmem:[%s803_s1 + $0xf8] sm:$0xff]  ;;  %360 = vmatpush.bf16.msra.mxu2 %v609_v2  ;;  %v616_v7 = vld [vmem:[%s803_s1 + $0xf0] sm:$0xff]  ;;  %v615_v11 = vld [vmem:[%s803_s1 + $0xe8] sm:$0xff] }
   0x5   :  { %379 = vmatpush.bf16.msra.mxu3 %v617_v3  ;;  %v590_v12 = vld [vmem:[%s803_s1 + $0x20] sm:$0xff]  ;;  %v589_v16 = vld [vmem:[%s803_s1 + $0x18] sm:$0xff]  ;;  %v588_v20 = vld [vmem:[%s803_s1 + $0x10] sm:$0xff] }
   0x6   :  { %323 = vmatpush.bf16.msra.mxu0 %v592_v4  ;;  %v598_v13 = vld [vmem:[%s803_s1 + $0x60] sm:$0xff]  ;;  %v597_v17 = vld [vmem:[%s803_s1 + $0x58] sm:$0xff]  ;;  %v596_v21 = vld [vmem:[%s803_s1 + $0x50] sm:$0xff] }
   0x7   :  { %342 = vmatpush.bf16.msra.mxu1 %v600_v5  ;;  %v606_v14 = vld [vmem:[%s803_s1 + $0xa0] sm:$0xff]  ;;  %v605_v18 = vld [vmem:[%s803_s1 + $0x98] sm:$0xff]  ;;  %v604_v22 = vld [vmem:[%s803_s1 + $0x90] sm:$0xff] }
   0x8   :  { %361 = vmatpush.bf16.msra.mxu2 %v608_v6  ;;  %v614_v15 = vld [vmem:[%s803_s1 + $0xe0] sm:$0xff]  ;;  %v613_v19 = vld [vmem:[%s803_s1 + $0xd8] sm:$0xff]  ;;  %v612_v23 = vld [vmem:[%s803_s1 + $0xd0] sm:$0xff] }
   0x9   :  { %380 = vmatpush.bf16.msra.mxu3 %v616_v7  ;;  %v587_v24 = vld [vmem:[%s803_s1 + $0x8] sm:$0xff]  ;;  %v586_v28 = vld [vmem:[%s803_s1] sm:$0xff]  ;;  %v580_v33 = vld [vmem:[%s805_s0 + $0xc] sm:$0xf0] }
   0xa   :  { %324 = vmatpush.bf16.msra.mxu0 %v591_v8  ;;  %v595_v25 = vld [vmem:[%s803_s1 + $0x48] sm:$0xff]  ;;  %v594_v29 = vld [vmem:[%s803_s1 + $0x40] sm:$0xff]  ;;  %v422_v35 = vld [vmem:[%s805_s0 + $0x10] sm:$0xf0] }
   0xb   :  { %343 = vmatpush.bf16.msra.mxu1 %v599_v9  ;;  %v603_v26 = vld [vmem:[%s803_s1 + $0x88] sm:$0xff]  ;;  %v602_v30 = vld [vmem:[%s803_s1 + $0x80] sm:$0xff]  ;;  %v581_v37 = vld [vmem:[%s805_s0 + $0x14] sm:$0xf0] }
   0xc   :  { %362 = vmatpush.bf16.msra.mxu2 %v607_v10  ;;  %v611_v27 = vld [vmem:[%s803_s1 + $0xc8] sm:$0xff]  ;;  %v610_v31 = vld [vmem:[%s803_s1 + $0xc0] sm:$0xff]  ;;  %v430_v39 = vld [vmem:[%s805_s0 + $0x18] sm:$0xf0] }
   0xd   :  { %381 = vmatpush.bf16.msra.mxu3 %v615_v11  ;;  %v420_v32 = vld [vmem:[%s805_s0] sm:$0xf]  ;;  %v578_v34 = vld [vmem:[%s805_s0 + $0x4] sm:$0xf]  ;;  %v428_v36 = vld [vmem:[%s805_s0 + $0x8] sm:$0xf] }
   0xe   :  { %325 = vmatpush.bf16.msra.mxu0 %v590_v12  ;;  %v579_v38 = vld [vmem:[%s805_s0 + $0xc] sm:$0xf]  ;;  %v421_v40 = vor.u32 %v580_v33, %v420_v32  ;;  %v425_v41 = vor.u32 %v578_v34, %v422_v35  ;;  %v429_v42 = vor.u32 %v581_v37, %v428_v36  ;;  %v436_v44 = vld [vmem:[%s805_s0 + $0x20] sm:$0xf]  ;;  %v584_v45 = vld [vmem:[%s805_s0 + $0x2c] sm:$0xf0] }
   0xf   :  { %344 = vmatpush.bf16.msra.mxu1 %v598_v13  ;;  %v433_v43 = vor.u32 %v579_v38, %v430_v39  ;;  %v582_v46 = vld [vmem:[%s805_s0 + $0x24] sm:$0xf]  ;;  %v438_v47 = vld [vmem:[%s805_s0 + $0x30] sm:$0xf0]  ;;  %v444_v48 = vld [vmem:[%s805_s0 + $0x28] sm:$0xf]  ;;  %v437_v52 = vor.u32 %v584_v45, %v436_v44 }
  0x10   :  { %363 = vmatpush.bf16.msra.mxu2 %v606_v14  ;;  %v585_v49 = vld [vmem:[%s805_s0 + $0x34] sm:$0xf0]  ;;  %v583_v50 = vld [vmem:[%s805_s0 + $0x2c] sm:$0xf]  ;;  %v446_v51 = vld [vmem:[%s805_s0 + $0x38] sm:$0xf0]  ;;  %v441_v53 = vor.u32 %v582_v46, %v438_v47 }
  0x11   :  { %382 = vmatpush.bf16.msra.mxu3 %v614_v15  ;;  %v445_v54 = vor.u32 %v585_v49, %v444_v48  ;;  %v449_v55 = vor.u32 %v583_v50, %v446_v51  ;;  %v629_v56 = vld [vmem:[%s804_s2] ss:$0 sm:$0xff] }
  0x12   :  { %326 = vmatpush.bf16.msra.mxu0 %v589_v16 }
  0x13   :  { %345 = vmatpush.bf16.msra.mxu1 %v597_v17 }
  0x14   :  { %364 = vmatpush.bf16.msra.mxu2 %v605_v18 }
  0x15   :  { %383 = vmatpush.bf16.msra.mxu3 %v613_v19 }
  0x16   :  { %327 = vmatpush.bf16.msra.mxu0 %v588_v20 }
  0x17   :  { %346 = vmatpush.bf16.msra.mxu1 %v596_v21 }
  0x18   :  { %365 = vmatpush.bf16.msra.mxu2 %v604_v22 }
  0x19   :  { %384 = vmatpush.bf16.msra.mxu3 %v612_v23 }
  0x1a   :  { %328 = vmatpush.bf16.msra.mxu0 %v587_v24 }
  0x1b   :  { %347 = vmatpush.bf16.msra.mxu1 %v595_v25 }
  0x1c   :  { %366 = vmatpush.bf16.msra.mxu2 %v603_v26 }
  0x1d   :  { %385 = vmatpush.bf16.msra.mxu3 %v611_v27 }
  0x1e   :  { %329 = vmatpush.bf16.msra.mxu0 %v586_v28 }
  0x1f   :  { %348 = vmatpush.bf16.msra.mxu1 %v594_v29 }
  0x20   :  { %367 = vmatpush.bf16.msra.mxu2 %v602_v30 }
  0x21   :  { %386 = vmatpush.bf16.msra.mxu3 %v610_v31  ;;  %330 = vmatmul.bf16.vlgmr.msra.gmra.mxu0 %v421_v40 }
  0x22   :  { %349 = vmatmul.bf16.vlgmr.msra.gmra.mxu1 %v425_v41 }
  0x23   :  { %368 = vmatmul.bf16.vlgmr.msra.gmra.mxu2 %v429_v42 }
  0x24   :  { %387 = vmatmul.bf16.vlgmr.msra.gmra.mxu3 %v433_v43 }
  0x31   :  { %335 = vmatmul.bf16.gmra.mxu0 %v437_v52 }
  0x32   :  { %354 = vmatmul.bf16.gmra.mxu1 %v441_v53 }
  0x33   :  { %373 = vmatmul.bf16.gmra.mxu2 %v445_v54 }
  0x34   :  { %392 = vmatmul.bf16.gmra.mxu3 %v449_v55 }
  0x9e   :  { %v331_v57 = vpop.f32.mrf.mxu0 }
  0x9f   :  { %v350_v58 = vpop.f32.mrf.mxu1  ;;  %v332_v59 = vadd.f32 %v629_v56, %v331_v57 }
  0xa1   :  { %v351_v60 = vadd.f32 %v350_v58, %v332_v59 }
  0xa6   :  { %v369_v61 = vpop.f32.mrf.mxu2  ;;  %v333_v63 = vpop.f32.mrf.mxu0 }
  0xa7   :  { %v388_v62 = vpop.f32.mrf.mxu3  ;;  %v352_v0 = vpop.f32.mrf.mxu1  ;;  %v370_v1 = vadd.f32 %v369_v61, %v351_v60  ;;  %v334_v2 = vadd.f32 %v629_v56, %v333_v63 }
  0xa9   :  { %v389_v3 = vadd.f32 %v388_v62, %v370_v1  ;;  %v353_v4 = vadd.f32 %v352_v0, %v334_v2 }
  0xab   :  { %v398_v9 = vmul.f32 0.2, %v389_v3 }
  0xad   :  { %v402_v14 = vmax.f32 %v389_v3, %v398_v9 }
  0xae   :  { %v371_v5 = vpop.f32.mrf.mxu2  ;;  %v336_v8 = vpop.f32.mrf.mxu0 }
  0xaf   :  { %v390_v6 = vpop.f32.mrf.mxu3  ;;  %v372_v7 = vadd.f32 %v371_v5, %v353_v4  ;;  %v337_v11 = vadd.f32 %v629_v56, %v336_v8  ;;  %v355_v12 = vpop.f32.mrf.mxu1 }
  0xb1   :  { %v391_v10 = vadd.f32 %v390_v6, %v372_v7  ;;  %v356_v16 = vadd.f32 %v355_v12, %v337_v11 }
  0xb3   :  { %v399_v13 = vmul.f32 0.2, %v391_v10 }
  0xb5   :  { %v403_v15 = vmax.f32 %v391_v10, %v399_v13 }
  0xb6   :  { %v374_v17 = vpop.f32.mrf.mxu2  ;;  %v338_v20 = vpop.f32.mrf.mxu0 }
  0xb7   :  { %v393_v18 = vpop.f32.mrf.mxu3  ;;  %v621_v19 = vpack.c.bf16 %v403_v15, %v402_v14  ;;  %v375_v21 = vadd.f32 %v374_v17, %v356_v16  ;;  %v339_v22 = vadd.f32 %v629_v56, %v338_v20  ;;  %v357_v23 = vpop.f32.mrf.mxu1 }
  0xb9   :  { %622 = vst [vmem:[%s806_s3] sm:$0xff] %v621_v19   ;;  %v394_v24 = vadd.f32 %v393_v18, %v375_v21  ;;  %v358_v25 = vadd.f32 %v357_v23, %v339_v22 }
  0xbb   :  { %v400_v29 = vmul.f32 0.2, %v394_v24 }
  0xbd   :  { %v404_v32 = vmax.f32 %v394_v24, %v400_v29 }
  0xbe   :  { %v376_v26 = vpop.f32.mrf.mxu2 }
  0xbf   :  { %v377_v27 = vadd.f32 %v376_v26, %v358_v25  ;;  %v395_v28 = vpop.f32.mrf.mxu3 }
  0xc1   :  { %v396_v30 = vadd.f32 %v395_v28, %v377_v27 }
  0xc3   :  { %v401_v31 = vmul.f32 0.2, %v396_v30 }
  0xc5   :  { %v405_v33 = vmax.f32 %v396_v30, %v401_v31 }
  0xc7   :  { %v626_v34 = vpack.c.bf16 %v405_v33, %v404_v32 }
  0xc9   :  { %628 = vst [vmem:[%s806_s3 + $0x8] sm:$0xff] %v626_v34  }

// kernel: forward.7
= control target key start
LH: loop header
LB: loop body
LE: loop exit
PB: predicated region body
PF: predicated region fallthrough
CT: control target
= control target key end

     0   :  { %s2598_s1 = inlined_call_operand.vmem [shape: bf16[2048,128], index: 1, kind: input, shape index: {}]   ;;  %s2599_s2 = inlined_call_operand.vmem [shape: f32[1,128], index: 2, kind: input, shape index: {}]   ;;  %s2600_s0 = inlined_call_operand.vmem [shape: bf16[16,2048], index: 0, kind: input, shape index: {}]   ;;  %s2601_s3 = inlined_call_operand.vmem [shape: f32[16,128], index: 3, kind: output, shape index: {}]  }
   0x1   :  { %v1967_v0 = vld [vmem:[%s2598_s1 + $0x38] sm:$0xff]  ;;  %v1966_v4 = vld [vmem:[%s2598_s1 + $0x30] sm:$0xff]  ;;  %v1965_v8 = vld [vmem:[%s2598_s1 + $0x28] sm:$0xff] }
   0x2   :  { %v1975_v1 = vld [vmem:[%s2598_s1 + $0x78] sm:$0xff]  ;;  %1138 = vmatpush.bf16.msra.mxu0 %v1967_v0  ;;  %v1974_v5 = vld [vmem:[%s2598_s1 + $0x70] sm:$0xff]  ;;  %v1973_v9 = vld [vmem:[%s2598_s1 + $0x68] sm:$0xff] }
   0x3   :  { %v1983_v2 = vld [vmem:[%s2598_s1 + $0xb8] sm:$0xff]  ;;  %1152 = vmatpush.bf16.msra.mxu1 %v1975_v1  ;;  %v1982_v6 = vld [vmem:[%s2598_s1 + $0xb0] sm:$0xff]  ;;  %v1981_v10 = vld [vmem:[%s2598_s1 + $0xa8] sm:$0xff] }
   0x4   :  { %v1991_v3 = vld [vmem:[%s2598_s1 + $0xf8] sm:$0xff]  ;;  %1166 = vmatpush.bf16.msra.mxu2 %v1983_v2  ;;  %v1990_v7 = vld [vmem:[%s2598_s1 + $0xf0] sm:$0xff]  ;;  %v1989_v11 = vld [vmem:[%s2598_s1 + $0xe8] sm:$0xff] }
   0x5   :  { %1180 = vmatpush.bf16.msra.mxu3 %v1991_v3  ;;  %v1964_v12 = vld [vmem:[%s2598_s1 + $0x20] sm:$0xff]  ;;  %v1963_v16 = vld [vmem:[%s2598_s1 + $0x18] sm:$0xff]  ;;  %v1962_v20 = vld [vmem:[%s2598_s1 + $0x10] sm:$0xff] }
   0x6   :  { %1139 = vmatpush.bf16.msra.mxu0 %v1966_v4  ;;  %v1972_v13 = vld [vmem:[%s2598_s1 + $0x60] sm:$0xff]  ;;  %v1971_v17 = vld [vmem:[%s2598_s1 + $0x58] sm:$0xff]  ;;  %v1970_v21 = vld [vmem:[%s2598_s1 + $0x50] sm:$0xff] }
   0x7   :  { %1153 = vmatpush.bf16.msra.mxu1 %v1974_v5  ;;  %v1980_v14 = vld [vmem:[%s2598_s1 + $0xa0] sm:$0xff]  ;;  %v1979_v18 = vld [vmem:[%s2598_s1 + $0x98] sm:$0xff]  ;;  %v1978_v22 = vld [vmem:[%s2598_s1 + $0x90] sm:$0xff] }
   0x8   :  { %1167 = vmatpush.bf16.msra.mxu2 %v1982_v6  ;;  %v1988_v15 = vld [vmem:[%s2598_s1 + $0xe0] sm:$0xff]  ;;  %v1987_v19 = vld [vmem:[%s2598_s1 + $0xd8] sm:$0xff]  ;;  %v1986_v23 = vld [vmem:[%s2598_s1 + $0xd0] sm:$0xff] }
   0x9   :  { %1181 = vmatpush.bf16.msra.mxu3 %v1990_v7  ;;  %v1961_v24 = vld [vmem:[%s2598_s1 + $0x8] sm:$0xff]  ;;  %v1960_v28 = vld [vmem:[%s2598_s1] sm:$0xff]  ;;  %v1999_v32 = vld [vmem:[%s2598_s1 + $0x138] sm:$0xff] }
   0xa   :  { %1140 = vmatpush.bf16.msra.mxu0 %v1965_v8  ;;  %v1969_v25 = vld [vmem:[%s2598_s1 + $0x48] sm:$0xff]  ;;  %v1968_v29 = vld [vmem:[%s2598_s1 + $0x40] sm:$0xff]  ;;  %v2007_v33 = vld [vmem:[%s2598_s1 + $0x178] sm:$0xff] }
   0xb   :  { %1154 = vmatpush.bf16.msra.mxu1 %v1973_v9  ;;  %v1977_v26 = vld [vmem:[%s2598_s1 + $0x88] sm:$0xff]  ;;  %v1976_v30 = vld [vmem:[%s2598_s1 + $0x80] sm:$0xff]  ;;  %v2015_v42 = vld [vmem:[%s2598_s1 + $0x1b8] sm:$0xff] }
   0xc   :  { %1168 = vmatpush.bf16.msra.mxu2 %v1981_v10  ;;  %v1985_v27 = vld [vmem:[%s2598_s1 + $0xc8] sm:$0xff]  ;;  %v1984_v31 = vld [vmem:[%s2598_s1 + $0xc0] sm:$0xff]  ;;  %v2023_v43 = vld [vmem:[%s2598_s1 + $0x1f8] sm:$0xff] }
   0xd   :  { %1182 = vmatpush.bf16.msra.mxu3 %v1989_v11  ;;  %v1370_v34 = vld [vmem:[%s2600_s0] sm:$0xf]  ;;  %v1378_v36 = vld [vmem:[%s2600_s0 + $0x8] sm:$0xf]  ;;  %v1944_v38 = vld [vmem:[%s2600_s0 + $0x4] sm:$0xf] }
   0xe   :  { %1141 = vmatpush.bf16.msra.mxu0 %v1964_v12  ;;  %v1952_v35 = vld [vmem:[%s2600_s0 + $0x3c] sm:$0xf0]  ;;  %v1953_v37 = vld [vmem:[%s2600_s0 + $0x44] sm:$0xf0]  ;;  %v1372_v39 = vld [vmem:[%s2600_s0 + $0x40] sm:$0xf0] }
   0xf   :  { %1155 = vmatpush.bf16.msra.mxu1 %v1972_v13  ;;  %v1945_v40 = vld [vmem:[%s2600_s0 + $0xc] sm:$0xf]  ;;  %v1371_v44 = vor.u32 %v1952_v35, %v1370_v34  ;;  %v1379_v45 = vor.u32 %v1953_v37, %v1378_v36  ;;  %v1375_v46 = vor.u32 %v1944_v38, %v1372_v39  ;;  %v1998_v48 = vld [vmem:[%s2598_s1 + $0x130] sm:$0xff]  ;;  %v1996_v56 = vld [vmem:[%s2598_s1 + $0x120] sm:$0xff] }
  0x10   :  { %1169 = vmatpush.bf16.msra.mxu2 %v1980_v14  ;;  %v1380_v41 = vld [vmem:[%s2600_s0 + $0x48] sm:$0xf0]  ;;  %v2006_v49 = vld [vmem:[%s2598_s1 + $0x170] sm:$0xff]  ;;  %v2004_v57 = vld [vmem:[%s2598_s1 + $0x160] sm:$0xff] }
  0x11   :  { %1183 = vmatpush.bf16.msra.mxu3 %v1988_v15  ;;  %v1383_v47 = vor.u32 %v1945_v40, %v1380_v41  ;;  %v2014_v50 = vld [vmem:[%s2598_s1 + $0x1b0] sm:$0xff]  ;;  %v1997_v52 = vld [vmem:[%s2598_s1 + $0x128] sm:$0xff]  ;;  %v2012_v58 = vld [vmem:[%s2598_s1 + $0x1a0] sm:$0xff] }
  0x12   :  { %1142 = vmatpush.bf16.msra.mxu0 %v1963_v16  ;;  %v2022_v51 = vld [vmem:[%s2598_s1 + $0x1f0] sm:$0xff]  ;;  %v2005_v53 = vld [vmem:[%s2598_s1 + $0x168] sm:$0xff]  ;;  %v2020_v59 = vld [vmem:[%s2598_s1 + $0x1e0] sm:$0xff] }
  0x13   :  { %1156 = vmatpush.bf16.msra.mxu1 %v1971_v17  ;;  %v2013_v54 = vld [vmem:[%s2598_s1 + $0x1a8] sm:$0xff]  ;;  %v1995_v60 = vld [vmem:[%s2598_s1 + $0x118] sm:$0xff]  ;;  %v1994_v0 = vld [vmem:[%s2598_s1 + $0x110] sm:$0xff] }
  0x14   :  { %1170 = vmatpush.bf16.msra.mxu2 %v1979_v18  ;;  %v2021_v55 = vld [vmem:[%s2598_s1 + $0x1e8] sm:$0xff]  ;;  %v2003_v61 = vld [vmem:[%s2598_s1 + $0x158] sm:$0xff]  ;;  %v2002_v1 = vld [vmem:[%s2598_s1 + $0x150] sm:$0xff] }
  0x15   :  { %1184 = vmatpush.bf16.msra.mxu3 %v1987_v19  ;;  %v2011_v62 = vld [vmem:[%s2598_s1 + $0x198] sm:$0xff]  ;;  %v2010_v2 = vld [vmem:[%s2598_s1 + $0x190] sm:$0xff]  ;;  %v1993_v4 = vld [vmem:[%s2598_s1 + $0x108] sm:$0xff] }
  0x16   :  { %1143 = vmatpush.bf16.msra.mxu0 %v1962_v20  ;;  %v2019_v63 = vld [vmem:[%s2598_s1 + $0x1d8] sm:$0xff]  ;;  %v2018_v3 = vld [vmem:[%s2598_s1 + $0x1d0] sm:$0xff]  ;;  %v2001_v5 = vld [vmem:[%s2598_s1 + $0x148] sm:$0xff] }
  0x17   :  { %1157 = vmatpush.bf16.msra.mxu1 %v1970_v21  ;;  %v2009_v6 = vld [vmem:[%s2598_s1 + $0x188] sm:$0xff]  ;;  %v1992_v8 = vld [vmem:[%s2598_s1 + $0x100] sm:$0xff]  ;;  %v2031_v12 = vld [vmem:[%s2598_s1 + $0x238] sm:$0xff] }
  0x18   :  { %1171 = vmatpush.bf16.msra.mxu2 %v1978_v22  ;;  %v2017_v7 = vld [vmem:[%s2598_s1 + $0x1c8] sm:$0xff]  ;;  %v2000_v9 = vld [vmem:[%s2598_s1 + $0x140] sm:$0xff]  ;;  %v2039_v13 = vld [vmem:[%s2598_s1 + $0x278] sm:$0xff] }
  0x19   :  { %1185 = vmatpush.bf16.msra.mxu3 %v1986_v23  ;;  %v2008_v10 = vld [vmem:[%s2598_s1 + $0x180] sm:$0xff]  ;;  %v1386_v14 = vld [vmem:[%s2600_s0 + $0x10] sm:$0xf]  ;;  %v1394_v16 = vld [vmem:[%s2600_s0 + $0x18] sm:$0xf] }
  0x1a   :  { %1144 = vmatpush.bf16.msra.mxu0 %v1961_v24  ;;  %v2016_v11 = vld [vmem:[%s2598_s1 + $0x1c0] sm:$0xff]  ;;  %v1954_v15 = vld [vmem:[%s2600_s0 + $0x4c] sm:$0xf0]  ;;  %v1955_v17 = vld [vmem:[%s2600_s0 + $0x54] sm:$0xf0] }
  0x1b   :  { %1158 = vmatpush.bf16.msra.mxu1 %v1969_v25  ;;  %v1946_v18 = vld [vmem:[%s2600_s0 + $0x14] sm:$0xf]  ;;  %v1947_v20 = vld [vmem:[%s2600_s0 + $0x1c] sm:$0xf]  ;;  %v1387_v24 = vor.u32 %v1954_v15, %v1386_v14  ;;  %v1395_v25 = vor.u32 %v1955_v17, %v1394_v16  ;;  %v2045_v34 = vld [vmem:[%s2598_s1 + $0x2a8] sm:$0xff] }
  0x1c   :  { %1172 = vmatpush.bf16.msra.mxu2 %v1977_v26  ;;  %v1388_v19 = vld [vmem:[%s2600_s0 + $0x50] sm:$0xf0]  ;;  %v1396_v21 = vld [vmem:[%s2600_s0 + $0x58] sm:$0xf0]  ;;  %v2053_v35 = vld [vmem:[%s2598_s1 + $0x2e8] sm:$0xff] }
  0x1d   :  { %1186 = vmatpush.bf16.msra.mxu3 %v1985_v27  ;;  %v2047_v22 = vld [vmem:[%s2598_s1 + $0x2b8] sm:$0xff]  ;;  %v1391_v26 = vor.u32 %v1946_v18, %v1388_v19  ;;  %v1399_v27 = vor.u32 %v1947_v20, %v1396_v21  ;;  %v2028_v36 = vld [vmem:[%s2598_s1 + $0x220] sm:$0xff]  ;;  %v2077_v14 = vld [vmem:[%s2598_s1 + $0x3a8] sm:$0xff] }
  0x1e   :  { %1145 = vmatpush.bf16.msra.mxu0 %v1960_v28  ;;  %v2055_v23 = vld [vmem:[%s2598_s1 + $0x2f8] sm:$0xff]  ;;  %v2030_v28 = vld [vmem:[%s2598_s1 + $0x230] sm:$0xff]  ;;  %v2036_v37 = vld [vmem:[%s2598_s1 + $0x260] sm:$0xff] }
  0x1f   :  { %1159 = vmatpush.bf16.msra.mxu1 %v1968_v29  ;;  %v2038_v29 = vld [vmem:[%s2598_s1 + $0x270] sm:$0xff]  ;;  %v2044_v38 = vld [vmem:[%s2598_s1 + $0x2a0] sm:$0xff]  ;;  %v2027_v40 = vld [vmem:[%s2598_s1 + $0x218] sm:$0xff] }
  0x20   :  { %1173 = vmatpush.bf16.msra.mxu2 %v1976_v30  ;;  %v2046_v30 = vld [vmem:[%s2598_s1 + $0x2b0] sm:$0xff]  ;;  %v2052_v39 = vld [vmem:[%s2598_s1 + $0x2e0] sm:$0xff]  ;;  %v2035_v41 = vld [vmem:[%s2598_s1 + $0x258] sm:$0xff] }
  0x21   :  { %1187 = vmatpush.bf16.msra.mxu3 %v1984_v31  ;;  %1146 = vmatmul.bf16.vlgmr.msra.gmra.mxu0 %v1371_v44  ;;  %v2054_v31 = vld [vmem:[%s2598_s1 + $0x2f0] sm:$0xff]  ;;  %v2085_v15 = vld [vmem:[%s2598_s1 + $0x3e8] sm:$0xff]  ;;  %v2060_v16 = vld [vmem:[%s2598_s1 + $0x320] sm:$0xff] }
  0x22   :  { %1194 = vmatpush.bf16.msrb.mxu0 %v1999_v32  ;;  %1160 = vmatmul.bf16.vlgmr.msra.gmra.mxu1 %v1375_v46  ;;  %v2029_v32 = vld [vmem:[%s2598_s1 + $0x228] sm:$0xff]  ;;  %v2026_v44 = vld [vmem:[%s2598_s1 + $0x210] sm:$0xff]  ;;  %v2068_v17 = vld [vmem:[%s2598_s1 + $0x360] sm:$0xff] }
  0x23   :  { %1208 = vmatpush.bf16.msrb.mxu1 %v2007_v33  ;;  %1174 = vmatmul.bf16.vlgmr.msra.gmra.mxu2 %v1379_v45  ;;  %v2037_v33 = vld [vmem:[%s2598_s1 + $0x268] sm:$0xff]  ;;  %v2034_v45 = vld [vmem:[%s2598_s1 + $0x250] sm:$0xff]  ;;  %v2076_v18 = vld [vmem:[%s2598_s1 + $0x3a0] sm:$0xff] }
  0x24   :  { %1222 = vmatpush.bf16.msrb.mxu2 %v2015_v42  ;;  %1188 = vmatmul.bf16.vlgmr.msra.gmra.mxu3 %v1383_v47  ;;  %v2043_v42 = vld [vmem:[%s2598_s1 + $0x298] sm:$0xff]  ;;  %v2042_v46 = vld [vmem:[%s2598_s1 + $0x290] sm:$0xff]  ;;  %v2084_v19 = vld [vmem:[%s2598_s1 + $0x3e0] sm:$0xff] }
  0x25   :  { %1236 = vmatpush.bf16.msrb.mxu3 %v2023_v43  ;;  %v2051_v43 = vld [vmem:[%s2598_s1 + $0x2d8] sm:$0xff]  ;;  %v2050_v47 = vld [vmem:[%s2598_s1 + $0x2d0] sm:$0xff] }
  0x26   :  { %1195 = vmatpush.bf16.msrb.mxu0 %v1998_v48  ;;  %v2025_v48 = vld [vmem:[%s2598_s1 + $0x208] sm:$0xff]  ;;  %v2059_v20 = vld [vmem:[%s2598_s1 + $0x318] sm:$0xff] }
  0x27   :  { %1209 = vmatpush.bf16.msrb.mxu1 %v2006_v49  ;;  %v2033_v49 = vld [vmem:[%s2598_s1 + $0x248] sm:$0xff]  ;;  %v2067_v21 = vld [vmem:[%s2598_s1 + $0x358] sm:$0xff] }
  0x28   :  { %1223 = vmatpush.bf16.msrb.mxu2 %v2014_v50  ;;  %v2041_v50 = vld [vmem:[%s2598_s1 + $0x288] sm:$0xff] }
  0x29   :  { %1237 = vmatpush.bf16.msrb.mxu3 %v2022_v51  ;;  %v2049_v51 = vld [vmem:[%s2598_s1 + $0x2c8] sm:$0xff] }
  0x2a   :  { %1196 = vmatpush.bf16.msrb.mxu0 %v1997_v52  ;;  %v2024_v52 = vld [vmem:[%s2598_s1 + $0x200] sm:$0xff] }
  0x2b   :  { %1210 = vmatpush.bf16.msrb.mxu1 %v2005_v53  ;;  %v2032_v53 = vld [vmem:[%s2598_s1 + $0x240] sm:$0xff] }
  0x2c   :  { %1224 = vmatpush.bf16.msrb.mxu2 %v2013_v54  ;;  %v2040_v54 = vld [vmem:[%s2598_s1 + $0x280] sm:$0xff] }
  0x2d   :  { %1238 = vmatpush.bf16.msrb.mxu3 %v2021_v55  ;;  %v2048_v55 = vld [vmem:[%s2598_s1 + $0x2c0] sm:$0xff] }
  0x2e   :  { %1197 = vmatpush.bf16.msrb.mxu0 %v1996_v56  ;;  %v2063_v56 = vld [vmem:[%s2598_s1 + $0x338] sm:$0xff] }
  0x2f   :  { %1211 = vmatpush.bf16.msrb.mxu1 %v2004_v57  ;;  %v2071_v57 = vld [vmem:[%s2598_s1 + $0x378] sm:$0xff] }
  0x30   :  { %1225 = vmatpush.bf16.msrb.mxu2 %v2012_v58  ;;  %v1402_v58 = vld [vmem:[%s2600_s0 + $0x20] sm:$0xf] }
  0x31   :  { %1239 = vmatpush.bf16.msrb.mxu3 %v2020_v59  ;;  %v1956_v59 = vld [vmem:[%s2600_s0 + $0x5c] sm:$0xf0] }
  0x32   :  { %1198 = vmatpush.bf16.msrb.mxu0 %v1995_v60  ;;  %v1410_v60 = vld [vmem:[%s2600_s0 + $0x28] sm:$0xf] }
  0x33   :  { %1212 = vmatpush.bf16.msrb.mxu1 %v2003_v61  ;;  %v1957_v61 = vld [vmem:[%s2600_s0 + $0x64] sm:$0xf0] }
  0x34   :  { %1226 = vmatpush.bf16.msrb.mxu2 %v2011_v62  ;;  %v1948_v62 = vld [vmem:[%s2600_s0 + $0x24] sm:$0xf] }
  0x35   :  { %1240 = vmatpush.bf16.msrb.mxu3 %v2019_v63  ;;  %v1404_v63 = vld [vmem:[%s2600_s0 + $0x60] sm:$0xf0] }
  0x36   :  { %1199 = vmatpush.bf16.msrb.mxu0 %v1994_v0  ;;  %v1949_v0 = vld [vmem:[%s2600_s0 + $0x2c] sm:$0xf] }
  0x37   :  { %1213 = vmatpush.bf16.msrb.mxu1 %v2002_v1  ;;  %v1412_v1 = vld [vmem:[%s2600_s0 + $0x68] sm:$0xf0] }
  0x38   :  { %1227 = vmatpush.bf16.msrb.mxu2 %v2010_v2  ;;  %v2079_v2 = vld [vmem:[%s2598_s1 + $0x3b8] sm:$0xff] }
  0x39   :  { %1241 = vmatpush.bf16.msrb.mxu3 %v2018_v3  ;;  %v2087_v3 = vld [vmem:[%s2598_s1 + $0x3f8] sm:$0xff] }
  0x3a   :  { %1200 = vmatpush.bf16.msrb.mxu0 %v1993_v4  ;;  %v1403_v4 = vor.u32 %v1956_v59, %v1402_v58 }
  0x3b   :  { %1214 = vmatpush.bf16.msrb.mxu1 %v2001_v5  ;;  %v1411_v5 = vor.u32 %v1957_v61, %v1410_v60 }
  0x3c   :  { %1228 = vmatpush.bf16.msrb.mxu2 %v2009_v6  ;;  %v1407_v6 = vor.u32 %v1948_v62, %v1404_v63 }
  0x3d   :  { %1242 = vmatpush.bf16.msrb.mxu3 %v2017_v7  ;;  %v1415_v7 = vor.u32 %v1949_v0, %v1412_v1 }
  0x3e   :  { %1201 = vmatpush.bf16.msrb.mxu0 %v1992_v8  ;;  %v2062_v8 = vld [vmem:[%s2598_s1 + $0x330] sm:$0xff] }
  0x3f   :  { %1215 = vmatpush.bf16.msrb.mxu1 %v2000_v9  ;;  %v2070_v9 = vld [vmem:[%s2598_s1 + $0x370] sm:$0xff] }
  0x40   :  { %1229 = vmatpush.bf16.msrb.mxu2 %v2008_v10  ;;  %v2078_v10 = vld [vmem:[%s2598_s1 + $0x3b0] sm:$0xff] }
  0x41   :  { %1243 = vmatpush.bf16.msrb.mxu3 %v2016_v11  ;;  %1202 = vmatmul.bf16.vlgmr.msrb.gmra.mxu0 %v1387_v24  ;;  %v2086_v11 = vld [vmem:[%s2598_s1 + $0x3f0] sm:$0xff] }
  0x42   :  { %1250 = vmatpush.bf16.msra.mxu0 %v2031_v12  ;;  %1216 = vmatmul.bf16.vlgmr.msrb.gmra.mxu1 %v1391_v26  ;;  %v2061_v12 = vld [vmem:[%s2598_s1 + $0x328] sm:$0xff]  ;;  %v2058_v24 = vld [vmem:[%s2598_s1 + $0x310] sm:$0xff] }
  0x43   :  { %1264 = vmatpush.bf16.msra.mxu1 %v2039_v13  ;;  %1230 = vmatmul.bf16.vlgmr.msrb.gmra.mxu2 %v1395_v25  ;;  %v2069_v13 = vld [vmem:[%s2598_s1 + $0x368] sm:$0xff]  ;;  %v2066_v25 = vld [vmem:[%s2598_s1 + $0x350] sm:$0xff] }
  0x44   :  { %1278 = vmatpush.bf16.msra.mxu2 %v2047_v22  ;;  %1244 = vmatmul.bf16.vlgmr.msrb.gmra.mxu3 %v1399_v27  ;;  %v2075_v22 = vld [vmem:[%s2598_s1 + $0x398] sm:$0xff]  ;;  %v2074_v26 = vld [vmem:[%s2598_s1 + $0x390] sm:$0xff] }
  0x45   :  { %1292 = vmatpush.bf16.msra.mxu3 %v2055_v23  ;;  %v2083_v23 = vld [vmem:[%s2598_s1 + $0x3d8] sm:$0xff]  ;;  %v2082_v27 = vld [vmem:[%s2598_s1 + $0x3d0] sm:$0xff] }
  0x46   :  { %1251 = vmatpush.bf16.msra.mxu0 %v2030_v28  ;;  %v2057_v28 = vld [vmem:[%s2598_s1 + $0x308] sm:$0xff] }
  0x47   :  { %1265 = vmatpush.bf16.msra.mxu1 %v2038_v29  ;;  %v2065_v29 = vld [vmem:[%s2598_s1 + $0x348] sm:$0xff] }
  0x48   :  { %1279 = vmatpush.bf16.msra.mxu2 %v2046_v30  ;;  %v2073_v30 = vld [vmem:[%s2598_s1 + $0x388] sm:$0xff] }
  0x49   :  { %1293 = vmatpush.bf16.msra.mxu3 %v2054_v31  ;;  %v2081_v31 = vld [vmem:[%s2598_s1 + $0x3c8] sm:$0xff] }
  0x4a   :  { %1252 = vmatpush.bf16.msra.mxu0 %v2029_v32  ;;  %v2056_v32 = vld [vmem:[%s2598_s1 + $0x300] sm:$0xff] }
  0x4b   :  { %1266 = vmatpush.bf16.msra.mxu1 %v2037_v33  ;;  %v2064_v33 = vld [vmem:[%s2598_s1 + $0x340] sm:$0xff] }
  0x4c   :  { %1280 = vmatpush.bf16.msra.mxu2 %v2045_v34  ;;  %v2072_v34 = vld [vmem:[%s2598_s1 + $0x380] sm:$0xff] }
  0x4d   :  { %1294 = vmatpush.bf16.msra.mxu3 %v2053_v35  ;;  %v2080_v35 = vld [vmem:[%s2598_s1 + $0x3c0] sm:$0xff] }
  0x4e   :  { %1253 = vmatpush.bf16.msra.mxu0 %v2028_v36  ;;  %v1418_v36 = vld [vmem:[%s2600_s0 + $0x30] sm:$0xf] }
  0x4f   :  { %1267 = vmatpush.bf16.msra.mxu1 %v2036_v37  ;;  %v1958_v37 = vld [vmem:[%s2600_s0 + $0x6c] sm:$0xf0] }
  0x50   :  { %1281 = vmatpush.bf16.msra.mxu2 %v2044_v38  ;;  %v1950_v38 = vld [vmem:[%s2600_s0 + $0x34] sm:$0xf] }
  0x51   :  { %1295 = vmatpush.bf16.msra.mxu3 %v2052_v39  ;;  %v1420_v39 = vld [vmem:[%s2600_s0 + $0x70] sm:$0xf0] }
  0x52   :  { %1254 = vmatpush.bf16.msra.mxu0 %v2027_v40  ;;  %v1426_v40 = vld [vmem:[%s2600_s0 + $0x38] sm:$0xf] }
  0x53   :  { %1268 = vmatpush.bf16.msra.mxu1 %v2035_v41  ;;  %v1959_v41 = vld [vmem:[%s2600_s0 + $0x74] sm:$0xf0] }
  0x54   :  { %1282 = vmatpush.bf16.msra.mxu2 %v2043_v42  ;;  %v1951_v42 = vld [vmem:[%s2600_s0 + $0x3c] sm:$0xf] }
  0x55   :  { %1296 = vmatpush.bf16.msra.mxu3 %v2051_v43  ;;  %v1428_v43 = vld [vmem:[%s2600_s0 + $0x78] sm:$0xf0] }
  0x56   :  { %1255 = vmatpush.bf16.msra.mxu0 %v2026_v44  ;;  %v1419_v44 = vor.u32 %v1958_v37, %v1418_v36 }
  0x57   :  { %1269 = vmatpush.bf16.msra.mxu1 %v2034_v45  ;;  %v1423_v45 = vor.u32 %v1950_v38, %v1420_v39 }
  0x58   :  { %1283 = vmatpush.bf16.msra.mxu2 %v2042_v46  ;;  %v1427_v46 = vor.u32 %v1959_v41, %v1426_v40 }
  0x59   :  { %1297 = vmatpush.bf16.msra.mxu3 %v2050_v47  ;;  %v1431_v47 = vor.u32 %v1951_v42, %v1428_v43 }
  0x5a   :  { %1256 = vmatpush.bf16.msra.mxu0 %v2025_v48 }
  0x5b   :  { %1270 = vmatpush.bf16.msra.mxu1 %v2033_v49 }
  0x5c   :  { %1284 = vmatpush.bf16.msra.mxu2 %v2041_v50 }
  0x5d   :  { %1298 = vmatpush.bf16.msra.mxu3 %v2049_v51 }
  0x5e   :  { %1257 = vmatpush.bf16.msra.mxu0 %v2024_v52 }
  0x5f   :  { %1271 = vmatpush.bf16.msra.mxu1 %v2032_v53  ;;  %v2088_v53 = vld [vmem:[%s2599_s2] ss:$0 sm:$0xff] }
  0x60   :  { %1285 = vmatpush.bf16.msra.mxu2 %v2040_v54 }
  0x61   :  { %1299 = vmatpush.bf16.msra.mxu3 %v2048_v55  ;;  %1258 = vmatmul.bf16.vlgmr.msra.gmra.mxu0 %v1403_v4 }
  0x62   :  { %1306 = vmatpush.bf16.msrb.mxu0 %v2063_v56  ;;  %1272 = vmatmul.bf16.vlgmr.msra.gmra.mxu1 %v1407_v6 }
  0x63   :  { %1320 = vmatpush.bf16.msrb.mxu1 %v2071_v57  ;;  %1286 = vmatmul.bf16.vlgmr.msra.gmra.mxu2 %v1411_v5 }
  0x64   :  { %1334 = vmatpush.bf16.msrb.mxu2 %v2079_v2  ;;  %1300 = vmatmul.bf16.vlgmr.msra.gmra.mxu3 %v1415_v7 }
  0x65   :  { %1348 = vmatpush.bf16.msrb.mxu3 %v2087_v3 }
  0x66   :  { %1307 = vmatpush.bf16.msrb.mxu0 %v2062_v8 }
  0x67   :  { %1321 = vmatpush.bf16.msrb.mxu1 %v2070_v9 }
  0x68   :  { %1335 = vmatpush.bf16.msrb.mxu2 %v2078_v10 }
  0x69   :  { %1349 = vmatpush.bf16.msrb.mxu3 %v2086_v11 }
  0x6a   :  { %1308 = vmatpush.bf16.msrb.mxu0 %v2061_v12 }
  0x6b   :  { %1322 = vmatpush.bf16.msrb.mxu1 %v2069_v13 }
  0x6c   :  { %1336 = vmatpush.bf16.msrb.mxu2 %v2077_v14 }
  0x6d   :  { %1350 = vmatpush.bf16.msrb.mxu3 %v2085_v15 }
  0x6e   :  { %1309 = vmatpush.bf16.msrb.mxu0 %v2060_v16 }
  0x6f   :  { %1323 = vmatpush.bf16.msrb.mxu1 %v2068_v17 }
  0x70   :  { %1337 = vmatpush.bf16.msrb.mxu2 %v2076_v18 }
  0x71   :  { %1351 = vmatpush.bf16.msrb.mxu3 %v2084_v19 }
  0x72   :  { %1310 = vmatpush.bf16.msrb.mxu0 %v2059_v20 }
  0x73   :  { %1324 = vmatpush.bf16.msrb.mxu1 %v2067_v21 }
  0x74   :  { %1338 = vmatpush.bf16.msrb.mxu2 %v2075_v22 }
  0x75   :  { %1352 = vmatpush.bf16.msrb.mxu3 %v2083_v23 }
  0x76   :  { %1311 = vmatpush.bf16.msrb.mxu0 %v2058_v24 }
  0x77   :  { %1325 = vmatpush.bf16.msrb.mxu1 %v2066_v25 }
  0x78   :  { %1339 = vmatpush.bf16.msrb.mxu2 %v2074_v26 }
  0x79   :  { %1353 = vmatpush.bf16.msrb.mxu3 %v2082_v27 }
  0x7a   :  { %1312 = vmatpush.bf16.msrb.mxu0 %v2057_v28 }
  0x7b   :  { %1326 = vmatpush.bf16.msrb.mxu1 %v2065_v29 }
  0x7c   :  { %1340 = vmatpush.bf16.msrb.mxu2 %v2073_v30 }
  0x7d   :  { %1354 = vmatpush.bf16.msrb.mxu3 %v2081_v31 }
  0x7e   :  { %1313 = vmatpush.bf16.msrb.mxu0 %v2056_v32 }
  0x7f   :  { %1327 = vmatpush.bf16.msrb.mxu1 %v2064_v33 }
  0x80   :  { %1341 = vmatpush.bf16.msrb.mxu2 %v2072_v34 }
  0x81   :  { %1355 = vmatpush.bf16.msrb.mxu3 %v2080_v35  ;;  %1314 = vmatmul.bf16.vlgmr.msrb.gmra.mxu0 %v1419_v44 }
  0x82   :  { %1328 = vmatmul.bf16.vlgmr.msrb.gmra.mxu1 %v1423_v45 }
  0x83   :  { %1342 = vmatmul.bf16.vlgmr.msrb.gmra.mxu2 %v1427_v46 }
  0x84   :  { %1356 = vmatmul.bf16.vlgmr.msrb.gmra.mxu3 %v1431_v47 }
  0x9e   :  { %v1147_v48 = vpop.f32.mrf.mxu0 }
  0x9f   :  { %v1161_v49 = vpop.f32.mrf.mxu1  ;;  %v1148_v55 = vadd.f32 %v2088_v53, %v1147_v48 }
  0xa1   :  { %v1162_v58 = vadd.f32 %v1161_v49, %v1148_v55 }
  0xa6   :  { %v1175_v50 = vpop.f32.mrf.mxu2  ;;  %v1149_v52 = vpop.f32.mrf.mxu0 }
  0xa7   :  { %v1189_v51 = vpop.f32.mrf.mxu3  ;;  %v1163_v54 = vpop.f32.mrf.mxu1  ;;  %v1176_v61 = vadd.f32 %v1175_v50, %v1162_v58  ;;  %v1150_v62 = vadd.f32 %v2088_v53, %v1149_v52 }
  0xa9   :  { %v1190_v1 = vadd.f32 %v1189_v51, %v1176_v61  ;;  %v1164_v2 = vadd.f32 %v1163_v54, %v1150_v62 }
  0xae   :  { %v1177_v56 = vpop.f32.mrf.mxu2 }
  0xaf   :  { %v1191_v57 = vpop.f32.mrf.mxu3  ;;  %v1178_v6 = vadd.f32 %v1177_v56, %v1164_v2 }
  0xb1   :  { %v1192_v10 = vadd.f32 %v1191_v57, %v1178_v6 }
  0xbe   :  { %v1203_v59 = vpop.f32.mrf.mxu0 }
  0xbf   :  { %v1217_v60 = vpop.f32.mrf.mxu1  ;;  %v1204_v4 = vadd.f32 %v1203_v59, %v1190_v1 }
  0xc1   :  { %v1218_v7 = vadd.f32 %v1217_v60, %v1204_v4 }
  0xc6   :  { %v1231_v63 = vpop.f32.mrf.mxu2  ;;  %v1205_v3 = vpop.f32.mrf.mxu0 }
  0xc7   :  { %v1245_v0 = vpop.f32.mrf.mxu3  ;;  %v1219_v5 = vpop.f32.mrf.mxu1  ;;  %v1232_v12 = vadd.f32 %v1231_v63, %v1218_v7  ;;  %v1206_v14 = vadd.f32 %v1205_v3, %v1192_v10 }
  0xc9   :  { %v1246_v15 = vadd.f32 %v1245_v0, %v1232_v12  ;;  %v1220_v18 = vadd.f32 %v1219_v5, %v1206_v14 }
  0xce   :  { %v1233_v8 = vpop.f32.mrf.mxu2 }
  0xcf   :  { %v1247_v9 = vpop.f32.mrf.mxu3  ;;  %v1234_v20 = vadd.f32 %v1233_v8, %v1220_v18 }
  0xd1   :  { %v1248_v24 = vadd.f32 %v1247_v9, %v1234_v20 }
  0xde   :  { %v1259_v11 = vpop.f32.mrf.mxu0 }
  0xdf   :  { %v1273_v13 = vpop.f32.mrf.mxu1  ;;  %v1260_v19 = vadd.f32 %v1259_v11, %v1246_v15 }
  0xe1   :  { %v1274_v22 = vadd.f32 %v1273_v13, %v1260_v19 }
  0xe6   :  { %v1287_v16 = vpop.f32.mrf.mxu2  ;;  %v1261_v21 = vpop.f32.mrf.mxu0 }
  0xe7   :  { %v1301_v17 = vpop.f32.mrf.mxu3  ;;  %v1275_v23 = vpop.f32.mrf.mxu1  ;;  %v1288_v25 = vadd.f32 %v1287_v16, %v1274_v22  ;;  %v1262_v26 = vadd.f32 %v1261_v21, %v1248_v24 }
  0xe9   :  { %v1302_v29 = vadd.f32 %v1301_v17, %v1288_v25  ;;  %v1276_v31 = vadd.f32 %v1275_v23, %v1262_v26 }
  0xee   :  { %v1289_v27 = vpop.f32.mrf.mxu2 }
  0xef   :  { %v1303_v28 = vpop.f32.mrf.mxu3  ;;  %v1290_v34 = vadd.f32 %v1289_v27, %v1276_v31 }
  0xf1   :  { %v1304_v38 = vadd.f32 %v1303_v28, %v1290_v34 }
  0xfe   :  { %v1315_v30 = vpop.f32.mrf.mxu0 }
  0xff   :  { %v1316_v32 = vadd.f32 %v1315_v30, %v1302_v29  ;;  %v1329_v33 = vpop.f32.mrf.mxu1 }
 0x101   :  { %v1330_v35 = vadd.f32 %v1329_v33, %v1316_v32 }
 0x106   :  { %v1343_v36 = vpop.f32.mrf.mxu2  ;;  %v1317_v40 = vpop.f32.mrf.mxu0 }
 0x107   :  { %v1357_v37 = vpop.f32.mrf.mxu3  ;;  %v1344_v39 = vadd.f32 %v1343_v36, %v1330_v35  ;;  %v1318_v42 = vadd.f32 %v1317_v40, %v1304_v38  ;;  %v1331_v43 = vpop.f32.mrf.mxu1 }
 0x109   :  { %v1358_v41 = vadd.f32 %v1357_v37, %v1344_v39  ;;  %v1332_v44 = vadd.f32 %v1331_v43, %v1318_v42 }
 0x10b   :  { %1362 = vst [vmem:[%s2601_s3] sm:$0xff] %v1358_v41 }
 0x10e   :  { %v1345_v45 = vpop.f32.mrf.mxu2 }
 0x10f   :  { %v1346_v46 = vadd.f32 %v1345_v45, %v1332_v44  ;;  %v1359_v47 = vpop.f32.mrf.mxu3 }
 0x111   :  { %v1360_v48 = vadd.f32 %v1359_v47, %v1346_v46 }
 0x113   :  { %1363 = vst [vmem:[%s2601_s3 + $0x8] sm:$0xff] %v1360_v48 }

</bundles_post_ra>
